<compile_context>
chip_gen: v5e
topology: v5e:2x2
jax: 0.10.0
libtpu: 0.0.40
codegen_flags: <defaults>
</compile_context>

<pallas_src>
import functools
import math

import jax
import jax.numpy as jnp
from jax import lax
from jax.experimental import pallas as pl
from jax.experimental.pallas import tpu as pltpu

NEG_INF = -1e30  # stand-in for float('-inf') in masked_fill (underflows to 0 in exp)


def _round_up(x, m):
    return ((x + m - 1) // m) * m


def _hw_defaults():
    """Generation-aware (max query tile, vmem limit) defaults."""
    vmem_cap = None
    try:
        vmem_cap = pltpu.get_tpu_info().vmem_capacity_bytes
    except Exception:
        pass  # interpret mode / info unavailable -> conservative 128-MiB assumptions
    if vmem_cap is not None and vmem_cap <= 64 * 1024 * 1024:   # v7x-class (64 MiB)
        return 128, 40 * 1024 * 1024
    return 512, 96 * 1024 * 1024                                # v5e / v6e (128 MiB)


def _pick_tq(s_pad, max_tq):
    if s_pad <= max_tq:
        return s_pad
    best = 8
    for cand in range(8, max_tq + 1, 8):
        if s_pad % cand == 0:
            best = cand
    return best


def _layer_norm(x, gamma, beta, eps=1e-6):
    mean = jnp.mean(x, axis=-1, keepdims=True)
    var = jnp.mean(jnp.square(x - mean), axis=-1, keepdims=True)
    return (x - mean) * lax.rsqrt(var + eps) * gamma + beta


def _output_path(x_q, prior_tile, v, wf, bf, g2, b2, mxu_dtype):
    """prior @ V -> residual -> LayerNorm -> feed-forward -> residual."""
    attn_out = jnp.dot(prior_tile.astype(mxu_dtype), v,
                       preferred_element_type=jnp.float32)        # (TQ, D)
    res1 = x_q + attn_out                                         # dropout == identity
    x2n = _layer_norm(res1, g2, b2)
    ff = jnp.dot(x2n.astype(mxu_dtype), wf,
                 preferred_element_type=jnp.float32) + bf
    return res1 + ff                                              # dropout == identity


def _gct_attn_kernel(x_ref, pad_row_ref, pad_col_ref, prior_ref,
                     wq_ref, bq_ref, wkv_ref, bkv_ref, wf_ref, bf_ref,
                     g1_ref, b1_ref, g2_ref, b2_ref,
                     out_ref, attn_ref,
                     k_scr, v_scr, *, d_model, mxu_dtype, approx_recip):
    tq = out_ref.shape[1]
    s_pad = attn_ref.shape[2]
    qi = pl.program_id(1)

    g1, b1 = g1_ref[...], b1_ref[...]
    g2, b2 = g2_ref[...], b2_ref[...]

    # ---- per-batch K / V cache: LN(full seq) + fused KV projection, once ----
    @pl.when(qi == 0)
    def _():
        xn_full = _layer_norm(x_ref[0], g1, b1)                   # (S, D)
        kv = jnp.dot(xn_full.astype(mxu_dtype), wkv_ref[...],
                     preferred_element_type=jnp.float32) + bkv_ref[...]
        k_scr[...] = kv[:, :d_model].astype(k_scr.dtype)
        v_scr[...] = kv[:, d_model:].astype(v_scr.dtype)

    q_start = pl.multiple_of(qi * tq, tq)
    x_q = x_ref[0, pl.ds(q_start, tq), :]                         # (TQ, D)

    # ---- layer output: prior @ V path (used downstream) ---------------------
    out = _output_path(x_q, prior_ref[0], v_scr[...],
                       wf_ref[...], bf_ref[...], g2, b2, mxu_dtype)
    out_ref[0] = out.astype(out_ref.dtype)

    # ---- attention weights (1/sqrt(d_model) folded into Wq/bq on host) ------
    xn_q = _layer_norm(x_q, g1, b1)
    q = jnp.dot(xn_q.astype(mxu_dtype), wq_ref[...],
                preferred_element_type=jnp.float32) + bq_ref[...]  # (TQ, D)

    # scores[i, j] = q[i] . k[j]  — contract last dims (no explicit k.T).
    scores = lax.dot_general(q.astype(mxu_dtype), k_scr[...],
                             (((1,), (1,)), ((), ())),
                             preferred_element_type=jnp.float32)   # (TQ, S)

    # Standard lower-triangular causal mask generated in-kernel; key padding
    # (including the lane-padding of S) is masked via pad_row.
    row_ids = lax.broadcasted_iota(jnp.int32, (tq, s_pad), 0) + q_start
    col_ids = lax.broadcasted_iota(jnp.int32, (tq, s_pad), 1)
    combined = (row_ids >= col_ids) & (pad_row_ref[0] > 0.5)       # (TQ, S)

    scores = jnp.where(combined, scores, NEG_INF)
    row_any = jnp.any(combined, axis=-1, keepdims=True)            # (TQ, 1)
    scores = jnp.where(row_any, scores, 0.0)

    m = jnp.max(scores, axis=-1, keepdims=True)
    e = jnp.exp(scores - m)
    denom = jnp.sum(e, axis=-1, keepdims=True)
    if approx_recip:
        attn = e * pl.reciprocal(denom, approx=True)               # EUP slot
    else:
        attn = e / denom                                           # exact path
    attn = jnp.where(row_any, attn, 0.0) * pad_col_ref[0]          # query-side pad
    attn_ref[0] = attn.astype(attn_ref.dtype)


def _gct_noattn_kernel(x_ref, prior_ref, wv_ref, bv_ref, wf_ref, bf_ref,
                       g1_ref, b1_ref, g2_ref, b2_ref,
                       out_ref, v_scr, *, mxu_dtype):
    tq = out_ref.shape[1]
    qi = pl.program_id(1)
    g1, b1 = g1_ref[...], b1_ref[...]
    g2, b2 = g2_ref[...], b2_ref[...]

    @pl.when(qi == 0)
    def _():
        xn_full = _layer_norm(x_ref[0], g1, b1)
        v = jnp.dot(xn_full.astype(mxu_dtype), wv_ref[...],
                    preferred_element_type=jnp.float32) + bv_ref[...]
        v_scr[...] = v.astype(v_scr.dtype)

    q_start = pl.multiple_of(qi * pl.num_programs(1) * 0 + qi * tq, tq)
    x_q = x_ref[0, pl.ds(q_start, tq), :]
    out = _output_path(x_q, prior_ref[0], v_scr[...],
                       wf_ref[...], bf_ref[...], g2, b2, mxu_dtype)
    out_ref[0] = out.astype(out_ref.dtype)


def gct_layer_pallas(seq_emds, pad_masks, causal_masks, priors, params, *,
                     return_attn=True, mxu_dtype=jnp.bfloat16,
                     out_dtype=jnp.float32, attn_dtype=None,
                     tq=None, vmem_limit_bytes=None,
                     check_causal_is_tril=False):
    B, S, D = seq_emds.shape

    if check_causal_is_tril:
        tril = jnp.tril(jnp.ones((S, S), jnp.float32))
        assert bool(jnp.all((causal_masks > 0.5) == (tril > 0.5))), \
            "kernel assumes a standard lower-triangular causal mask"
    # TODO(synk): support arbitrary per-batch causal masks by streaming the
    # (B,S,S) mask as an extra bf16 input instead of regenerating tril in-kernel.
    del causal_masks

    is_bf16 = jnp.dtype(mxu_dtype) == jnp.dtype(jnp.bfloat16)
    prior_dtype = jnp.bfloat16 if is_bf16 else jnp.float32
    if attn_dtype is None:
        attn_dtype = prior_dtype

    # ---- generation-aware tiling --------------------------------------------
    max_tq, default_vmem = _hw_defaults()
    if vmem_limit_bytes is None:
        vmem_limit_bytes = default_vmem

    # ---- lane-dense padding of the sequence axis (unpadded after the call) --
    S_pad = _round_up(S, 128)
    if tq is None:
        tq = _pick_tq(S_pad, max_tq)
    assert S_pad % tq == 0 and tq % 8 == 0, "bad query tile size"
    n_q = S_pad // tq

    x = seq_emds.astype(jnp.float32)
    prior = priors.astype(prior_dtype)
    pad = pad_masks.astype(jnp.float32)
    if S_pad != S:
        extra = S_pad - S
        x = jnp.pad(x, ((0, 0), (0, extra), (0, 0)))
        prior = jnp.pad(prior, ((0, 0), (0, extra), (0, extra)))
        pad = jnp.pad(pad, ((0, 0), (0, extra)))
    pad_row = pad.reshape(B, 1, S_pad)
    pad_col = pad.reshape(B, S_pad, 1)

    # PyTorch Linear weights are (out, in); pre-transpose so the kernel does
    # x @ W, pre-cast to the MXU dtype (halves weight HBM traffic in bf16).
    wf_m = params["wf"].T.astype(mxu_dtype)
    bf = params["bf"].reshape(1, D).astype(jnp.float32)
    g1 = params["g1"].reshape(1, D).astype(jnp.float32)
    b1 = params["b1"].reshape(1, D).astype(jnp.float32)
    g2 = params["g2"].reshape(1, D).astype(jnp.float32)
    b2 = params["b2"].reshape(1, D).astype(jnp.float32)

    bmap_bfull = lambda b, q: (b, 0, 0)
    bmap_qtile = lambda b, q: (b, q, 0)
    shared2d = lambda b, q: (0, 0)

    x_spec = pl.BlockSpec((1, S_pad, D), bmap_bfull)       # resident per batch
    prior_spec = pl.BlockSpec((1, tq, S_pad), bmap_qtile)
    out_spec = pl.BlockSpec((1, tq, D), bmap_qtile)
    mat = lambda m, n: pl.BlockSpec((m, n), shared2d)
    vec = lambda n: pl.BlockSpec((1, n), shared2d)

    cparams = pltpu.CompilerParams(
        # batch axis parallel (megacore / v7x 2 TCs); q axis carries K/V scratch.
        dimension_semantics=("parallel", "arbitrary"),
        vmem_limit_bytes=vmem_limit_bytes)

    out_shape_main = jax.ShapeDtypeStruct((B, S_pad, D), out_dtype)

    if return_attn:
        inv_sqrt_d = 1.0 / math.sqrt(float(D))
        # Fold 1/sqrt(d_model) into the query projection (q only feeds attn).
        wq_m = (params["wq"].T * inv_sqrt_d).astype(mxu_dtype)
        bq = (params["bq"] * inv_sqrt_d).reshape(1, D).astype(jnp.float32)
        # Fused K/V projection weight: one (D, 2D) matmul fills the 256-wide MXU.
        wkv_m = jnp.concatenate([params["wk"].T, params["wv"].T],
                                axis=1).astype(mxu_dtype)
        bkv = jnp.concatenate([params["bk"], params["bv"]]
                              ).reshape(1, 2 * D).astype(jnp.float32)

        kernel = pl.pallas_call(
            functools.partial(_gct_attn_kernel, d_model=D, mxu_dtype=mxu_dtype,
                              approx_recip=is_bf16),
            out_shape=(out_shape_main,
                       jax.ShapeDtypeStruct((B, S_pad, S_pad), attn_dtype)),
            grid_spec=pltpu.PrefetchScalarGridSpec(
                num_scalar_prefetch=0,
                grid=(B, n_q),
                in_specs=[
                    x_spec,                                   # seq_emds (full seq)
                    pl.BlockSpec((1, 1, S_pad), bmap_bfull),  # pad (key side)
                    pl.BlockSpec((1, tq, 1), bmap_qtile),     # pad (query side)
                    prior_spec,                               # priors (mxu dtype)
                    mat(D, D), vec(D),                        # Wq/sqrt(d), bq/sqrt(d)
                    mat(D, 2 * D), vec(2 * D),                # [Wk|Wv], [bk|bv]
                    mat(D, D), vec(D),                        # Wff, bff
                    vec(D), vec(D),                           # LN1 gamma/beta
                    vec(D), vec(D),                           # LN2 gamma/beta
                ],
                out_specs=[out_spec,
                           pl.BlockSpec((1, tq, S_pad), bmap_qtile)],
                scratch_shapes=[pltpu.VMEM((S_pad, D), mxu_dtype),   # K cache
                                pltpu.VMEM((S_pad, D), mxu_dtype)],  # V cache
            ),
            compiler_params=cparams,
        )
        out_p, attn_p = kernel(x, pad_row, pad_col, prior,
                               wq_m, bq, wkv_m, bkv, wf_m, bf,
                               g1, b1, g2, b2)
        return out_p[:, :S, :], attn_p[:, :S, :S]

    wv_m = params["wv"].T.astype(mxu_dtype)
    bv = params["bv"].reshape(1, D).astype(jnp.float32)
    kernel = pl.pallas_call(
        functools.partial(_gct_noattn_kernel, mxu_dtype=mxu_dtype),
        out_shape=out_shape_main,
        grid_spec=pltpu.PrefetchScalarGridSpec(
            num_scalar_prefetch=0,
            grid=(B, n_q),
            in_specs=[x_spec, prior_spec,
                      mat(D, D), vec(D),        # Wv, bv
                      mat(D, D), vec(D),        # Wff, bff
                      vec(D), vec(D),           # LN1
                      vec(D), vec(D)],          # LN2
            out_specs=out_spec,
            scratch_shapes=[pltpu.VMEM((S_pad, D), mxu_dtype)],  # V cache
        ),
        compiler_params=cparams,
    )
    out_p = kernel(x, prior, wv_m, bv, wf_m, bf, g1, b1, g2, b2)
    return out_p[:, :S, :]


def gct_layer_reference(seq_emds, pad_masks, causal_masks, priors, p):
    """Pure-JAX reference mirroring the PyTorch forward (eval mode)."""
    def ln(x, g, b, eps=1e-6):
        m = x.mean(-1, keepdims=True)
        v = ((x - m) ** 2).mean(-1, keepdims=True)
        return (x - m) / jnp.sqrt(v + eps) * g + b

    x = seq_emds.astype(jnp.float32)
    d = x.shape[-1]
    xn = ln(x, p["g1"], p["b1"])
    q = xn @ p["wq"].T + p["bq"]
    k = xn @ p["wk"].T + p["bk"]
    v = xn @ p["wv"].T + p["bv"]
    scores = jnp.einsum("bid,bjd->bij", q, k) / math.sqrt(float(d))
    combined = (pad_masks[:, None, :] > 0.5) & (causal_masks > 0.5)
    scores = jnp.where(combined, scores, NEG_INF)
    row_any = jnp.any(combined, axis=-1, keepdims=True)
    scores = jnp.where(row_any, scores, 0.0)
    attn = jax.nn.softmax(scores, axis=-1)
    attn = jnp.where(row_any, attn, 0.0)
    attn = attn * pad_masks[:, :, None]
    attn_out = jnp.einsum("bij,bjd->bid", priors.astype(jnp.float32), v)
    res1 = x + attn_out
    x2n = ln(res1, p["g2"], p["b2"])
    out = res1 + x2n @ p["wf"].T + p["bf"]
    return out, attn


if __name__ == "__main__":
    B, S, D = 2, 8, 128  # batch, seq_len, d_model

    key = jax.random.PRNGKey(0)
    keys = jax.random.split(key, 16)

    scale = 1.0 / math.sqrt(D)
    params = {
        "wq": jax.random.normal(keys[0], (D, D), jnp.float32) * scale,
        "bq": jax.random.normal(keys[1], (D,), jnp.float32) * 0.1,
        "wk": jax.random.normal(keys[2], (D, D), jnp.float32) * scale,
        "bk": jax.random.normal(keys[3], (D,), jnp.float32) * 0.1,
        "wv": jax.random.normal(keys[4], (D, D), jnp.float32) * scale,
        "bv": jax.random.normal(keys[5], (D,), jnp.float32) * 0.1,
        "wf": jax.random.normal(keys[6], (D, D), jnp.float32) * scale,
        "bf": jax.random.normal(keys[7], (D,), jnp.float32) * 0.1,
        "g1": 1.0 + 0.1 * jax.random.normal(keys[8], (D,), jnp.float32),
        "b1": 0.1 * jax.random.normal(keys[9], (D,), jnp.float32),
        "g2": 1.0 + 0.1 * jax.random.normal(keys[10], (D,), jnp.float32),
        "b2": 0.1 * jax.random.normal(keys[11], (D,), jnp.float32),
    }

    seq_emds = jax.random.normal(keys[12], (B, S, D), jnp.float32)

    # pad_masks: batch 0 fully valid, batch 1 has last 3 positions padded.
    valid_len = jnp.array([S, S - 3], dtype=jnp.int32)
    pad_masks = (jnp.arange(S)[None, :] < valid_len[:, None]).astype(jnp.float32)

    # causal_masks: standard lower-triangular (regenerated inside the kernel).
    causal_masks = jnp.broadcast_to(
        jnp.tril(jnp.ones((S, S), jnp.float32)), (B, S, S))

    # priors: row-normalized non-negative matrices.
    raw = jax.nn.relu(jax.random.normal(keys[13], (B, S, S), jnp.float32)) + 1e-3
    priors = raw / raw.sum(-1, keepdims=True)

    out_ref, attn_ref = gct_layer_reference(
        seq_emds, pad_masks, causal_masks, priors, params)

    # 1) Exact-semantics check: f32 MXU path, exact softmax divide, tight tol.
    out32, attn32 = gct_layer_pallas(seq_emds, pad_masks, causal_masks, priors,
                                     params, mxu_dtype=jnp.float32,
                                     check_causal_is_tril=True)
    out32 = jax.block_until_ready(out32)
    attn32 = jax.block_until_ready(attn32)
    assert jnp.allclose(out32, out_ref, atol=1e-3, rtol=1e-3), "f32 seq_emds mismatch"
    assert jnp.allclose(attn32, attn_ref, atol=1e-3, rtol=1e-3), "f32 attn mismatch"

    # 2) Multi-tile config (tq=64 -> n_q=2): exercises the per-batch K/V scratch
    #    cache being carried across query tiles.
    out_mt, attn_mt = gct_layer_pallas(seq_emds, pad_masks, causal_masks, priors,
                                       params, mxu_dtype=jnp.float32, tq=64)
    out_mt = jax.block_until_ready(out_mt)
    attn_mt = jax.block_until_ready(attn_mt)
    assert jnp.allclose(out_mt, out_ref, atol=1e-3, rtol=1e-3), "multi-tile out mismatch"
    assert jnp.allclose(attn_mt, attn_ref, atol=1e-3, rtol=1e-3), "multi-tile attn mismatch"

    # 3) Production config: bf16 MXU operands / bf16 priors+attn, f32 accum.
    out16, attn16 = gct_layer_pallas(seq_emds, pad_masks, causal_masks, priors,
                                     params, mxu_dtype=jnp.bfloat16)
    out16 = jax.block_until_ready(out16)
    attn16 = jax.block_until_ready(attn16)
    assert jnp.allclose(out16, out_ref, atol=5e-2, rtol=5e-2), "bf16 seq_emds mismatch"
    assert jnp.allclose(attn16.astype(jnp.float32), attn_ref,
                        atol=5e-2, rtol=5e-2), "bf16 attn mismatch"

    # 4) Fast path: attn_weights not requested -> Q/K, softmax and the (B,S,S)
    #    writeback are skipped entirely.
    out_fast = gct_layer_pallas(seq_emds, pad_masks, causal_masks, priors,
                                params, return_attn=False,
                                mxu_dtype=jnp.bfloat16)
    out_fast = jax.block_until_ready(out_fast)
    assert jnp.allclose(out_fast, out_ref, atol=5e-2, rtol=5e-2), "fast-path mismatch"

    print("KERNEL_OK")
</pallas_src>

<mosaic_0001>
module attributes {stable_mosaic.version = 11 : i64} {
  func.func @_gct_attn_kernel(%arg0: i32, %arg1: i32, %arg2: memref<1x128x128xf32, #tpu.memory_space<vmem>>, %arg3: memref<1x1x128xf32, #tpu.memory_space<vmem>>, %arg4: memref<1x128x1xf32, #tpu.memory_space<vmem>>, %arg5: memref<1x128x128xf32, #tpu.memory_space<vmem>>, %arg6: memref<128x128xf32, #tpu.memory_space<vmem>>, %arg7: memref<1x128xf32, #tpu.memory_space<vmem>>, %arg8: memref<128x256xf32, #tpu.memory_space<vmem>>, %arg9: memref<1x256xf32, #tpu.memory_space<vmem>>, %arg10: memref<128x128xf32, #tpu.memory_space<vmem>>, %arg11: memref<1x128xf32, #tpu.memory_space<vmem>>, %arg12: memref<1x128xf32, #tpu.memory_space<vmem>>, %arg13: memref<1x128xf32, #tpu.memory_space<vmem>>, %arg14: memref<1x128xf32, #tpu.memory_space<vmem>>, %arg15: memref<1x128xf32, #tpu.memory_space<vmem>>, %arg16: memref<1x128x128xf32, #tpu.memory_space<vmem>>, %arg17: memref<1x128x128xf32, #tpu.memory_space<vmem>>, %arg18: memref<128x128xf32, #tpu.memory_space<vmem>>, %arg19: memref<128x128xf32, #tpu.memory_space<vmem>>) attributes {dimension_semantics = [#tpu.dimension_semantics<parallel>, #tpu.dimension_semantics<arbitrary>], iteration_bounds = array<i64: 2, 1>, scalar_prefetch = 0 : i64, scratch_operands = 2 : i64, tpu.core_type = #tpu.core_type<tc>, window_params = [{transform_indices = @transform_0, window_bounds = array<i64: 1, 128, 128>}, {transform_indices = @transform_1, window_bounds = array<i64: 1, 1, 128>}, {transform_indices = @transform_2, window_bounds = array<i64: 1, 128, 1>}, {transform_indices = @transform_3, window_bounds = array<i64: 1, 128, 128>}, {pipeline_mode = #tpu.pipeline_mode<synchronous>, transform_indices = @transform_4, window_bounds = array<i64: 128, 128>}, {pipeline_mode = #tpu.pipeline_mode<synchronous>, transform_indices = @transform_5, window_bounds = array<i64: 1, 128>}, {pipeline_mode = #tpu.pipeline_mode<synchronous>, transform_indices = @transform_6, window_bounds = array<i64: 128, 256>}, {pipeline_mode = #tpu.pipeline_mode<synchronous>, transform_indices = @transform_7, window_bounds = array<i64: 1, 256>}, {pipeline_mode = #tpu.pipeline_mode<synchronous>, transform_indices = @transform_8, window_bounds = array<i64: 128, 128>}, {pipeline_mode = #tpu.pipeline_mode<synchronous>, transform_indices = @transform_9, window_bounds = array<i64: 1, 128>}, {pipeline_mode = #tpu.pipeline_mode<synchronous>, transform_indices = @transform_10, window_bounds = array<i64: 1, 128>}, {pipeline_mode = #tpu.pipeline_mode<synchronous>, transform_indices = @transform_11, window_bounds = array<i64: 1, 128>}, {pipeline_mode = #tpu.pipeline_mode<synchronous>, transform_indices = @transform_12, window_bounds = array<i64: 1, 128>}, {pipeline_mode = #tpu.pipeline_mode<synchronous>, transform_indices = @transform_13, window_bounds = array<i64: 1, 128>}, {transform_indices = @transform_14, window_bounds = array<i64: 1, 128, 128>}, {transform_indices = @transform_15, window_bounds = array<i64: 1, 128, 128>}]} {
    %c0 = arith.constant 0 : index
    %c0_0 = arith.constant 0 : index
    %0 = vector.load %arg12[%c0, %c0_0] : memref<1x128xf32, #tpu.memory_space<vmem>>, vector<1x128xf32>
    %c0_1 = arith.constant 0 : index
    %c0_2 = arith.constant 0 : index
    %1 = vector.load %arg13[%c0_1, %c0_2] : memref<1x128xf32, #tpu.memory_space<vmem>>, vector<1x128xf32>
    %c0_3 = arith.constant 0 : index
    %c0_4 = arith.constant 0 : index
    %2 = vector.load %arg14[%c0_3, %c0_4] : memref<1x128xf32, #tpu.memory_space<vmem>>, vector<1x128xf32>
    %c0_5 = arith.constant 0 : index
    %c0_6 = arith.constant 0 : index
    %3 = vector.load %arg15[%c0_5, %c0_6] : memref<1x128xf32, #tpu.memory_space<vmem>>, vector<1x128xf32>
    %c0_i32 = arith.constant 0 : i32
    %4 = arith.cmpi eq, %arg1, %c0_i32 : i32
    %5 = arith.extui %4 : i1 to i32
    %c0_i32_7 = arith.constant 0 : i32
    %6 = arith.cmpi ne, %5, %c0_i32_7 : i32
    scf.if %6 {
      %c0_60 = arith.constant 0 : index
      %c0_61 = arith.constant 0 : index
      %c0_62 = arith.constant 0 : index
      %121 = vector.load %arg2[%c0_60, %c0_61, %c0_62] : memref<1x128x128xf32, #tpu.memory_space<vmem>>, vector<1x128x128xf32>
      %122 = vector.shape_cast %121 : vector<1x128x128xf32> to vector<128x128xf32>
      %cst_63 = arith.constant dense<0.000000e+00> : vector<128xf32>
      %123 = vector.multi_reduction <add>, %122, %cst_63 [1] : vector<128x128xf32> to vector<128xf32>
      %124 = vector.shape_cast %123 : vector<128xf32> to vector<128x1xf32>
      %cst_64 = arith.constant 1.280000e+02 : f32
      %125 = vector.broadcast %cst_64 : f32 to vector<128x1xf32>
      %126 = arith.divf %124, %125 : vector<128x1xf32>
      %127 = vector.broadcast %126 : vector<128x1xf32> to vector<128x128xf32>
      %128 = arith.subf %122, %127 : vector<128x128xf32>
      %129 = arith.mulf %128, %128 : vector<128x128xf32>
      %cst_65 = arith.constant dense<0.000000e+00> : vector<128xf32>
      %130 = vector.multi_reduction <add>, %129, %cst_65 [1] : vector<128x128xf32> to vector<128xf32>
      %131 = vector.shape_cast %130 : vector<128xf32> to vector<128x1xf32>
      %cst_66 = arith.constant 1.280000e+02 : f32
      %132 = vector.broadcast %cst_66 : f32 to vector<128x1xf32>
      %133 = arith.divf %131, %132 : vector<128x1xf32>
      %134 = vector.broadcast %126 : vector<128x1xf32> to vector<128x128xf32>
      %135 = arith.subf %122, %134 : vector<128x128xf32>
      %cst_67 = arith.constant 9.99999997E-7 : f32
      %136 = vector.broadcast %cst_67 : f32 to vector<128x1xf32>
      %137 = arith.addf %133, %136 : vector<128x1xf32>
      %138 = math.rsqrt %137 : vector<128x1xf32>
      %139 = vector.broadcast %138 : vector<128x1xf32> to vector<128x128xf32>
      %140 = arith.mulf %135, %139 : vector<128x128xf32>
      %141 = vector.broadcast %0 : vector<1x128xf32> to vector<128x128xf32>
      %142 = arith.mulf %140, %141 : vector<128x128xf32>
      %143 = vector.broadcast %1 : vector<1x128xf32> to vector<128x128xf32>
      %144 = arith.addf %142, %143 : vector<128x128xf32>
      %c0_68 = arith.constant 0 : index
      %c0_69 = arith.constant 0 : index
      %145 = vector.load %arg8[%c0_68, %c0_69] : memref<128x256xf32, #tpu.memory_space<vmem>>, vector<128x256xf32>
      %cst_70 = arith.constant dense<0.000000e+00> : vector<128x256xf32>
      %146 = tpu.matmul %144, %145, %cst_70 {dimension_numbers = #tpu.dot_dimension_numbers<[1], [0], [0], [1], [0, 0, 1, 1], [], []>} : vector<128x128xf32>, vector<128x256xf32>, vector<128x256xf32> -> vector<128x256xf32>
      %c0_71 = arith.constant 0 : index
      %c0_72 = arith.constant 0 : index
      %147 = vector.load %arg9[%c0_71, %c0_72] : memref<1x256xf32, #tpu.memory_space<vmem>>, vector<1x256xf32>
      %148 = vector.broadcast %147 : vector<1x256xf32> to vector<128x256xf32>
      %149 = arith.addf %146, %148 : vector<128x256xf32>
      %150 = vector.extract_strided_slice %149 {offsets = [0, 0], sizes = [128, 128], strides = [1, 1]} : vector<128x256xf32> to vector<128x128xf32>
      %c0_73 = arith.constant 0 : index
      %c0_74 = arith.constant 0 : index
      %151 = vector.load %arg18[%c0_73, %c0_74] : memref<128x128xf32, #tpu.memory_space<vmem>>, vector<128x128xf32>
      tpu.vector_store %arg18[%c0_73, %c0_74], %150 {strides = array<i32>} : memref<128x128xf32, #tpu.memory_space<vmem>>, vector<128x128xf32>,
      %152 = vector.extract_strided_slice %149 {offsets = [0, 128], sizes = [128, 128], strides = [1, 1]} : vector<128x256xf32> to vector<128x128xf32>
      %c0_75 = arith.constant 0 : index
      %c0_76 = arith.constant 0 : index
      %153 = vector.load %arg19[%c0_75, %c0_76] : memref<128x128xf32, #tpu.memory_space<vmem>>, vector<128x128xf32>
      tpu.vector_store %arg19[%c0_75, %c0_76], %152 {strides = array<i32>} : memref<128x128xf32, #tpu.memory_space<vmem>>, vector<128x128xf32>,
    } else {
    }
    %c128_i32 = arith.constant 128 : i32
    %7 = arith.muli %arg1, %c128_i32 : i32
    %8 = tpu.assume_multiple %7, 128 : i32
    %c0_8 = arith.constant 0 : index
    %9 = arith.index_cast %8 : i32 to index
    %c0_9 = arith.constant 0 : index
    %10 = vector.load %arg2[%c0_8, %9, %c0_9] : memref<1x128x128xf32, #tpu.memory_space<vmem>>, vector<1x128x128xf32>
    %11 = vector.shape_cast %10 : vector<1x128x128xf32> to vector<128x128xf32>
    %c0_10 = arith.constant 0 : index
    %c0_11 = arith.constant 0 : index
    %c0_12 = arith.constant 0 : index
    %12 = vector.load %arg5[%c0_10, %c0_11, %c0_12] : memref<1x128x128xf32, #tpu.memory_space<vmem>>, vector<1x128x128xf32>
    %13 = vector.shape_cast %12 : vector<1x128x128xf32> to vector<128x128xf32>
    %c0_13 = arith.constant 0 : index
    %c0_14 = arith.constant 0 : index
    %14 = vector.load %arg19[%c0_13, %c0_14] : memref<128x128xf32, #tpu.memory_space<vmem>>, vector<128x128xf32>
    %c0_15 = arith.constant 0 : index
    %c0_16 = arith.constant 0 : index
    %15 = vector.load %arg10[%c0_15, %c0_16] : memref<128x128xf32, #tpu.memory_space<vmem>>, vector<128x128xf32>
    %c0_17 = arith.constant 0 : index
    %c0_18 = arith.constant 0 : index
    %16 = vector.load %arg11[%c0_17, %c0_18] : memref<1x128xf32, #tpu.memory_space<vmem>>, vector<1x128xf32>
    %cst = arith.constant dense<0.000000e+00> : vector<128x128xf32>
    %17 = tpu.matmul %13, %14, %cst {dimension_numbers = #tpu.dot_dimension_numbers<[1], [0], [0], [1], [0, 0, 1, 1], [], []>} : vector<128x128xf32>, vector<128x128xf32>, vector<128x128xf32> -> vector<128x128xf32>
    %18 = arith.addf %11, %17 : vector<128x128xf32>
    %cst_19 = arith.constant dense<0.000000e+00> : vector<128xf32>
    %19 = vector.multi_reduction <add>, %18, %cst_19 [1] : vector<128x128xf32> to vector<128xf32>
    %20 = vector.shape_cast %19 : vector<128xf32> to vector<128x1xf32>
    %cst_20 = arith.constant 1.280000e+02 : f32
    %21 = vector.broadcast %cst_20 : f32 to vector<128x1xf32>
    %22 = arith.divf %20, %21 : vector<128x1xf32>
    %23 = vector.broadcast %22 : vector<128x1xf32> to vector<128x128xf32>
    %24 = arith.subf %18, %23 : vector<128x128xf32>
    %25 = arith.mulf %24, %24 : vector<128x128xf32>
    %cst_21 = arith.constant dense<0.000000e+00> : vector<128xf32>
    %26 = vector.multi_reduction <add>, %25, %cst_21 [1] : vector<128x128xf32> to vector<128xf32>
    %27 = vector.shape_cast %26 : vector<128xf32> to vector<128x1xf32>
    %cst_22 = arith.constant 1.280000e+02 : f32
    %28 = vector.broadcast %cst_22 : f32 to vector<128x1xf32>
    %29 = arith.divf %27, %28 : vector<128x1xf32>
    %30 = vector.broadcast %22 : vector<128x1xf32> to vector<128x128xf32>
    %31 = arith.subf %18, %30 : vector<128x128xf32>
    %cst_23 = arith.constant 9.99999997E-7 : f32
    %32 = vector.broadcast %cst_23 : f32 to vector<128x1xf32>
    %33 = arith.addf %29, %32 : vector<128x1xf32>
    %34 = math.rsqrt %33 : vector<128x1xf32>
    %35 = vector.broadcast %34 : vector<128x1xf32> to vector<128x128xf32>
    %36 = arith.mulf %31, %35 : vector<128x128xf32>
    %37 = vector.broadcast %2 : vector<1x128xf32> to vector<128x128xf32>
    %38 = arith.mulf %36, %37 : vector<128x128xf32>
    %39 = vector.broadcast %3 : vector<1x128xf32> to vector<128x128xf32>
    %40 = arith.addf %38, %39 : vector<128x128xf32>
    %cst_24 = arith.constant dense<0.000000e+00> : vector<128x128xf32>
    %41 = tpu.matmul %40, %15, %cst_24 {dimension_numbers = #tpu.dot_dimension_numbers<[1], [0], [0], [1], [0, 0, 1, 1], [], []>} : vector<128x128xf32>, vector<128x128xf32>, vector<128x128xf32> -> vector<128x128xf32>
    %42 = vector.broadcast %16 : vector<1x128xf32> to vector<128x128xf32>
    %43 = arith.addf %41, %42 : vector<128x128xf32>
    %44 = arith.addf %18, %43 : vector<128x128xf32>
    %c0_25 = arith.constant 0 : index
    %c0_26 = arith.constant 0 : index
    %c0_27 = arith.constant 0 : index
    %45 = vector.load %arg16[%c0_25, %c0_26, %c0_27] : memref<1x128x128xf32, #tpu.memory_space<vmem>>, vector<1x128x128xf32>
    %46 = vector.shape_cast %45 : vector<1x128x128xf32> to vector<128x128xf32>
    %47 = vector.shape_cast %44 : vector<128x128xf32> to vector<1x128x128xf32>
    tpu.vector_store %arg16[%c0_25, %c0_26, %c0_27], %47 {strides = array<i32>} : memref<1x128x128xf32, #tpu.memory_space<vmem>>, vector<1x128x128xf32>,
    %cst_28 = arith.constant dense<0.000000e+00> : vector<128xf32>
    %48 = vector.multi_reduction <add>, %11, %cst_28 [1] : vector<128x128xf32> to vector<128xf32>
    %49 = vector.shape_cast %48 : vector<128xf32> to vector<128x1xf32>
    %cst_29 = arith.constant 1.280000e+02 : f32
    %50 = vector.broadcast %cst_29 : f32 to vector<128x1xf32>
    %51 = arith.divf %49, %50 : vector<128x1xf32>
    %52 = vector.broadcast %51 : vector<128x1xf32> to vector<128x128xf32>
    %53 = arith.subf %11, %52 : vector<128x128xf32>
    %54 = arith.mulf %53, %53 : vector<128x128xf32>
    %cst_30 = arith.constant dense<0.000000e+00> : vector<128xf32>
    %55 = vector.multi_reduction <add>, %54, %cst_30 [1] : vector<128x128xf32> to vector<128xf32>
    %56 = vector.shape_cast %55 : vector<128xf32> to vector<128x1xf32>
    %cst_31 = arith.constant 1.280000e+02 : f32
    %57 = vector.broadcast %cst_31 : f32 to vector<128x1xf32>
    %58 = arith.divf %56, %57 : vector<128x1xf32>
    %59 = vector.broadcast %51 : vector<128x1xf32> to vector<128x128xf32>
    %60 = arith.subf %11, %59 : vector<128x128xf32>
    %cst_32 = arith.constant 9.99999997E-7 : f32
    %61 = vector.broadcast %cst_32 : f32 to vector<128x1xf32>
    %62 = arith.addf %58, %61 : vector<128x1xf32>
    %63 = math.rsqrt %62 : vector<128x1xf32>
    %64 = vector.broadcast %63 : vector<128x1xf32> to vector<128x128xf32>
    %65 = arith.mulf %60, %64 : vector<128x128xf32>
    %66 = vector.broadcast %0 : vector<1x128xf32> to vector<128x128xf32>
    %67 = arith.mulf %65, %66 : vector<128x128xf32>
    %68 = vector.broadcast %1 : vector<1x128xf32> to vector<128x128xf32>
    %69 = arith.addf %67, %68 : vector<128x128xf32>
    %c0_33 = arith.constant 0 : index
    %c0_34 = arith.constant 0 : index
    %70 = vector.load %arg6[%c0_33, %c0_34] : memref<128x128xf32, #tpu.memory_space<vmem>>, vector<128x128xf32>
    %cst_35 = arith.constant dense<0.000000e+00> : vector<128x128xf32>
    %71 = tpu.matmul %69, %70, %cst_35 {dimension_numbers = #tpu.dot_dimension_numbers<[1], [0], [0], [1], [0, 0, 1, 1], [], []>} : vector<128x128xf32>, vector<128x128xf32>, vector<128x128xf32> -> vector<128x128xf32>
    %c0_36 = arith.constant 0 : index
    %c0_37 = arith.constant 0 : index
    %72 = vector.load %arg7[%c0_36, %c0_37] : memref<1x128xf32, #tpu.memory_space<vmem>>, vector<1x128xf32>
    %73 = vector.broadcast %72 : vector<1x128xf32> to vector<128x128xf32>
    %74 = arith.addf %71, %73 : vector<128x128xf32>
    %c0_38 = arith.constant 0 : index
    %c0_39 = arith.constant 0 : index
    %75 = vector.load %arg18[%c0_38, %c0_39] : memref<128x128xf32, #tpu.memory_space<vmem>>, vector<128x128xf32>
    %cst_40 = arith.constant dense<0.000000e+00> : vector<128x128xf32>
    %76 = tpu.matmul %74, %75, %cst_40 {dimension_numbers = #tpu.dot_dimension_numbers<[1], [1], [0], [0], [0, 0, 1, 0], [], []>} : vector<128x128xf32>, vector<128x128xf32>, vector<128x128xf32> -> vector<128x128xf32>
    %77 = tpu.iota {dimensions = array<i32: 0>} : vector<128x128xi32>
    %78 = vector.broadcast %8 : i32 to vector<128x128xi32>
    %79 = arith.addi %77, %78 : vector<128x128xi32>
    %80 = tpu.iota {dimensions = array<i32: 1>} : vector<128x128xi32>
    %81 = arith.cmpi sge, %79, %80 : vector<128x128xi32>
    %c0_41 = arith.constant 0 : index
    %c0_42 = arith.constant 0 : index
    %c0_43 = arith.constant 0 : index
    %82 = vector.load %arg3[%c0_41, %c0_42, %c0_43] : memref<1x1x128xf32, #tpu.memory_space<vmem>>, vector<1x1x128xf32>
    %83 = vector.shape_cast %82 : vector<1x1x128xf32> to vector<1x128xf32>
    %cst_44 = arith.constant 5.000000e-01 : f32
    %84 = vector.broadcast %cst_44 : f32 to vector<1x128xf32>
    %85 = arith.cmpf ogt, %83, %84 : vector<1x128xf32>
    %86 = vector.broadcast %85 : vector<1x128xi1> to vector<128x128xi1>
    %87 = arith.andi %81, %86 : vector<128x128xi1>
    %cst_45 = arith.constant -1.000000e+30 : f32
    %88 = vector.broadcast %cst_45 : f32 to vector<128x128xf32>
    %89 = arith.select %87, %76, %88 : vector<128x128xi1>, vector<128x128xf32>
    %cst_46 = arith.constant 1.000000e+00 : f32
    %cst_47 = arith.constant 0.000000e+00 : f32
    %90 = vector.broadcast %cst_46 : f32 to vector<128x128xf32>
    %91 = vector.broadcast %cst_47 : f32 to vector<128x128xf32>
    %92 = arith.select %87, %90, %91 : vector<128x128xi1>, vector<128x128xf32>
    %cst_48 = arith.constant dense<0xFF800000> : vector<128xf32>
    %93 = vector.multi_reduction <maximumf>, %92, %cst_48 [1] : vector<128x128xf32> to vector<128xf32>
    %cst_49 = arith.constant 0.000000e+00 : f32
    %94 = vector.broadcast %cst_49 : f32 to vector<128xf32>
    %95 = arith.cmpf ogt, %93, %94 : vector<128xf32>
    %96 = vector.shape_cast %95 : vector<128xi1> to vector<128x1xi1>
    %cst_50 = arith.constant 0.000000e+00 : f32
    %97 = vector.shape_cast %96 : vector<128x1xi1> to vector<128x1xi1>
    %98 = vector.broadcast %97 : vector<128x1xi1> to vector<128x128xi1>
    %99 = vector.broadcast %cst_50 : f32 to vector<128x128xf32>
    %100 = arith.select %98, %89, %99 : vector<128x128xi1>, vector<128x128xf32>
    %cst_51 = arith.constant dense<0xFF800000> : vector<128xf32>
    %101 = vector.multi_reduction <maximumf>, %100, %cst_51 [1] : vector<128x128xf32> to vector<128xf32>
    %102 = vector.shape_cast %101 : vector<128xf32> to vector<128x1xf32>
    %103 = vector.broadcast %102 : vector<128x1xf32> to vector<128x128xf32>
    %104 = arith.subf %100, %103 : vector<128x128xf32>
    %105 = math.exp %104 : vector<128x128xf32>
    %cst_52 = arith.constant dense<0.000000e+00> : vector<128xf32>
    %106 = vector.multi_reduction <add>, %105, %cst_52 [1] : vector<128x128xf32> to vector<128xf32>
    %107 = vector.shape_cast %106 : vector<128xf32> to vector<128x1xf32>
    %108 = vector.broadcast %107 : vector<128x1xf32> to vector<128x128xf32>
    %109 = arith.divf %105, %108 : vector<128x128xf32>
    %cst_53 = arith.constant 0.000000e+00 : f32
    %110 = vector.shape_cast %96 : vector<128x1xi1> to vector<128x1xi1>
    %111 = vector.broadcast %110 : vector<128x1xi1> to vector<128x128xi1>
    %112 = vector.broadcast %cst_53 : f32 to vector<128x128xf32>
    %113 = arith.select %111, %109, %112 : vector<128x128xi1>, vector<128x128xf32>
    %c0_54 = arith.constant 0 : index
    %c0_55 = arith.constant 0 : index
    %c0_56 = arith.constant 0 : index
    %114 = vector.load %arg4[%c0_54, %c0_55, %c0_56] : memref<1x128x1xf32, #tpu.memory_space<vmem>>, vector<1x128x1xf32>
    %115 = vector.shape_cast %114 : vector<1x128x1xf32> to vector<128x1xf32>
    %116 = vector.broadcast %115 : vector<128x1xf32> to vector<128x128xf32>
    %117 = arith.mulf %113, %116 : vector<128x128xf32>
    %c0_57 = arith.constant 0 : index
    %c0_58 = arith.constant 0 : index
    %c0_59 = arith.constant 0 : index
    %118 = vector.load %arg17[%c0_57, %c0_58, %c0_59] : memref<1x128x128xf32, #tpu.memory_space<vmem>>, vector<1x128x128xf32>
    %119 = vector.shape_cast %118 : vector<1x128x128xf32> to vector<128x128xf32>
    %120 = vector.shape_cast %117 : vector<128x128xf32> to vector<1x128x128xf32>
    tpu.vector_store %arg17[%c0_57, %c0_58, %c0_59], %120 {strides = array<i32>} : memref<1x128x128xf32, #tpu.memory_space<vmem>>, vector<1x128x128xf32>,
    return
  }
  func.func @transform_0(%arg0: i32, %arg1: i32) -> (i32, i32, i32) {
    %c0_i32 = arith.constant 0 : i32
    %c0_i32_0 = arith.constant 0 : i32
    %c0_i32_1 = arith.constant 0 : i32
    return %arg0, %c0_i32, %c0_i32_0 : i32, i32, i32
  }
  func.func @transform_1(%arg0: i32, %arg1: i32) -> (i32, i32, i32) {
    %c0_i32 = arith.constant 0 : i32
    %c0_i32_0 = arith.constant 0 : i32
    %c0_i32_1 = arith.constant 0 : i32
    return %arg0, %c0_i32, %c0_i32_0 : i32, i32, i32
  }
  func.func @transform_2(%arg0: i32, %arg1: i32) -> (i32, i32, i32) {
    %c0_i32 = arith.constant 0 : i32
    %c0_i32_0 = arith.constant 0 : i32
    return %arg0, %arg1, %c0_i32 : i32, i32, i32
  }
  func.func @transform_3(%arg0: i32, %arg1: i32) -> (i32, i32, i32) {
    %c0_i32 = arith.constant 0 : i32
    %c0_i32_0 = arith.constant 0 : i32
    return %arg0, %arg1, %c0_i32 : i32, i32, i32
  }
  func.func @transform_4(%arg0: i32, %arg1: i32) -> (i32, i32) {
    %c0_i32 = arith.constant 0 : i32
    %c0_i32_0 = arith.constant 0 : i32
    %c0_i32_1 = arith.constant 0 : i32
    return %c0_i32, %c0_i32_0 : i32, i32
  }
  func.func @transform_5(%arg0: i32, %arg1: i32) -> (i32, i32) {
    %c0_i32 = arith.constant 0 : i32
    %c0_i32_0 = arith.constant 0 : i32
    %c0_i32_1 = arith.constant 0 : i32
    return %c0_i32, %c0_i32_0 : i32, i32
  }
  func.func @transform_6(%arg0: i32, %arg1: i32) -> (i32, i32) {
    %c0_i32 = arith.constant 0 : i32
    %c0_i32_0 = arith.constant 0 : i32
    %c0_i32_1 = arith.constant 0 : i32
    return %c0_i32, %c0_i32_0 : i32, i32
  }
  func.func @transform_7(%arg0: i32, %arg1: i32) -> (i32, i32) {
    %c0_i32 = arith.constant 0 : i32
    %c0_i32_0 = arith.constant 0 : i32
    %c0_i32_1 = arith.constant 0 : i32
    return %c0_i32, %c0_i32_0 : i32, i32
  }
  func.func @transform_8(%arg0: i32, %arg1: i32) -> (i32, i32) {
    %c0_i32 = arith.constant 0 : i32
    %c0_i32_0 = arith.constant 0 : i32
    %c0_i32_1 = arith.constant 0 : i32
    return %c0_i32, %c0_i32_0 : i32, i32
  }
  func.func @transform_9(%arg0: i32, %arg1: i32) -> (i32, i32) {
    %c0_i32 = arith.constant 0 : i32
    %c0_i32_0 = arith.constant 0 : i32
    %c0_i32_1 = arith.constant 0 : i32
    return %c0_i32, %c0_i32_0 : i32, i32
  }
  func.func @transform_10(%arg0: i32, %arg1: i32) -> (i32, i32) {
    %c0_i32 = arith.constant 0 : i32
    %c0_i32_0 = arith.constant 0 : i32
    %c0_i32_1 = arith.constant 0 : i32
    return %c0_i32, %c0_i32_0 : i32, i32
  }
  func.func @transform_11(%arg0: i32, %arg1: i32) -> (i32, i32) {
    %c0_i32 = arith.constant 0 : i32
    %c0_i32_0 = arith.constant 0 : i32
    %c0_i32_1 = arith.constant 0 : i32
    return %c0_i32, %c0_i32_0 : i32, i32
  }
  func.func @transform_12(%arg0: i32, %arg1: i32) -> (i32, i32) {
    %c0_i32 = arith.constant 0 : i32
    %c0_i32_0 = arith.constant 0 : i32
    %c0_i32_1 = arith.constant 0 : i32
    return %c0_i32, %c0_i32_0 : i32, i32
  }
  func.func @transform_13(%arg0: i32, %arg1: i32) -> (i32, i32) {
    %c0_i32 = arith.constant 0 : i32
    %c0_i32_0 = arith.constant 0 : i32
    %c0_i32_1 = arith.constant 0 : i32
    return %c0_i32, %c0_i32_0 : i32, i32
  }
  func.func @transform_14(%arg0: i32, %arg1: i32) -> (i32, i32, i32) {
    %c0_i32 = arith.constant 0 : i32
    %c0_i32_0 = arith.constant 0 : i32
    return %arg0, %arg1, %c0_i32 : i32, i32, i32
  }
  func.func @transform_15(%arg0: i32, %arg1: i32) -> (i32, i32, i32) {
    %c0_i32 = arith.constant 0 : i32
    %c0_i32_0 = arith.constant 0 : i32
    return %arg0, %arg1, %c0_i32 : i32, i32, i32
  }
}

</mosaic_0001>

<bundles_post_ra>
// kernel: tpu_custom_call.1
= control target key start
LH: loop header
LB: loop body
LE: loop exit
PB: predicated region body
PF: predicated region fallthrough
CT: control target
= control target key end

     0   :  { %s6437_s0 = inlined_call_operand.vmem [shape: f32[2,128,128], index: 0, kind: input, shape index: {}]   ;;  %s6438_s1 = inlined_call_operand.vmem [shape: f32[2,1,128], index: 1, kind: input, shape index: {}]   ;;  %s6439_s2 = inlined_call_operand.vmem [shape: f32[2,128,1], index: 2, kind: input, shape index: {}]   ;;  %s6440_s3 = inlined_call_operand.hbm [shape: f32[2,128,128], index: 3, kind: input, shape index: {}]   ;;  %s6441_s4 = inlined_call_operand.hbm [shape: f32[128,128], index: 4, kind: input, shape index: {}]   ;;  %s6442_s5 = inlined_call_operand.hbm [shape: f32[1,128], index: 5, kind: input, shape index: {}]   ;;  %s6443_s6 = inlined_call_operand.hbm [shape: f32[128,256], index: 6, kind: input, shape index: {}]   ;;  %s6444_s7 = inlined_call_operand.vmem [shape: f32[1,256], index: 7, kind: input, shape index: {}]   ;;  %s6445_s8 = inlined_call_operand.hbm [shape: f32[128,128], index: 8, kind: input, shape index: {}]   ;;  %s6446_s9 = inlined_call_operand.vmem [shape: f32[1,128], index: 9, kind: input, shape index: {}]   ;;  %s6447_s10 = inlined_call_operand.vmem [shape: f32[1,128], index: 10, kind: input, shape index: {}]   ;;  %s6448_s11 = inlined_call_operand.vmem [shape: f32[1,128], index: 11, kind: input, shape index: {}]   ;;  %s6449_s12 = inlined_call_operand.vmem [shape: f32[1,128], index: 12, kind: input, shape index: {}]   ;;  %s6450_s13 = inlined_call_operand.vmem [shape: f32[1,128], index: 13, kind: input, shape index: {}]   ;;  %s6451_s14 = inlined_call_operand.hbm [shape: f32[2,128,128], index: 14, kind: output, shape index: {0}]   ;;  %s6452_s15 = inlined_call_operand.hbm [shape: f32[2,128,128], index: 15, kind: output, shape index: {1}]  }
   0x1   :  { %6494 = sst [smem:[#allocation43_spill]] %s6439_s2 }
   0x2   :  { %6495 = sst [smem:[#allocation44_spill]] %s6441_s4 }
   0x3   :  { %6496 = sst [smem:[#allocation45_spill]] %s6442_s5 }
   0x4   :  { %6497 = sst [smem:[#allocation46_spill]] %s6443_s6 }
   0x5   :  { %6498 = sst [smem:[#allocation47_spill]] %s6445_s8 }
   0x6   :  { %6499 = sst [smem:[#allocation48_spill]] %s6446_s9 }
   0x7   :  { %6500 = sst [smem:[#allocation49_spill]] %s6450_s13 }
   0x8   :  { %6501 = sst [smem:[#allocation50_spill]] %s6451_s14 }
   0x9   :  { %6502 = sst [smem:[#allocation51_spill]] %s6452_s15 }
   0xa   :  { %21 = vsyncpa [#allocation5], 0 }
   0xb   :  { %23 = vsyncpa [#allocation5 + $0x1], 0 }
   0xc   :  { %24 = vsyncpa [#allocation8], 0 }
   0xd   :  { %25 = vsyncpa [#allocation11], 0 }
   0xe   :  { %26 = vsyncpa [#allocation6], 0 }
   0xf   :  { %28 = vsyncpa [#allocation6 + $0x1], 0 }
  0x10   :  { %29 = vsyncpa [#allocation15], 0 }
  0x11   :  { %31 = vsyncpa [#allocation15 + $0x1], 0  ;;  %s4092_s18 = smov 0   ;;  %s4094_s19 = smov 0  }
  0x12   :  { %s4096_s20 = smov 0   ;;  %s4098_s21 = smov 0  }
  0x13   :  { %s4100_s22 = smov 0   ;;  %s4102_s23 = smov 0  }
  0x14 LB: > { %6503 = sst [smem:[#allocation21_spill]] %s3977_s18  ;;  %s6453_s24 = sadd.s32 4294967295, %s3997_s23   ;;  %s3997_s23 = sphi %s4102_s23, %s37_s23   ;;  %s3993_s22 = sphi %s4100_s22, %s6689_s22   ;;  %s3989_s21 = sphi %s4098_s21, %s6688_s21   ;;  %s3985_s20 = sphi %s4096_s20, %s6687_s20   ;;  %s3981_s19 = sphi %s4094_s19, %s6686_s19   ;;  %s3977_s18 = sphi %s4092_s18, %s6685_s18  }
  0x15   : > { %s3351_s25 = sadd.s32 4294967294, %s3997_s23   ;;  %p151_p0 = scmp.ne.s32.totalorder %s3981_s19, %s3977_s18 }
  0x16   : > { %p4128_p1 = scmp.eq.s32.totalorder %s6453_s24, 0  ;;  %p393_p2 = scmp.eq.s32.totalorder %s3351_s25, 1 }
  0x17   : > { %p3352_p4 = scmp.ge.s32.totalorder %s3997_s23, 1  ;;  %p428_p6 = scmp.lt.s32.totalorder %s3997_s23, 3 }
  0x18   : > { %p4134_p3 = por %p4128_p1, %p151_p0  ;;  %p4139_p5 = por %p393_p2, %p151_p0 }
  0x19   : > { %s6508_s4 = sld [smem:[#allocation44_spill]]  ;;  %p4147_p7 = pnand %p3352_p4, %p428_p6 }
  0x1a   : > { %s6506_s28 = scalar_select %p4139_p5, 1, 0 }
  0x1b   : > { %p3440_p8 = pneg %p4147_p7  ;;  %s3999_s25 = smov [#allocation7]  }
  0x1c   : > { %6507 = sst [smem:[#allocation22_spill]] %s6506_s28  ;;  %s441_s24 = sshll.u32 %s3999_s25, 4  ;;  %s442_s24 = int_to_ptr.vmem [resolvable:$true] %s441_s24 }
  0x1d   : > { %p4155_p9 = pnand %p3440_p8, %p4128_p1  ;;  %p3357_p10 = scmp.ge.s32.totalorder %s3997_s23, 2 }
  0x1e   : > { %s6511_s6 = sld [smem:[#allocation46_spill]]  ;;  %s6458_s28 = smov 128  }
  0x1f   : > { %s439_s16 = sshll.u32 %s6508_s4, 4  ;;  %s6460_s15 = smov 8   ;;  %s440_s16 = int_to_ptr.hbm [resolvable:$true] %s439_s16 }
  0x20   : > { %3443 = dma.hbm_to_vmem [thread:$0]  (!%p4155_p9), %s440_s16, 2048, %s442_s24, [#allocation8], %s6458_s28, %s6458_s28, %s6460_s15  }
  0x21   : > { %s4002_s25 = smov [#allocation10]   ;;  %s4003_s2 = smov 256  }
  0x22   : > { %s467_s14 = sshll.u32 %s4002_s25, 4  ;;  %s4004_s9 = smov 16   ;;  %s468_s14 = int_to_ptr.vmem [resolvable:$true] %s467_s14 }
  0x23   : > { %s6512_s5 = sld [smem:[#allocation45_spill]]  ;;  %s4005_s24 = smov [#allocation9]  }
  0x24   : > { %s465_s4 = sshll.u32 %s6511_s6, 4  ;;  %s456_s16 = sshll.u32 %s4005_s24, 4  ;;  %s466_s4 = int_to_ptr.hbm [resolvable:$true] %s465_s4  ;;  %s457_s16 = int_to_ptr.vmem [resolvable:$true] %s456_s16 }
  0x25   : > { %3449 = dma.hbm_to_vmem [thread:$0]  (!%p4155_p9), %s466_s4, 4096, %s468_s14, [#allocation11], %s4003_s2, %s4003_s2, %s4004_s9  }
  0x26   : > { %s6513_s8 = sld [smem:[#allocation47_spill]]  ;;  %s4006_s2 = smov [#allocation12]  }
  0x27   : > { %s484_s4 = sshll.u32 %s4006_s2, 4  ;;  %s6514_s9 = smov 8   ;;  %s485_s4 = int_to_ptr.vmem [resolvable:$true] %s484_s4 }
  0x28   : > { %s6515_s14 = smov 128   ;;  %s6516_s29 = sadd.s32 4294967295, %s3997_s23  }
  0x29   : > { %s454_s6 = sshll.u32 %s6512_s5, 4  ;;  %p387_p11 = scmp.eq.s32.totalorder %s6516_s29, 1  ;;  %s455_s6 = int_to_ptr.hbm [resolvable:$true] %s454_s6 }
  0x2a   : > { %3446 = dma.hbm_to_vmem [thread:$0]  (!%p4155_p9), %s455_s6, 16, %s457_s16, [#allocation8]  }
  0x2b   : > { %s49_s28 = sadd.s32 1, %s3993_s22  ;;  %s138_s30 = sadd.s32 1, %s3985_s20 }
  0x2c   : > { %s482_s15 = sshll.u32 %s6513_s8, 4  ;;  %p51_p12 = scmp.ge.s32.totalorder %s49_s28, 2  ;;  %s483_s15 = int_to_ptr.hbm [resolvable:$true] %s482_s15 }
  0x2d   : > { %3452 = dma.hbm_to_vmem [thread:$0]  (!%p4155_p9), %s483_s15, 2048, %s485_s4, [#allocation11], %s6515_s14, %s6515_s14, %s6514_s9  }
  0x2e   : > { %p145_p13 = scmp.ne.s32.totalorder %s3985_s20, %s3981_s19  ;;  %p146_p0 = scmp.eq.s32.totalorder %s3997_s23, 0 }
  0x2f   : > { %s6691_s28 = smov (%p51_p12, %s49_s28), 0  ;;  %p3468_p4 = scmp.lt.s32.totalorder %s3997_s23, 2 }
  0x30   : > { %p4192_p2 = por %p387_p11, %p145_p13  ;;  %s133_s18 = ssub.s32 %s3993_s22, %s6691_s28 }
  0x31   : > { %s540_s24 = sand.u32 1, %s3985_s20   ;;  %p136_p6 = scmp.eq.s32.totalorder %s133_s18, 0 }
  0x32   : > { %s6517_s6 = scalar_select %p4192_p2, 1, 0 }
  0x33   : > { %p147_p8 = por %p146_p0, %p145_p13  ;;  %s3358_s15 = sshll.u32 %s540_s24, 7 }
  0x34   : > { %6518 = sst [smem:[#allocation23_spill]] %s6517_s6  ;;  %s3381_s16 = sshll.u32 %s3993_s22, 7 }
  0x35   : > { %s4202_s25 = scalar_select %p136_p6, %s3985_s20, %s138_s30  }
  0x36   : > { %s551_s29 = scalar_lea.hbm %s6440_s3, %s3381_s16  ;;  %s544_s8 = scalar_lea.vmem [#allocation4], %s3358_s15 }
  0x37   : > { %s552_s5 = sshll.u32 %s551_s29, 4  ;;  %s554_s13 = sshll.u32 %s544_s8, 4  ;;  %s553_s5 = int_to_ptr.hbm [resolvable:$true] %s552_s5  ;;  %s555_s13 = int_to_ptr.vmem [resolvable:$true] %s554_s13 }
  0x38   : > { %p3454_p9 = pnand %p3468_p4, %p147_p8  ;;  %s541_s6 = scalar_lea.sflag [#allocation5], %s540_s24 }
  0x39   : > { %566 = sbr.rel (%p4147_p7) target bundleno = 1380 (0x564), region = 76 }
  0x3a   : > { %3456 = dma.hbm_to_vmem [thread:$0]  (!%p3454_p9), %s553_s5, 2048, %s555_s13, %s541_s6, %s6515_s14, %s6515_s14, %s6514_s9  }
  0x3e   : > { %s4215_s30 = sand.u32 1, %s3981_s19  }
  0x3f   : > { %s4218_s18 = sshll.u32 %s4215_s30, 7  ;;  %s569_s8 = scalar_lea.sflag [#allocation5], %s4215_s30 }
  0x40   : > { %s4222_s15 = scalar_lea.vmem [#allocation4], %s4218_s18 }
  0x41   : > { %3956 = dma.done.wait (%p4134_p3), %s569_s8, 2048  }
  0x42   : > { %3958 = vsyncadd (%p4134_p3), %s569_s8, 4294965248 }
  0x43   : > { %3960 = dma.done.wait (%p4128_p1), [#allocation8], 2064  }
  0x44   : > { %3962 = vsyncadd (%p4128_p1), [#allocation8], 4294965232 }
  0x45   : > { %3964 = dma.done.wait (%p4128_p1), [#allocation11], 6144  }
  0x46   : > { %3966 = vsyncadd (%p4128_p1), [#allocation11], 4294961152  ;;  %p662_p7 = scmp.lt.s32.totalorder %s3989_s21, 1  ;;  %v4007_v16 = vmov 128.0   ;;  %s6614_s16 = sld [smem:[#allocation49_spill]] }
  0x47   : > { %3544 = vrcp.f32 %v4007_v16  ;;  %s6625_s29 = sld [smem:[#allocation48_spill]]  ;;  %s5926_s8 = scalar_lea.vmem [#allocation13], %s4218_s18 }
  0x48   : > { %s4238_s5 = scalar_select %p662_p7, %s3989_s21, 1 }
  0x49   : > { %s6626_s26 = sld [smem:[#allocation43_spill]]  ;;  %s3126_s24 = sshll.u32 %s5926_s8, 4  ;;  %s3127_s24 = int_to_ptr.vmem [resolvable:$true] %s3126_s24 }
  0x4a   : > { %s3382_s13 = sshll.u32 %s4238_s5, 7  ;;  %s669_s14 = scalar_lea.vmem %s6438_s1, %s4238_s5 }
  0x4b   : > { %s4246_s9 = scalar_lea.vmem %s6437_s0, %s3382_s13  ;;  %s6197_s5 = scalar_lea.vmem [#allocation14], %s4218_s18 }
  0x4c   : > { %v4249_v0 = vld [vmem:[%s4246_s9 + $0x58] sm:$0xff]  ;;  %v4252_v1 = vld [vmem:[%s4246_s9 + $0x50] sm:$0xff]  ;;  %v4255_v2 = vld [vmem:[%s4246_s9 + $0x40] sm:$0xff]  ;;  %s3384_s18 = sshll.u32 %s3989_s21, 7  ;;  %s3107_s4 = scalar_lea.sflag [#allocation6], %s4215_s30 }
  0x4d   : > { %729 = vadd.xlane.f32.xlu2 %v4249_v0  ;;  %727 = vadd.xlane.f32.xlu1 %v4252_v1  ;;  %v4261_v3 = vld [vmem:[%s4246_s9 + $0x8] sm:$0xff]  ;;  %v4264_v4 = vld [vmem:[%s4246_s9] sm:$0xff]  ;;  %v4271_v7 = vld [vmem:[%s4246_s9 + $0x10] sm:$0xff]  ;;  %v3545_v17 = vpop.eup %3544 }
  0x4e   : > { %723 = vadd.xlane.f32.xlu0 %v4255_v2  ;;  %v700_v5 = vld [vmem:[%s4246_s9 + $0x48] sm:$0xff]  ;;  %v4274_v8 = vld [vmem:[%s4246_s9 + $0x60] sm:$0xff]  ;;  %v4279_v9 = vld [vmem:[%s4246_s9 + $0x70] sm:$0xff]  ;;  %v740_v18 = vmul.f32 128.0, %v3545_v17  ;;  %vm744_vm0 = vweird.f32 %v3545_v17 }
  0x4f   : > { %v704_v6 = vld [vmem:[%s4246_s9 + $0x68] sm:$0xff]  ;;  %v4282_v10 = vld [vmem:[%s4246_s9 + $0x18] sm:$0xff]  ;;  %v4290_v12 = vld [vmem:[%s4246_s9 + $0x20] sm:$0xff] }
  0x50   : > { %v4287_v11 = vld [vmem:[%s4246_s9 + $0x78] sm:$0xff]  ;;  %v4295_v13 = vld [vmem:[%s4246_s9 + $0x28] sm:$0xff]  ;;  %v4299_v14 = vld [vmem:[%s4246_s9 + $0x30] sm:$0xff]  ;;  %v741_v19 = vsub.f32 1.0, %v740_v18 }
  0x51   : > { %v4303_v15 = vld [vmem:[%s4246_s9 + $0x38] sm:$0xff] }
  0x52   : > { %v742_v20 = vmul.f32 %v3545_v17, %v741_v19 }
  0x54   : > { %v743_v21 = vadd.f32 %v3545_v17, %v742_v20 }
  0x55   : > { %709 = vadd.xlane.f32.xlu2 %v4261_v3  ;;  %707 = vadd.xlane.f32.xlu1 %v4264_v4 }
  0x56   : > { %725 = vadd.xlane.f32.xlu0 %v700_v5  ;;  %v4306_v22 = vsel %vm744_vm0, %v3545_v17, %v743_v21 }
  0x5d   : > { %733 = vadd.xlane.f32.xlu2 %v704_v6  ;;  %711 = vadd.xlane.f32.xlu1 %v4271_v7 }
  0x5e   : > { %731 = vadd.xlane.f32.xlu0 %v4274_v8 }
  0x65   : > { %735 = vadd.xlane.f32.xlu2 %v4279_v9 }
  0x66   : > { %713 = vadd.xlane.f32.xlu0 %v4282_v10 }
  0x6d   : > { %737 = vadd.xlane.f32.xlu2 %v4287_v11 }
  0x6e   : > { %715 = vadd.xlane.f32.xlu0 %v4290_v12 }
  0x76   : > { %717 = vadd.xlane.f32.xlu0 %v4295_v13 }
  0x7e   : > { %719 = vadd.xlane.f32.xlu0 %v4299_v14 }
  0x86   : > { %721 = vadd.xlane.f32.xlu0 %v4303_v15 }
  0xc0   : > { %v730_v23 = vpop.xlane.xlu2 %729  ;;  %v728_v24 = vpop.xlane.xlu1 %727 }
  0xc1   : > { %v724_v25 = vpop.xlane.xlu0 %723  ;;  %v756_v38 = vmul.f32 %v4306_v22, %v728_v24  ;;  %v757_v50 = vmul.f32 %v4306_v22, %v730_v23 }
  0xc2   : > { %v754_v26 = vmul.f32 %v4306_v22, %v724_v25  ;;  %v1102_v25 = vld [vmem:[#allocation10 + $0xf0] sm:$0xff] }
  0xc3   : > { %v4332_v45 = vsub.f32 %v4252_v1, %v756_v38  ;;  %v4348_v55 = vsub.f32 %v4249_v0, %v757_v50  ;;  %3386 = vmatpush.msra.mxu2 %v1102_v25  ;;  %1110 = vmatpush.msra.mxu0 %v1102_v25  ;;  %v1093_v50 = vld [vmem:[#allocation10 + $0xa8] sm:$0xff] }
  0xc4   : > { %v4310_v27 = vsub.f32 %v4255_v2, %v754_v26  ;;  %v1103_v26 = vld [vmem:[#allocation10 + $0xf8] sm:$0xff] }
  0xc5   : > { %v788_v51 = vmul.f32 %v4332_v45, %v4332_v45  ;;  %v789_v59 = vmul.f32 %v4348_v55, %v4348_v55  ;;  %3402 = vmatpush.msra.mxu3 %v1103_v26  ;;  %1175 = vmatpush.msra.mxu1 %v1103_v26 }
  0xc6   : > { %v786_v28 = vmul.f32 %v4310_v27, %v4310_v27 }
  0xc8   : > { %810 = vadd.xlane.f32.xlu1 %v786_v28  ;;  %v710_v29 = vpop.xlane.xlu2 %709  ;;  %v708_v30 = vpop.xlane.xlu1 %707  ;;  %v1100_v28 = vld [vmem:[#allocation10 + $0xe0] sm:$0xff] }
  0xc9   : > { %v726_v31 = vpop.xlane.xlu0 %725  ;;  %v746_v32 = vmul.f32 %v4306_v22, %v708_v30  ;;  %v747_v34 = vmul.f32 %v4306_v22, %v710_v29  ;;  %v1101_v30 = vld [vmem:[#allocation10 + $0xe8] sm:$0xff]  ;;  %3387 = vmatpush.msra.mxu2 %v1100_v28  ;;  %1111 = vmatpush.msra.mxu0 %v1100_v28 }
  0xca   : > { %v755_v33 = vmul.f32 %v4306_v22, %v726_v31  ;;  %3403 = vmatpush.msra.mxu3 %v1101_v30  ;;  %1176 = vmatpush.msra.mxu1 %v1101_v30 }
  0xcb   : > { %v4318_v35 = vsub.f32 %v4264_v4, %v746_v32  ;;  %v4328_v40 = vsub.f32 %v4261_v3, %v747_v34 }
  0xcc   : > { %v4320_v36 = vsub.f32 %v700_v5, %v755_v33 }
  0xcd   : > { %v778_v37 = vmul.f32 %v4318_v35, %v4318_v35  ;;  %v779_v47 = vmul.f32 %v4328_v40, %v4328_v40 }
  0xce   : > { %v787_v39 = vmul.f32 %v4320_v36, %v4320_v36 }
  0xcf   : > { %794 = vadd.xlane.f32.xlu2 %v778_v37 }
  0xd0   : > { %812 = vadd.xlane.f32.xlu1 %v787_v39  ;;  %v734_v41 = vpop.xlane.xlu2 %733  ;;  %v712_v42 = vpop.xlane.xlu1 %711 }
  0xd1   : > { %v732_v43 = vpop.xlane.xlu0 %731  ;;  %v759_v44 = vmul.f32 %v4306_v22, %v734_v41  ;;  %v748_v48 = vmul.f32 %v4306_v22, %v712_v42  ;;  %v1098_v41 = vld [vmem:[#allocation10 + $0xd0] sm:$0xff]  ;;  %v1099_v42 = vld [vmem:[#allocation10 + $0xd8] sm:$0xff] }
  0xd2   : > { %v758_v58 = vmul.f32 %v4306_v22, %v732_v43  ;;  %3388 = vmatpush.msra.mxu2 %v1098_v41  ;;  %3404 = vmatpush.msra.mxu3 %v1099_v42  ;;  %v1096_v43 = vld [vmem:[#allocation10 + $0xc0] sm:$0xff] }
  0xd3   : > { %v4334_v46 = vsub.f32 %v704_v6, %v759_v44  ;;  %v4345_v52 = vsub.f32 %v4271_v7, %v748_v48  ;;  %v1097_v44 = vld [vmem:[#allocation10 + $0xc8] sm:$0xff]  ;;  %1112 = vmatpush.msra.mxu0 %v1098_v41  ;;  %1177 = vmatpush.msra.mxu1 %v1099_v42  ;;  %v1095_v48 = vld [vmem:[#allocation10 + $0xb8] sm:$0xff] }
  0xd4   : > { %v4360_v61 = vsub.f32 %v4274_v8, %v758_v58  ;;  %3389 = vmatpush.msra.mxu2 %v1096_v43  ;;  %3405 = vmatpush.msra.mxu3 %v1097_v44  ;;  %v1084_v58 = vld [vmem:[#allocation10 + $0x60] sm:$0xff] }
  0xd5   : > { %v791_v49 = vmul.f32 %v4334_v46, %v4334_v46  ;;  %v780_v56 = vmul.f32 %v4345_v52, %v4345_v52  ;;  %1113 = vmatpush.msra.mxu0 %v1096_v43  ;;  %1178 = vmatpush.msra.mxu1 %v1097_v44 }
  0xd6   : > { %v790_v6 = vmul.f32 %v4360_v61, %v4360_v61  ;;  %3406 = vmatpush.msra.mxu3 %v1095_v48 }
  0xd7   : > { %820 = vadd.xlane.f32.xlu0 %v791_v49  ;;  %796 = vadd.xlane.f32.xlu2 %v779_v47  ;;  %v1094_v47 = vld [vmem:[#allocation10 + $0xb0] sm:$0xff]  ;;  %v1092_v49 = vld [vmem:[#allocation10 + $0xa0] sm:$0xff] }
  0xd8   : > { %814 = vadd.xlane.f32.xlu1 %v788_v51  ;;  %v736_v53 = vpop.xlane.xlu2 %735  ;;  %3390 = vmatpush.msra.mxu2 %v1094_v47  ;;  %v1091_v51 = vld [vmem:[#allocation10 + $0x98] sm:$0xff] }
  0xd9   : > { %v714_v54 = vpop.xlane.xlu0 %713  ;;  %v760_v57 = vmul.f32 %v4306_v22, %v736_v53  ;;  %1114 = vmatpush.msra.mxu0 %v1094_v47  ;;  %1179 = vmatpush.msra.mxu1 %v1095_v48  ;;  %v1088_v53 = vld [vmem:[#allocation10 + $0x80] sm:$0xff] }
  0xda   : > { %v749_v1 = vmul.f32 %v4306_v22, %v714_v54  ;;  %3391 = vmatpush.msra.mxu2 %v1092_v49  ;;  %3407 = vmatpush.msra.mxu3 %v1093_v50  ;;  %v1089_v54 = vld [vmem:[#allocation10 + $0x88] sm:$0xff] }
  0xdb   : > { %v4357_v60 = vsub.f32 %v4279_v9, %v760_v57  ;;  %1115 = vmatpush.msra.mxu0 %v1092_v49  ;;  %1180 = vmatpush.msra.mxu1 %v1093_v50  ;;  %v1087_v57 = vld [vmem:[#allocation10 + $0x78] sm:$0xff] }
  0xdc   : > { %v4374_v8 = vsub.f32 %v4282_v10, %v749_v1  ;;  %3408 = vmatpush.msra.mxu3 %v1091_v51  ;;  %v1081_v1 = vld [vmem:[#allocation10 + $0x48] sm:$0xff] }
  0xdd   : > { %v792_v0 = vmul.f32 %v4357_v60, %v4357_v60  ;;  %1181 = vmatpush.msra.mxu1 %v1091_v51 }
  0xde   : > { %v781_v20 = vmul.f32 %v4374_v8, %v4374_v8  ;;  %3409 = vmatpush.msra.mxu3 %v1089_v54 }
  0xdf   : > { %798 = vadd.xlane.f32.xlu2 %v780_v56  ;;  %v1086_v56 = vld [vmem:[#allocation10 + $0x70] sm:$0xff]  ;;  %1182 = vmatpush.msra.mxu1 %v1089_v54 }
  0xe0   : > { %816 = vadd.xlane.f32.xlu1 %v789_v59  ;;  %v738_v17 = vpop.xlane.xlu2 %737  ;;  %3410 = vmatpush.msra.mxu3 %v1087_v57  ;;  %v1085_v59 = vld [vmem:[#allocation10 + $0x68] sm:$0xff] }
  0xe1   : > { %v716_v62 = vpop.xlane.xlu0 %715  ;;  %v761_v21 = vmul.f32 %v4306_v22, %v738_v17  ;;  %1183 = vmatpush.msra.mxu1 %v1087_v57  ;;  %v1077_v17 = vld [vmem:[#allocation10 + $0x28] sm:$0xff] }
  0xe2   : > { %v750_v63 = vmul.f32 %v4306_v22, %v716_v62  ;;  %3411 = vmatpush.msra.mxu3 %v1085_v59  ;;  %v1082_v62 = vld [vmem:[#allocation10 + $0x50] sm:$0xff] }
  0xe3   : > { %v4386_v24 = vsub.f32 %v4287_v11, %v761_v21  ;;  %1184 = vmatpush.msra.mxu1 %v1085_v59  ;;  %v1072_v21 = vld [vmem:[#allocation10] sm:$0xff] }
  0xe4   : > { %v4367_v5 = vsub.f32 %v4290_v12, %v750_v63  ;;  %v1083_v63 = vld [vmem:[#allocation10 + $0x58] sm:$0xff] }
  0xe5   : > { %v793_v11 = vmul.f32 %v4386_v24, %v4386_v24  ;;  %3412 = vmatpush.msra.mxu3 %v1083_v63  ;;  %1185 = vmatpush.msra.mxu1 %v1083_v63 }
  0xe6   : > { %v782_v9 = vmul.f32 %v4367_v5, %v4367_v5 }
  0xe7   : > { %822 = vadd.xlane.f32.xlu2 %v792_v0  ;;  %v1080_v0 = vld [vmem:[#allocation10 + $0x40] sm:$0xff]  ;;  %3413 = vmatpush.msra.mxu3 %v1081_v1 }
  0xe8   : > { %802 = vadd.xlane.f32.xlu0 %v782_v9  ;;  %818 = vadd.xlane.f32.xlu1 %v790_v6  ;;  %v1078_v6 = vld [vmem:[#allocation10 + $0x30] sm:$0xff]  ;;  %v1079_v9 = vld [vmem:[#allocation10 + $0x38] sm:$0xff] }
  0xe9   : > { %v718_v16 = vpop.xlane.xlu0 %717  ;;  %1186 = vmatpush.msra.mxu1 %v1081_v1  ;;  %3414 = vmatpush.msra.mxu3 %v1079_v9 }
  0xea   : > { %v751_v18 = vmul.f32 %v4306_v22, %v718_v16  ;;  %v1076_v16 = vld [vmem:[#allocation10 + $0x20] sm:$0xff] }
  0xeb   : > { %1187 = vmatpush.msra.mxu1 %v1079_v9  ;;  %3415 = vmatpush.msra.mxu3 %v1077_v17 }
  0xec   : > { %v4378_v19 = vsub.f32 %v4295_v13, %v751_v18  ;;  %v1074_v18 = vld [vmem:[#allocation10 + $0x10] sm:$0xff] }
  0xed   : > { %1188 = vmatpush.msra.mxu1 %v1077_v17 }
  0xee   : > { %v783_v23 = vmul.f32 %v4378_v19, %v4378_v19 }
  0xf0   : > { %800 = vadd.xlane.f32.xlu1 %v781_v20  ;;  %804 = vadd.xlane.f32.xlu2 %v783_v23  ;;  %v1075_v20 = vld [vmem:[#allocation10 + $0x18] sm:$0xff]  ;;  %v1073_v23 = vld [vmem:[#allocation10 + $0x8] sm:$0xff] }
  0xf1   : > { %v720_v29 = vpop.xlane.xlu0 %719  ;;  %3416 = vmatpush.msra.mxu3 %v1075_v20  ;;  %1189 = vmatpush.msra.mxu1 %v1075_v20 }
  0xf2   : > { %v752_v31 = vmul.f32 %v4306_v22, %v720_v29 }
  0xf3   : > { %3417 = vmatpush.msra.mxu3 %v1073_v23  ;;  %1190 = vmatpush.msra.mxu1 %v1073_v23 }
  0xf4   : > { %v4390_v32 = vsub.f32 %v4299_v14, %v752_v31 }
  0xf6   : > { %v784_v33 = vmul.f32 %v4390_v32, %v4390_v32 }
  0xf8   : > { %806 = vadd.xlane.f32.xlu0 %v784_v33  ;;  %824 = vadd.xlane.f32.xlu1 %v793_v11 }
  0xf9   : > { %1885 = vadd.xlane.f32.xlu2 %v4264_v4  ;;  %v722_v34 = vpop.xlane.xlu0 %721 }
  0xfa   : > { %v753_v37 = vmul.f32 %v4306_v22, %v722_v34 }
  0xfc   : > { %v4399_v38 = vsub.f32 %v4303_v15, %v753_v37 }
  0xfe   : > { %v785_v39 = vmul.f32 %v4399_v38, %v4399_v38 }
 0x100   : > { %1887 = vadd.xlane.f32.xlu0 %v4261_v3  ;;  %808 = vadd.xlane.f32.xlu1 %v785_v39 }
 0x101   : > { %1891 = vadd.xlane.f32.xlu2 %v4282_v10 }
 0x108   : > { %1889 = vadd.xlane.f32.xlu1 %v4271_v7  ;;  %1893 = vadd.xlane.f32.xlu0 %v4290_v12 }
 0x110   : > { %1895 = vadd.xlane.f32.xlu1 %v4295_v13  ;;  %1897 = vadd.xlane.f32.xlu0 %v4299_v14  ;;  %v1090_v14 = vld [vmem:[#allocation10 + $0x90] sm:$0xff] }
 0x111   : > { %3392 = vmatpush.msra.mxu2 %v1090_v14  ;;  %1116 = vmatpush.msra.mxu0 %v1090_v14 }
 0x113   : > { %3393 = vmatpush.msra.mxu2 %v1088_v53  ;;  %1117 = vmatpush.msra.mxu0 %v1088_v53 }
 0x115   : > { %3394 = vmatpush.msra.mxu2 %v1086_v56  ;;  %1118 = vmatpush.msra.mxu0 %v1086_v56 }
 0x117   : > { %3395 = vmatpush.msra.mxu2 %v1084_v58  ;;  %1119 = vmatpush.msra.mxu0 %v1084_v58 }
 0x119   : > { %3396 = vmatpush.msra.mxu2 %v1082_v62  ;;  %1120 = vmatpush.msra.mxu0 %v1082_v62 }
 0x11b   : > { %3397 = vmatpush.msra.mxu2 %v1080_v0  ;;  %1121 = vmatpush.msra.mxu0 %v1080_v0 }
 0x11d   : > { %3398 = vmatpush.msra.mxu2 %v1078_v6  ;;  %1122 = vmatpush.msra.mxu0 %v1078_v6 }
 0x11f   : > { %3399 = vmatpush.msra.mxu2 %v1076_v16  ;;  %1123 = vmatpush.msra.mxu0 %v1076_v16 }
 0x121   : > { %3400 = vmatpush.msra.mxu2 %v1074_v18  ;;  %1124 = vmatpush.msra.mxu0 %v1074_v18 }
 0x123   : > { %3401 = vmatpush.msra.mxu2 %v1072_v21  ;;  %1125 = vmatpush.msra.mxu0 %v1072_v21 }
 0x13b   : > { %v811_v25 = vpop.xlane.xlu1 %810 }
 0x13c   : > { %v834_v26 = vmul.f32 %v811_v25, %v4306_v22 }
 0x13e   : > { %v850_v28 = vadd.f32 1e-06, %v834_v26  ;;  %v4440_v26 = vld [vmem:[%s6447_s10] ss:$0 sm:$0xff] }
 0x140   : > { %3546 = vrsqrt.f32 %v850_v28  ;;  %vm944_vm2 = vweird.f32 %v850_v28 }
 0x142   : > { %v795_v29 = vpop.xlane.xlu2 %794 }
 0x143   : > { %v826_v30 = vmul.f32 %v795_v29, %v4306_v22  ;;  %v813_v31 = vpop.xlane.xlu1 %812 }
 0x144   : > { %v835_v11 = vmul.f32 %v813_v31, %v4306_v22 }
 0x145   : > { %v842_v33 = vadd.f32 1e-06, %v826_v30 }
 0x146   : > { %v3547_v34 = vpop.eup %3546  ;;  %v4412_v37 = vadd.f32 1e-06, %v835_v11 }
 0x147   : > { %v939_v39 = vmul.f32 %v3547_v34, %v850_v28  ;;  %3548 = vrsqrt.f32 %v842_v33  ;;  %vm945_vm1 = vweird.f32 %v3547_v34  ;;  %vm864_vm4 = vweird.f32 %v842_v33 }
 0x148   : > { %3550 = vrsqrt.f32 %v4412_v37  ;;  %vm946_vm3 = vmor %vm944_vm2, %vm945_vm1  ;;  %vm954_vm7 = vweird.f32 %v4412_v37 }
 0x149   : > { %v940_v41 = vmul.f32 %v3547_v34, %v939_v39  ;;  %v4459_v39 = vld [vmem:[%s6448_s11] ss:$0 sm:$0xff] }
 0x14a   : > { %v821_v42 = vpop.xlane.xlu0 %820  ;;  %v797_v43 = vpop.xlane.xlu2 %796 }
 0x14b   : > { %v941_v44 = vmul.f32 0.5, %v940_v41  ;;  %v827_v47 = vmul.f32 %v797_v43, %v4306_v22  ;;  %v815_v48 = vpop.xlane.xlu1 %814  ;;  %v839_v51 = vmul.f32 %v821_v42, %v4306_v22 }
 0x14c   : > { %v836_v49 = vmul.f32 %v815_v48, %v4306_v22 }
 0x14d   : > { %v3549_v50 = vpop.eup %3548  ;;  %v942_v14 = vsub.f32 1.5, %v941_v44  ;;  %v4418_v53 = vadd.f32 1e-06, %v827_v47  ;;  %v4428_v63 = vadd.f32 1e-06, %v839_v51 }
 0x14e   : > { %v4420_v54 = vpop.eup %3550  ;;  %v859_v56 = vmul.f32 %v3549_v50, %v842_v33  ;;  %v4422_v57 = vadd.f32 1e-06, %v836_v49  ;;  %vm865_vm5 = vweird.f32 %v3549_v50 }
 0x14f   : > { %v949_v58 = vmul.f32 %v4420_v54, %v4412_v37  ;;  %3552 = vrsqrt.f32 %v4418_v53  ;;  %v943_v0 = vmul.f32 %v3547_v34, %v942_v14  ;;  %vm4445_vm6 = vmor %vm864_vm4, %vm865_vm5  ;;  %vm955_vm8 = vweird.f32 %v4420_v54 }
 0x150   : > { %v860_v59 = vmul.f32 %v3549_v50, %v859_v56  ;;  %3554 = vrsqrt.f32 %v4422_v57  ;;  %vm874_vm9 = vweird.f32 %v4418_v53  ;;  %vm964_vm11 = vweird.f32 %v4422_v57  ;;  %vm4492_vm12 = vmor %vm954_vm7, %vm955_vm8 }
 0x151   : > { %v950_v62 = vmul.f32 %v4420_v54, %v949_v58  ;;  %v947_v18 = vsel %vm946_vm3, %v3547_v34, %v943_v0  ;;  %3556 = vrsqrt.f32 %v4428_v63  ;;  %vm994_vm5 = vweird.f32 %v4428_v63 }
 0x152   : > { %v861_v1 = vmul.f32 0.5, %v860_v59  ;;  %v799_v6 = vpop.xlane.xlu2 %798  ;;  %v1026_v25 = vmul.f32 %v947_v18, %v4310_v27 }
 0x153   : > { %v951_v9 = vmul.f32 0.5, %v950_v62  ;;  %v828_v16 = vmul.f32 %v799_v6, %v4306_v22  ;;  %v817_v17 = vpop.xlane.xlu1 %816 }
 0x154   : > { %v862_v20 = vsub.f32 1.5, %v861_v1  ;;  %v837_v21 = vmul.f32 %v817_v17, %v4306_v22  ;;  %v1045_v42 = vmul.f32 %v4440_v26, %v1026_v25 }
 0x155   : > { %v4434_v23 = vadd.f32 1e-06, %v828_v16  ;;  %v4442_v28 = vpop.eup %3552  ;;  %v952_v34 = vsub.f32 1.5, %v951_v9 }
 0x156   : > { %v863_v29 = vmul.f32 %v3549_v50, %v862_v20  ;;  %v4449_v31 = vadd.f32 1e-06, %v837_v21  ;;  %v4451_v11 = vpop.eup %3554  ;;  %v869_v27 = vmul.f32 %v4442_v28, %v4418_v53  ;;  %v1064_v51 = vadd.f32 %v4459_v39, %v1045_v42 }
 0x157   : > { %3558 = vrsqrt.f32 %v4434_v23  ;;  %v959_v33 = vmul.f32 %v4451_v11, %v4422_v57  ;;  %v4472_v49 = vpop.eup %3556  ;;  %vm875_vm10 = vweird.f32 %v4442_v28  ;;  %vm965_vm14 = vweird.f32 %v4451_v11 }
 0x158   : > { %3560 = vrsqrt.f32 %v4449_v31  ;;  %v870_v41 = vmul.f32 %v4442_v28, %v869_v27  ;;  %v867_v43 = vsel %vm4445_vm6, %v3549_v50, %v863_v29  ;;  %v953_v50 = vmul.f32 %v4420_v54, %v952_v34  ;;  %1150 = vmatmul.f32.vlgmr.msra.gmra.mxu2 %v1064_v51  ;;  %1215 = vmatmul.f32.vlgmr.msra.gmra.mxu3 %v1064_v51  ;;  %vm4506_vm13 = vmor %vm874_vm9, %vm875_vm10 }
 0x159   : > { %v960_v44 = vmul.f32 %v4451_v11, %v959_v33  ;;  %v1018_v48 = vmul.f32 %v867_v43, %v4318_v35  ;;  %v989_v18 = vmul.f32 %v4472_v49, %v4428_v63  ;;  %vm884_vm15 = vweird.f32 %v4434_v23  ;;  %vm4538_vm1 = vmor %vm964_vm11, %vm965_vm14 }
 0x15a   : > { %v823_v47 = vpop.xlane.xlu2 %822  ;;  %v871_v14 = vmul.f32 0.5, %v870_v41  ;;  %v957_v27 = vsel %vm4492_vm12, %v4420_v54, %v953_v50  ;;  %vm974_vm3 = vweird.f32 %v4449_v31  ;;  %vm995_vm6 = vweird.f32 %v4472_v49 }
 0x15b   : > { %v803_v56 = vpop.xlane.xlu0 %802  ;;  %v840_v58 = vmul.f32 %v823_v47, %v4306_v22  ;;  %v819_v59 = vpop.xlane.xlu1 %818  ;;  %v961_v62 = vmul.f32 0.5, %v960_v44  ;;  %v1037_v25 = vmul.f32 %v4440_v26, %v1018_v48  ;;  %v1027_v54 = vmul.f32 %v957_v27, %v4320_v36 }
 0x15c   : > { %v830_v0 = vmul.f32 %v803_v56, %v4306_v22  ;;  %v872_v35 = vsub.f32 1.5, %v871_v14  ;;  %v838_v9 = vmul.f32 %v819_v59, %v4306_v22 }
 0x15d   : > { %v4480_v1 = vpop.eup %3558  ;;  %v4483_v6 = vadd.f32 1e-06, %v840_v58  ;;  %v962_v20 = vsub.f32 1.5, %v961_v62  ;;  %v1056_v44 = vadd.f32 %v4459_v39, %v1037_v25  ;;  %v990_v62 = vmul.f32 %v4472_v49, %v989_v18 }
 0x15e   : > { %v4486_v16 = vpop.eup %3560  ;;  %v879_v21 = vmul.f32 %v4480_v1, %v4434_v23  ;;  %v873_v29 = vmul.f32 %v4442_v28, %v872_v35  ;;  %v4512_v34 = vadd.f32 1e-06, %v830_v0  ;;  %v4524_v42 = vadd.f32 1e-06, %v838_v9 }
 0x15f   : > { %v969_v30 = vmul.f32 %v4486_v16, %v4449_v31  ;;  %3562 = vrsqrt.f32 %v4483_v6  ;;  %v963_v53 = vmul.f32 %v4451_v11, %v962_v20  ;;  %vm885_vm0 = vweird.f32 %v4480_v1  ;;  %1126 = vmatmul.f32.vlgmr.msra.gmra.mxu0 %v1056_v44  ;;  %1191 = vmatmul.f32.vlgmr.msra.gmra.mxu1 %v1056_v44 }
 0x160   : > { %v880_v33 = vmul.f32 %v4480_v1, %v879_v21  ;;  %3564 = vrsqrt.f32 %v4512_v34  ;;  %v877_v47 = vsel %vm4506_vm13, %v4442_v28, %v873_v29  ;;  %v1046_v28 = vmul.f32 %v4440_v26, %v1027_v54  ;;  %vm4564_vm2 = vmor %vm884_vm15, %vm885_vm0 }
 0x161   : > { %v970_v41 = vmul.f32 %v4486_v16, %v969_v30  ;;  %3566 = vrsqrt.f32 %v4524_v42  ;;  %v1019_v56 = vmul.f32 %v877_v47, %v4328_v40  ;;  %v967_v57 = vsel %vm4538_vm1, %v4451_v11, %v963_v53  ;;  %vm4668_vm15 = vmor %vm994_vm5, %vm995_vm6 }
 0x162   : > { %v881_v43 = vmul.f32 0.5, %v880_v33  ;;  %v1065_v9 = vadd.f32 %v4459_v39, %v1046_v28  ;;  %v991_v30 = vmul.f32 0.5, %v990_v62  ;;  %v1028_v23 = vmul.f32 %v967_v57, %v4332_v45 }
 0x163   : > { %v971_v48 = vmul.f32 0.5, %v970_v41  ;;  %v805_v14 = vpop.xlane.xlu2 %804  ;;  %v801_v51 = vpop.xlane.xlu1 %800  ;;  %v1038_v40 = vmul.f32 %v4440_v26, %v1019_v56  ;;  %vm975_vm4 = vweird.f32 %v4486_v16  ;;  %vm984_vm9 = vweird.f32 %v4524_v42 }
 0x164   : > { %v882_v36 = vsub.f32 1.5, %v881_v43  ;;  %v831_v59 = vmul.f32 %v805_v14, %v4306_v22  ;;  %v829_v50 = vmul.f32 %v801_v51, %v4306_v22  ;;  %1153 = vmatmul.f32.gmra.mxu2 %v1065_v9  ;;  %1218 = vmatmul.f32.gmra.mxu3 %v1065_v9  ;;  %v1047_v43 = vmul.f32 %v4440_v26, %v1028_v23  ;;  %vm4609_vm7 = vmor %vm974_vm3, %vm975_vm4 }
 0x165   : > { %v4550_v0 = vpop.eup %3562  ;;  %v972_v11 = vsub.f32 1.5, %v971_v48  ;;  %v1057_v29 = vadd.f32 %v4459_v39, %v1038_v40  ;;  %v992_v51 = vsub.f32 1.5, %v991_v30  ;;  %vm904_vm11 = vweird.f32 %v4512_v34 }
 0x166   : > { %v883_v35 = vmul.f32 %v4480_v1, %v882_v36  ;;  %v4554_v17 = vadd.f32 1e-06, %v831_v59  ;;  %v4556_v20 = vadd.f32 1e-06, %v829_v50  ;;  %v4558_v21 = vpop.eup %3564  ;;  %v999_v56 = vmul.f32 %v4550_v0, %v4483_v6 }
 0x167   : > { %v899_v25 = vmul.f32 %v4558_v21, %v4512_v34  ;;  %v4572_v37 = vpop.eup %3566  ;;  %v973_v53 = vmul.f32 %v4486_v16, %v972_v11  ;;  %1129 = vmatmul.f32.gmra.mxu0 %v1057_v29  ;;  %1194 = vmatmul.f32.gmra.mxu1 %v1057_v29  ;;  %v1066_v58 = vadd.f32 %v4459_v39, %v1047_v43  ;;  %vm905_vm14 = vweird.f32 %v4558_v21 }
 0x168   : > { %3568 = vrsqrt.f32 %v4554_v17  ;;  %v979_v27 = vmul.f32 %v4572_v37, %v4524_v42  ;;  %v887_v33 = vsel %vm4564_vm2, %v4480_v1, %v883_v35  ;;  %vm985_vm8 = vweird.f32 %v4572_v37  ;;  %vm4686_vm1 = vmor %vm904_vm11, %vm905_vm14 }
 0x169   : > { %3570 = vrsqrt.f32 %v4556_v20  ;;  %v900_v41 = vmul.f32 %v4558_v21, %v899_v25  ;;  %v1020_v47 = vmul.f32 %v887_v33, %v4345_v52  ;;  %v977_v31 = vsel %vm4609_vm7, %v4486_v16, %v973_v53  ;;  %vm4634_vm10 = vmor %vm984_vm9, %vm985_vm8 }
 0x16a   : > { %v980_v45 = vmul.f32 %v4572_v37, %v979_v27  ;;  %v4625_v29 = vmul.f32 %v4472_v49, %v992_v51  ;;  %v1000_v30 = vmul.f32 %v4550_v0, %v999_v56  ;;  %vm894_vm12 = vweird.f32 %v4556_v20 }
 0x16b   : > { %v807_v44 = vpop.xlane.xlu0 %806  ;;  %v825_v54 = vpop.xlane.xlu1 %824  ;;  %v1039_v62 = vmul.f32 %v4440_v26, %v1020_v47  ;;  %v901_v35 = vmul.f32 0.5, %v900_v41  ;;  %v1029_v41 = vmul.f32 %v977_v31, %v4348_v55  ;;  %vm1004_vm2 = vweird.f32 %v4483_v6 }
 0x16c   : > { %v832_v48 = vmul.f32 %v807_v44, %v4306_v22  ;;  %v1886_v14 = vpop.xlane.xlu2 %1885  ;;  %v841_v1 = vmul.f32 %v825_v54, %v4306_v22  ;;  %v981_v28 = vmul.f32 0.5, %v980_v45  ;;  %1156 = vmatmul.f32.gmra.mxu2 %v1066_v58  ;;  %1221 = vmatmul.f32.gmra.mxu3 %v1066_v58  ;;  %vm1005_vm3 = vweird.f32 %v4550_v0 }
 0x16d   : > { %v1917_v52 = vmul.f32 %v1886_v14, %v4306_v22  ;;  %v1058_v27 = vadd.f32 %v4459_v39, %v1039_v62  ;;  %v902_v33 = vsub.f32 1.5, %v901_v35  ;;  %v1048_v55 = vmul.f32 %v4440_v26, %v1029_v41  ;;  %vm4726_vm6 = vmor %vm1004_vm2, %vm1005_vm3 }
 0x16e   : > { %v4595_v36 = vpop.eup %3568  ;;  %v4597_v59 = vadd.f32 1e-06, %v832_v48  ;;  %v4599_v50 = vadd.f32 1e-06, %v841_v1  ;;  %v982_v11 = vsub.f32 1.5, %v981_v28  ;;  %v1001_v28 = vmul.f32 0.5, %v1000_v30 }
 0x16f   : > { %v4602_v40 = vpop.eup %3570  ;;  %v909_v9 = vmul.f32 %v4595_v36, %v4554_v17  ;;  %v4616_v18 = vsub.f32 %v4264_v4, %v1917_v52  ;;  %1132 = vmatmul.f32.gmra.mxu0 %v1058_v27  ;;  %1197 = vmatmul.f32.gmra.mxu1 %v1058_v27  ;;  %v1067_v62 = vadd.f32 %v4459_v39, %v1048_v55  ;;  %vm914_vm4 = vweird.f32 %v4554_v17 }
 0x170   : > { %v889_v25 = vmul.f32 %v4602_v40, %v4556_v20  ;;  %3572 = vrsqrt.f32 %v4597_v59  ;;  %v983_v4 = vmul.f32 %v4572_v37, %v982_v11  ;;  %vm895_vm13 = vweird.f32 %v4602_v40 }
 0x171   : > { %3574 = vrsqrt.f32 %v4599_v50  ;;  %v910_v53 = vmul.f32 %v4595_v36, %v909_v9  ;;  %v1949_v42 = vmul.f32 %v4616_v18, %v4616_v18  ;;  %vm896_vm0 = vmor %vm894_vm12, %vm895_vm13  ;;  %vm915_vm5 = vweird.f32 %v4595_v36 }
 0x172   : > { %v890_v23 = vmul.f32 %v4602_v40, %v889_v25  ;;  %v987_v48 = vsel %vm4634_vm10, %v4572_v37, %v983_v4  ;;  %v903_v37 = vmul.f32 %v4558_v21, %v902_v33  ;;  %v1002_v4 = vsub.f32 1.5, %v1001_v28  ;;  %vm4737_vm7 = vmor %vm914_vm4, %vm915_vm5 }
 0x173   : > { %v1888_v43 = vpop.xlane.xlu0 %1887  ;;  %v809_v44 = vpop.xlane.xlu1 %808  ;;  %1965 = vadd.xlane.f32.xlu2 %v1949_v42  ;;  %v1030_v14 = vmul.f32 %v987_v48, %v4360_v61  ;;  %v911_v61 = vmul.f32 0.5, %v910_v53  ;;  %v997_v33 = vsel %vm4668_vm15, %v4472_v49, %v4625_v29  ;;  %vm924_vm8 = vweird.f32 %v4597_v59  ;;  %v2256_v48 = vld [vmem:[#allocation7 + $0x68] sm:$0xff] }
 0x174   : > { %v891_v54 = vmul.f32 0.5, %v890_v23  ;;  %v1918_v47 = vmul.f32 %v1888_v43, %v4306_v22  ;;  %v833_v45 = vmul.f32 %v809_v44, %v4306_v22  ;;  %v1892_v1 = vpop.xlane.xlu2 %1891  ;;  %1159 = vmatmul.f32.gmra.mxu2 %v1067_v62  ;;  %1224 = vmatmul.f32.gmra.mxu3 %v1067_v62  ;;  %v907_v49 = vsel %vm4686_vm1, %v4558_v21, %v903_v37 }
 0x175   : > { %v1920_v9 = vmul.f32 %v1892_v1, %v4306_v22  ;;  %v1049_v25 = vmul.f32 %v4440_v26, %v1030_v14  ;;  %v912_v16 = vsub.f32 1.5, %v911_v61  ;;  %v1003_v44 = vmul.f32 %v4550_v0, %v1002_v4 }
 0x176   : > { %v892_v51 = vsub.f32 1.5, %v891_v54  ;;  %v4653_v56 = vsub.f32 %v4261_v3, %v1918_v47  ;;  %v4655_v58 = vadd.f32 1e-06, %v833_v45  ;;  %v4657_v52 = vpop.eup %3572  ;;  %v1031_v54 = vmul.f32 %v997_v33, %v4334_v46 }
 0x177   : > { %v4662_v57 = vpop.eup %3574  ;;  %v919_v11 = vmul.f32 %v4657_v52, %v4597_v59  ;;  %v4700_v53 = vsub.f32 %v4282_v10, %v1920_v9  ;;  %v1068_v43 = vadd.f32 %v4459_v39, %v1049_v25  ;;  %v1022_v45 = vmul.f32 %v907_v49, %v4367_v5  ;;  %v4766_v25 = vld [vmem:[%s4246_s9 + $0x48] sm:$0xff] }
 0x178   : > { %v893_v35 = vmul.f32 %v4602_v40, %v892_v51  ;;  %3576 = vrsqrt.f32 %v4655_v58  ;;  %v1009_v63 = vmul.f32 %v4662_v57, %v4599_v50  ;;  %v1950_v20 = vmul.f32 %v4653_v56, %v4653_v56 }
 0x179   : > { %v1952_v46 = vmul.f32 %v4700_v53, %v4700_v53  ;;  %v1050_v5 = vmul.f32 %v4440_v26, %v1031_v54  ;;  %v1041_v28 = vmul.f32 %v4440_v26, %v1022_v45  ;;  %v1007_v17 = vsel %vm4726_vm6, %v4550_v0, %v1003_v44  ;;  %v2258_v45 = vld [vmem:[#allocation7 + $0x78] sm:$0xff] }
 0x17a   : > { %v897_v30 = vsel %vm896_vm0, %v4602_v40, %v893_v35  ;;  %v1010_v34 = vmul.f32 %v4662_v57, %v1009_v63  ;;  %1967 = vadd.xlane.f32.xlu1 %v1950_v20  ;;  %v920_v40 = vmul.f32 %v4657_v52, %v919_v11  ;;  %vm925_vm9 = vweird.f32 %v4657_v52  ;;  %2263 = vmatpush.msrb.mxu0 %v2258_v45  ;;  %v4871_v45 = vld [vmem:[%s4246_s9 + $0x40] sm:$0xff] }
 0x17b   : > { %v1890_v23 = vpop.xlane.xlu1 %1889  ;;  %v1021_v27 = vmul.f32 %v897_v30, %v4374_v8  ;;  %v1894_v42 = vpop.xlane.xlu0 %1893  ;;  %1899 = vadd.xlane.f32.xlu2 %v4303_v15  ;;  %vm1014_vm10 = vweird.f32 %v4599_v50  ;;  %vm1015_vm11 = vweird.f32 %v4662_v57  ;;  %v1032_v0 = vmul.f32 %v1007_v17, %v4357_v60  ;;  %vm4775_vm12 = vmor %vm924_vm8, %vm925_vm9 }
 0x17c   : > { %v1919_v41 = vmul.f32 %v1890_v23, %v4306_v22  ;;  %v1011_v21 = vmul.f32 0.5, %v1010_v34  ;;  %v1921_v6 = vmul.f32 %v1894_v42, %v4306_v22  ;;  %v921_v55 = vmul.f32 0.5, %v920_v40  ;;  %1162 = vmatmul.f32.gmra.mxu2 %v1068_v43  ;;  %1227 = vmatmul.f32.gmra.mxu3 %v1068_v43  ;;  %v4780_v23 = vld [vmem:[%s4246_s9 + $0x50] sm:$0xff]  ;;  %vm1016_vm13 = vmor %vm1014_vm10, %vm1015_vm11 }
 0x17d   : > { %v1040_v8 = vmul.f32 %v4440_v26, %v1021_v27  ;;  %v3706_v34 = vld [vmem:[%s4246_s9 + $0x30] sm:$0xff]  ;;  %vm934_vm14 = vweird.f32 %v4655_v58 }
 0x17e   : > { %v4710_v29 = vpop.eup %3576  ;;  %v4716_v10 = vsub.f32 %v4271_v7, %v1919_v41  ;;  %v913_v7 = vmul.f32 %v4595_v36, %v912_v16  ;;  %v1012_v51 = vsub.f32 1.5, %v1011_v21  ;;  %v4744_v37 = vsub.f32 %v4290_v12, %v1921_v6  ;;  %v4822_v21 = vld [vmem:[%s4246_s9 + $0x60] sm:$0xff] }
 0x17f   : > { %v1059_v15 = vadd.f32 %v4459_v39, %v1040_v8  ;;  %v929_v14 = vmul.f32 %v4710_v29, %v4655_v58  ;;  %v922_v3 = vsub.f32 1.5, %v921_v55  ;;  %v1069_v12 = vadd.f32 %v4459_v39, %v1050_v5  ;;  %v4810_v8 = vld [vmem:[%s4246_s9 + $0x58] sm:$0xff]  ;;  %v2252_v5 = vld [vmem:[#allocation7 + $0x48] sm:$0xff] }
 0x180   : > { %v1951_v47 = vmul.f32 %v4716_v10, %v4716_v10  ;;  %v917_v35 = vsel %vm4737_vm7, %v4595_v36, %v913_v7  ;;  %v1013_v11 = vmul.f32 %v4662_v57, %v1012_v51  ;;  %v1060_v36 = vadd.f32 %v4459_v39, %v1041_v28  ;;  %v2255_v7 = vld [vmem:[#allocation7 + $0x60] sm:$0xff]  ;;  %v2254_v55 = vld [vmem:[#allocation7 + $0x58] sm:$0xff] }
 0x181   : > { %1135 = vmatmul.f32.gmra.mxu0 %v1059_v15  ;;  %1200 = vmatmul.f32.gmra.mxu1 %v1059_v15  ;;  %v930_v61 = vmul.f32 %v4710_v29, %v929_v14  ;;  %v1953_v63 = vmul.f32 %v4744_v37, %v4744_v37  ;;  %v1023_v31 = vmul.f32 %v917_v35, %v4378_v19  ;;  %vm935_vm15 = vweird.f32 %v4710_v29  ;;  %v2253_v14 = vld [vmem:[#allocation7 + $0x50] sm:$0xff]  ;;  %v2251_v51 = vld [vmem:[#allocation7 + $0x40] sm:$0xff]  ;;  %v2250_v28 = vld [vmem:[#allocation7 + $0x38] sm:$0xff] }
 0x182   : > { %1969 = vadd.xlane.f32.xlu0 %v1951_v47  ;;  %1901 = vadd.xlane.f32.xlu1 %v4255_v2  ;;  %v923_v20 = vmul.f32 %v4657_v52, %v922_v3  ;;  %v1051_v19 = vmul.f32 %v4440_v26, %v1032_v0  ;;  %v1017_v33 = vsel %vm1016_vm13, %v4662_v57, %v1013_v11  ;;  %vm936_vm0 = vmor %vm934_vm14, %vm935_vm15  ;;  %v4825_v47 = vld [vmem:[%s4246_s9 + $0x68] sm:$0xff]  ;;  %v2246_v11 = vld [vmem:[#allocation7 + $0x18] sm:$0xff] }
 0x183   : > { %v1896_v62 = vpop.xlane.xlu1 %1895  ;;  %1971 = vadd.xlane.f32.xlu2 %v1952_v46  ;;  %v1898_v2 = vpop.xlane.xlu0 %1897  ;;  %v931_v30 = vmul.f32 0.5, %v930_v61  ;;  %v1042_v59 = vmul.f32 %v4440_v26, %v1023_v31  ;;  %v1033_v42 = vmul.f32 %v1017_v33, %v4386_v24  ;;  %v2248_v35 = vld [vmem:[#allocation7 + $0x28] sm:$0xff] }
 0x184   : > { %v1922_v9 = vmul.f32 %v1896_v62, %v4306_v22  ;;  %1165 = vmatmul.f32.gmra.mxu2 %v1069_v12  ;;  %1230 = vmatmul.f32.gmra.mxu3 %v1069_v12  ;;  %v1923_v60 = vmul.f32 %v1898_v2, %v4306_v22  ;;  %v927_v50 = vsel %vm4775_vm12, %v4657_v52, %v923_v20  ;;  %v2249_v62 = vld [vmem:[#allocation7 + $0x30] sm:$0xff] }
 0x185   : > { %v932_v16 = vsub.f32 1.5, %v931_v30  ;;  %v1061_v40 = vadd.f32 %v4459_v39, %v1042_v59  ;;  %v1024_v43 = vmul.f32 %v927_v50, %v4390_v32  ;;  %v1052_v24 = vmul.f32 %v4440_v26, %v1033_v42  ;;  %v4853_v50 = vld [vmem:[%s4246_s9 + $0x38] sm:$0xff]  ;;  %v2243_v42 = vld [vmem:[#allocation7] sm:$0xff] }
 0x186   : > { %v4789_v27 = vsub.f32 %v4295_v13, %v1922_v9  ;;  %v4798_v41 = vsub.f32 %v3706_v34, %v1923_v60  ;;  %v1070_v13 = vadd.f32 %v4459_v39, %v1051_v19  ;;  %v2247_v9 = vld [vmem:[#allocation7 + $0x20] sm:$0xff]  ;;  %v2244_v19 = vld [vmem:[#allocation7 + $0x8] sm:$0xff] }
 0x187   : > { %v933_v52 = vmul.f32 %v4710_v29, %v932_v16  ;;  %v1043_v32 = vmul.f32 %v4440_v26, %v1024_v43  ;;  %v1071_v44 = vadd.f32 %v4459_v39, %v1052_v24 }
 0x188   : > { %v1954_v57 = vmul.f32 %v4789_v27, %v4789_v27  ;;  %v1955_v58 = vmul.f32 %v4798_v41, %v4798_v41 }
 0x189   : > { %1138 = vmatmul.f32.gmra.mxu0 %v1060_v36  ;;  %1203 = vmatmul.f32.gmra.mxu1 %v1060_v36  ;;  %v937_v49 = vsel %vm936_vm0, %v4710_v29, %v933_v52  ;;  %v1062_v15 = vadd.f32 %v4459_v39, %v1043_v32  ;;  %v2245_v36 = vld [vmem:[#allocation7 + $0x10] sm:$0xff] }
 0x18a   : > { %1903 = vadd.xlane.f32.xlu0 %v4766_v25  ;;  %1973 = vadd.xlane.f32.xlu1 %v1953_v63  ;;  %v1025_v54 = vmul.f32 %v937_v49, %v4399_v38  ;;  %v2257_v38 = vld [vmem:[#allocation7 + $0x70] sm:$0xff] }
 0x18b   : > { %1905 = vadd.xlane.f32.xlu2 %v4780_v23  ;;  %2264 = vmatpush.msrb.mxu0 %v2257_v38 }
 0x18c   : > { %1168 = vmatmul.f32.gmra.mxu2 %v1070_v13  ;;  %1233 = vmatmul.f32.gmra.mxu3 %v1070_v13  ;;  %v1044_v6 = vmul.f32 %v4440_v26, %v1025_v54 }
 0x18d   : > { %2265 = vmatpush.msrb.mxu0 %v2256_v48 }
 0x18e   : > { %v1063_v29 = vadd.f32 %v4459_v39, %v1044_v6 }
 0x18f   : > { %2266 = vmatpush.msrb.mxu0 %v2255_v7 }
 0x191   : > { %1141 = vmatmul.f32.gmra.mxu0 %v1061_v40  ;;  %1206 = vmatmul.f32.gmra.mxu1 %v1061_v40 }
 0x192   : > { %1975 = vadd.xlane.f32.xlu0 %v1954_v57  ;;  %1907 = vadd.xlane.f32.xlu1 %v4810_v8 }
 0x193   : > { %1977 = vadd.xlane.f32.xlu2 %v1955_v58  ;;  %2267 = vmatpush.msrb.mxu0 %v2254_v55 }
 0x194   : > { %1171 = vmatmul.f32.gmra.mxu2 %v1071_v44  ;;  %1236 = vmatmul.f32.gmra.mxu3 %v1071_v44 }
 0x195   : > { %2268 = vmatpush.msrb.mxu0 %v2253_v14 }
 0x197   : > { %2269 = vmatpush.msrb.mxu0 %v2252_v5 }
 0x199   : > { %1144 = vmatmul.f32.gmra.mxu0 %v1062_v15  ;;  %1209 = vmatmul.f32.gmra.mxu1 %v1062_v15 }
 0x19a   : > { %1909 = vadd.xlane.f32.xlu0 %v4822_v21  ;;  %2270 = vmatpush.msrb.mxu0 %v2251_v51 }
 0x19b   : > { %1911 = vadd.xlane.f32.xlu2 %v4825_v47 }
 0x19c   : > { %2271 = vmatpush.msrb.mxu0 %v2250_v28 }
 0x19e   : > { %2272 = vmatpush.msrb.mxu0 %v2249_v62  ;;  %v4889_v62 = vld [vmem:[%s4246_s9 + $0x70] sm:$0xff] }
 0x1a0   : > { %2273 = vmatpush.msrb.mxu0 %v2248_v35 }
 0x1a1   : > { %1147 = vmatmul.f32.gmra.mxu0 %v1063_v29  ;;  %1212 = vmatmul.f32.gmra.mxu1 %v1063_v29 }
 0x1a2   : > { %2274 = vmatpush.msrb.mxu0 %v2247_v9 }
 0x1a4   : > { %2275 = vmatpush.msrb.mxu0 %v2246_v11 }
 0x1a6   : > { %2276 = vmatpush.msrb.mxu0 %v2245_v36 }
 0x1a8   : > { %2277 = vmatpush.msrb.mxu0 %v2244_v19 }
 0x1aa   : > { %2278 = vmatpush.msrb.mxu0 %v2243_v42 }
 0x1db   : > { %v4831_v46 = vpop.f32.mrf.mxu2  ;;  %v4833_v1 = vpop.f32.mrf.mxu3 }
 0x1dc   : > { %v4835_v17 = vpop.f32.mrf.mxu1  ;;  %v4858_v57 = vpop.f32.mrf.mxu0 }
 0x1e4   : > { %v4842_v63 = vpop.f32.mrf.mxu1  ;;  %v4896_v9 = vpop.f32.mrf.mxu0 }
 0x1e6   : > { %v1966_v3 = vpop.xlane.xlu2 %1965 }
 0x1e7   : > { %v1997_v61 = vmul.f32 %v1966_v3, %v4306_v22  ;;  %v4838_v2 = vpop.f32.mrf.mxu2  ;;  %v4840_v12 = vpop.f32.mrf.mxu3 }
 0x1e9   : > { %v2013_v0 = vadd.f32 1e-06, %v1997_v61 }
 0x1eb   : > { %3578 = vrsqrt.f32 %v2013_v0  ;;  %vm2035_vm1 = vweird.f32 %v2013_v0 }
 0x1ec   : > { %v4865_v15 = vpop.f32.mrf.mxu1 }
 0x1ed   : > { %v1968_v31 = vpop.xlane.xlu1 %1967 }
 0x1ee   : > { %v1900_v20 = vpop.xlane.xlu2 %1899  ;;  %v1998_v30 = vmul.f32 %v1968_v31, %v4306_v22 }
 0x1ef   : > { %v1924_v60 = vmul.f32 %v1900_v20, %v4306_v22  ;;  %v4848_v33 = vpop.f32.mrf.mxu2  ;;  %v4850_v16 = vpop.f32.mrf.mxu3 }
 0x1f0   : > { %v4846_v4 = vadd.f32 1e-06, %v1998_v30 }
 0x1f1   : > { %v3579_v59 = vpop.eup %3578  ;;  %v4856_v34 = vsub.f32 %v4853_v50, %v1924_v60 }
 0x1f2   : > { %v2030_v13 = vmul.f32 %v3579_v59, %v2013_v0  ;;  %3580 = vrsqrt.f32 %v4846_v4  ;;  %vm2036_vm2 = vweird.f32 %v3579_v59  ;;  %vm2045_vm4 = vweird.f32 %v4846_v4 }
 0x1f3   : > { %v1956_v40 = vmul.f32 %v4856_v34, %v4856_v34  ;;  %vm4876_vm3 = vmor %vm2035_vm1, %vm2036_vm2 }
 0x1f4   : > { %v2031_v43 = vmul.f32 %v3579_v59, %v2030_v13 }
 0x1f5   : > { %v1970_v52 = vpop.xlane.xlu0 %1969  ;;  %1979 = vadd.xlane.f32.xlu1 %v1956_v40  ;;  %v1902_v24 = vpop.xlane.xlu1 %1901 }
 0x1f6   : > { %v1999_v58 = vmul.f32 %v1970_v52, %v4306_v22  ;;  %v2032_v32 = vmul.f32 0.5, %v2031_v43  ;;  %v1972_v49 = vpop.xlane.xlu2 %1971  ;;  %v1925_v44 = vmul.f32 %v1902_v24, %v4306_v22 }
 0x1f7   : > { %v2000_v54 = vmul.f32 %v1972_v49, %v4306_v22  ;;  %v4884_v51 = vpop.f32.mrf.mxu2  ;;  %v4886_v28 = vpop.f32.mrf.mxu3  ;;  %v4929_v49 = vld [vmem:[%s4246_s9 + $0x78] sm:$0xff] }
 0x1f8   : > { %v4868_v6 = vadd.f32 1e-06, %v1999_v58  ;;  %v2033_v29 = vsub.f32 1.5, %v2032_v32  ;;  %v4874_v38 = vsub.f32 %v4871_v45, %v1925_v44  ;;  %v3581_v48 = vpop.eup %3580 }
 0x1f9   : > { %v4880_v55 = vadd.f32 1e-06, %v2000_v54  ;;  %v2040_v5 = vmul.f32 %v3581_v48, %v4846_v4  ;;  %vm2046_vm5 = vweird.f32 %v3581_v48 }
 0x1fa   : > { %3582 = vrsqrt.f32 %v4868_v6  ;;  %v2034_v14 = vmul.f32 %v3579_v59, %v2033_v29  ;;  %v1957_v3 = vmul.f32 %v4874_v38, %v4874_v38  ;;  %vm4918_vm6 = vmor %vm2045_vm4, %vm2046_vm5  ;;  %vm2055_vm7 = vweird.f32 %v4868_v6 }
 0x1fb   : > { %3584 = vrsqrt.f32 %v4880_v55  ;;  %v2041_v35 = vmul.f32 %v3581_v48, %v2040_v5  ;;  %vm2065_vm9 = vweird.f32 %v4880_v55 }
 0x1fc   : > { %v2038_v61 = vsel %vm4876_vm3, %v3579_v59, %v2034_v14  ;;  %1981 = vadd.xlane.f32.xlu0 %v1957_v3 }
 0x1fd   : > { %v1904_v0 = vpop.xlane.xlu0 %1903  ;;  %1913 = vadd.xlane.f32.xlu1 %v4889_v62  ;;  %v1974_v36 = vpop.xlane.xlu1 %1973  ;;  %v2189_v31 = vmul.f32 %v2038_v61, %v4616_v18  ;;  %v2042_v20 = vmul.f32 0.5, %v2041_v35 }
 0x1fe   : > { %v1926_v11 = vmul.f32 %v1904_v0, %v4306_v22  ;;  %v1906_v30 = vpop.xlane.xlu2 %1905  ;;  %v2001_v60 = vmul.f32 %v1974_v36, %v4306_v22  ;;  %v4909_v42 = vpop.f32.mrf.mxu1 }
 0x1ff   : > { %v1927_v59 = vmul.f32 %v1906_v30, %v4306_v22  ;;  %v2208_v40 = vmul.f32 %v4440_v26, %v2189_v31  ;;  %v2043_v18 = vsub.f32 1.5, %v2042_v20  ;;  %v4934_v7 = vpop.f32.mrf.mxu2  ;;  %v4936_v14 = vpop.f32.mrf.mxu3 }
 0x200   : > { %v4903_v19 = vpop.eup %3582  ;;  %v4907_v13 = vsub.f32 %v4766_v25, %v1926_v11  ;;  %v4914_v43 = vadd.f32 1e-06, %v2001_v60 }
 0x201   : > { %v2050_v4 = vmul.f32 %v4903_v19, %v4868_v6  ;;  %v4916_v52 = vpop.eup %3584  ;;  %v4923_v24 = vsub.f32 %v4780_v23, %v1927_v59  ;;  %v2227_v25 = vadd.f32 %v4459_v39, %v2208_v40  ;;  %v2044_v44 = vmul.f32 %v3581_v48, %v2043_v18  ;;  %v4950_v59 = vpop.f32.mrf.mxu0 }
 0x202   : > { %v1958_v32 = vmul.f32 %v4907_v13, %v4907_v13  ;;  %v2060_v54 = vmul.f32 %v4916_v52, %v4880_v55  ;;  %3586 = vrsqrt.f32 %v4914_v43  ;;  %vm2056_vm8 = vweird.f32 %v4903_v19 }
 0x203   : > { %v2051_v29 = vmul.f32 %v4903_v19, %v2050_v4  ;;  %2279 = vmatmul.f32.vlgmr.msrb.gmra.mxu0 %v2227_v25  ;;  %v1959_v3 = vmul.f32 %v4923_v24, %v4923_v24  ;;  %v2048_v61 = vsel %vm4918_vm6, %v3581_v48, %v2044_v44  ;;  %vm2066_vm10 = vweird.f32 %v4916_v52  ;;  %vm4963_vm11 = vmor %vm2055_vm7, %vm2056_vm8 }
 0x204   : > { %1983 = vadd.xlane.f32.xlu2 %v1958_v32  ;;  %v2061_v23 = vmul.f32 %v4916_v52, %v2060_v54  ;;  %1915 = vadd.xlane.f32.xlu0 %v4929_v49  ;;  %v2190_v11 = vmul.f32 %v2048_v61, %v4653_v56  ;;  %vm4986_vm12 = vmor %vm2065_vm9, %vm2066_vm10  ;;  %vm2075_vm13 = vweird.f32 %v4914_v43 }
 0x205   : > { %v2052_v5 = vmul.f32 0.5, %v2051_v29  ;;  %v1976_v35 = vpop.xlane.xlu0 %1975  ;;  %v1908_v0 = vpop.xlane.xlu1 %1907  ;;  %1985 = vadd.xlane.f32.xlu1 %v1959_v3 }
 0x206   : > { %v2002_v36 = vmul.f32 %v1976_v35, %v4306_v22  ;;  %v2062_v31 = vmul.f32 0.5, %v2061_v23  ;;  %v1928_v30 = vmul.f32 %v1908_v0, %v4306_v22  ;;  %v1978_v60 = vpop.xlane.xlu2 %1977  ;;  %v2209_v48 = vmul.f32 %v4440_v26, %v2190_v11  ;;  %v4970_v44 = vpop.f32.mrf.mxu1 }
 0x207   : > { %v2053_v20 = vsub.f32 1.5, %v2052_v5  ;;  %v2003_v18 = vmul.f32 %v1978_v60, %v4306_v22  ;;  %v4978_v5 = vpop.f32.mrf.mxu2  ;;  %v4980_v3 = vpop.f32.mrf.mxu3 }
 0x208   : > { %v4954_v40 = vadd.f32 1e-06, %v2002_v36  ;;  %v2063_v4 = vsub.f32 1.5, %v2062_v31  ;;  %v4968_v25 = vsub.f32 %v4810_v8, %v1928_v30  ;;  %v3587_v32 = vpop.eup %3586  ;;  %v2228_v54 = vadd.f32 %v4459_v39, %v2209_v48 }
 0x209   : > { %v2054_v56 = vmul.f32 %v4903_v19, %v2053_v20  ;;  %v4974_v29 = vadd.f32 1e-06, %v2003_v18  ;;  %v2070_v6 = vmul.f32 %v3587_v32, %v4914_v43  ;;  %vm2076_vm14 = vweird.f32 %v3587_v32 }
 0x20a   : > { %3588 = vrsqrt.f32 %v4954_v40  ;;  %v2064_v23 = vmul.f32 %v4916_v52, %v2063_v4  ;;  %v1960_v8 = vmul.f32 %v4968_v25, %v4968_v25  ;;  %vm5025_vm15 = vmor %vm2075_vm13, %vm2076_vm14  ;;  %vm2085_vm0 = vweird.f32 %v4954_v40 }
 0x20b   : > { %2282 = vmatmul.f32.gmra.mxu0 %v2228_v54  ;;  %v2058_v35 = vsel %vm4963_vm11, %v4903_v19, %v2054_v56  ;;  %3590 = vrsqrt.f32 %v4974_v29  ;;  %v2071_v0 = vmul.f32 %v3587_v32, %v2070_v6  ;;  %v5003_v19 = vpop.f32.mrf.mxu0  ;;  %vm2095_vm3 = vweird.f32 %v4974_v29 }
 0x20c   : > { %1987 = vadd.xlane.f32.xlu2 %v1960_v8  ;;  %v2191_v11 = vmul.f32 %v2058_v35, %v4716_v10  ;;  %v2068_v30 = vsel %vm4986_vm12, %v4916_v52, %v2064_v23 }
 0x20d   : > { %v1910_v36 = vpop.xlane.xlu0 %1909  ;;  %v2072_v20 = vmul.f32 0.5, %v2071_v0  ;;  %v2192_v54 = vmul.f32 %v2068_v30, %v4700_v53 }
 0x20e   : > { %v1929_v31 = vmul.f32 %v1910_v36, %v4306_v22  ;;  %v2210_v55 = vmul.f32 %v4440_v26, %v2191_v11  ;;  %v1912_v60 = vpop.xlane.xlu2 %1911 }
 0x20f   : > { %v1930_v10 = vmul.f32 %v1912_v60, %v4306_v22  ;;  %v2073_v4 = vsub.f32 1.5, %v2072_v20  ;;  %v1169_v8 = vpop.f32.mrf.mxu2  ;;  %v1234_v61 = vpop.f32.mrf.mxu3  ;;  %v1104_v20 = vld [vmem:[%s6444_s7] sm:$0x3] }
 0x210   : > { %v5000_v48 = vpop.eup %3588  ;;  %v5006_v18 = vsub.f32 %v4822_v21, %v1929_v31  ;;  %v2229_v56 = vadd.f32 %v4459_v39, %v2210_v55  ;;  %v2211_v31 = vmul.f32 %v4440_v26, %v2192_v54  ;;  %v5042_v60 = vperm.slane %v1104_v20, 0 }
 0x211   : > { %v2080_v58 = vmul.f32 %v5000_v48, %v4954_v40  ;;  %v5012_v52 = vpop.eup %3590  ;;  %v5018_v6 = vsub.f32 %v4825_v47, %v1930_v10  ;;  %v2074_v21 = vmul.f32 %v3587_v32, %v2073_v4  ;;  %v5031_v47 = vpop.f32.mrf.mxu1  ;;  %vm2086_vm1 = vweird.f32 %v5000_v48 }
 0x212   : > { %v1961_v23 = vmul.f32 %v5006_v18, %v5006_v18  ;;  %v2090_v0 = vmul.f32 %v5012_v52, %v4974_v29  ;;  %v5044_v10 = vperm.slane %v1104_v20, 1  ;;  %v2230_v4 = vadd.f32 %v4459_v39, %v2211_v31  ;;  %vm5051_vm2 = vmor %vm2085_vm0, %vm2086_vm1  ;;  %v5061_v39 = vld [vmem:[%s6447_s10] ss:$0 sm:$0xff] }
 0x213   : > { %v2081_v35 = vmul.f32 %v5000_v48, %v2080_v58  ;;  %2285 = vmatmul.f32.gmra.mxu0 %v2229_v56  ;;  %v1962_v53 = vmul.f32 %v5018_v6, %v5018_v6  ;;  %v2078_v30 = vsel %vm5025_vm15, %v3587_v32, %v2074_v21  ;;  %v5046_v26 = vpop.f32.mrf.mxu0  ;;  %vm2096_vm4 = vweird.f32 %v5012_v52 }
 0x214   : > { %1989 = vadd.xlane.f32.xlu0 %v1961_v23  ;;  %v2091_v55 = vmul.f32 %v5012_v52, %v2090_v0  ;;  %v2193_v56 = vmul.f32 %v2078_v30, %v4744_v37  ;;  %v1235_v0 = vadd.f32 %v1234_v61, %v5044_v10  ;;  %v1232_v31 = vadd.f32 %v4980_v3, %v5044_v10  ;;  %vm5086_vm5 = vmor %vm2095_vm3, %vm2096_vm4 }
 0x215   : > { %v2082_v36 = vmul.f32 0.5, %v2081_v35  ;;  %1991 = vadd.xlane.f32.xlu1 %v1962_v53  ;;  %v1170_v61 = vadd.f32 %v1169_v8, %v5042_v60  ;;  %v1229_v20 = vadd.f32 %v4936_v14, %v5044_v10  ;;  %v1226_v29 = vadd.f32 %v4886_v28, %v5044_v10  ;;  %v1297_v14 = vld [vmem:[%s4222_s15 + $0x38] sm:$0xff] }
 0x216   : > { %v2092_v35 = vmul.f32 0.5, %v2091_v55  ;;  %v2212_v37 = vmul.f32 %v5061_v39, %v2193_v56  ;;  %v1167_v55 = vadd.f32 %v4978_v5, %v5042_v60  ;;  %v1220_v5 = vadd.f32 %v4840_v12, %v5044_v10 }
 0x217   : > { %v2083_v43 = vsub.f32 1.5, %v2082_v36  ;;  %v1172_v54 = vpop.f32.mrf.mxu2  ;;  %v1237_v23 = vpop.f32.mrf.mxu3  ;;  %v1164_v56 = vadd.f32 %v4934_v7, %v5042_v60  ;;  %v1158_v32 = vadd.f32 %v4848_v33, %v5042_v60  ;;  %v1199_v33 = vadd.f32 %v4865_v15, %v5044_v10 }
 0x218   : > { %v1173_v40 = vadd.f32 %v1172_v54, %v5042_v60  ;;  %v1238_v21 = vadd.f32 %v1237_v23, %v5044_v10  ;;  %v2093_v53 = vsub.f32 1.5, %v2092_v35  ;;  %v1217_v54 = vadd.f32 %v4833_v1, %v5044_v10 }
 0x219   : > { %v2084_v58 = vmul.f32 %v5000_v48, %v2083_v43  ;;  %v1210_v11 = vpop.f32.mrf.mxu1  ;;  %v5077_v43 = vld [vmem:[%s6448_s11] ss:$0 sm:$0xff] }
 0x21a   : > { %1339 = vmatpush.msrb.mxu2 %v1238_v21  ;;  %2344 = vmatpush.xpose.msrb.mxu1 %v1173_v40  ;;  %v2094_v8 = vmul.f32 %v5012_v52, %v2093_v53  ;;  %v1211_v12 = vadd.f32 %v1210_v11, %v5044_v10  ;;  %v1155_v21 = vadd.f32 %v4838_v2, %v5042_v60  ;;  %v1291_v11 = vld [vmem:[%s4222_s15 + $0x8] sm:$0xff] }
 0x21b   : > { %2288 = vmatmul.f32.gmra.mxu0 %v2230_v4  ;;  %v2088_v36 = vsel %vm5051_vm2, %v5000_v48, %v2084_v58  ;;  %v2231_v48 = vadd.f32 %v5077_v43, %v2212_v37  ;;  %v1142_v30 = vpop.f32.mrf.mxu0  ;;  %v1223_v4 = vadd.f32 %v4850_v16, %v5044_v10  ;;  %v1193_v2 = vadd.f32 %v4835_v17, %v5044_v10 }
 0x21c   : > { %1340 = vmatpush.msrb.mxu2 %v1235_v0  ;;  %v2194_v3 = vmul.f32 %v2088_v36, %v4789_v27  ;;  %v2098_v28 = vsel %vm5086_vm5, %v5012_v52, %v2094_v8  ;;  %v1161_v52 = vadd.f32 %v4884_v51, %v5042_v60  ;;  %v1205_v51 = vadd.f32 %v4970_v44, %v5044_v10 }
 0x21d   : > { %v2195_v23 = vmul.f32 %v2098_v28, %v4798_v41  ;;  %v1208_v41 = vadd.f32 %v5031_v47, %v5044_v10  ;;  %v1202_v0 = vadd.f32 %v4909_v42, %v5044_v10  ;;  %v1152_v44 = vadd.f32 %v4831_v46, %v5042_v60  ;;  %v1290_v42 = vld [vmem:[%s4222_s15] sm:$0xff] }
 0x21e   : > { %1341 = vmatpush.msrb.mxu2 %v1232_v31  ;;  %2345 = vmatpush.xpose.msrb.mxu1 %v1170_v61  ;;  %v2213_v27 = vmul.f32 %v5061_v39, %v2194_v3  ;;  %v1196_v47 = vadd.f32 %v4842_v63, %v5044_v10  ;;  %v1143_v63 = vadd.f32 %v1142_v30, %v5042_v60  ;;  %v1293_v31 = vld [vmem:[%s4222_s15 + $0x18] sm:$0xff]  ;;  %v1296_v3 = vld [vmem:[%s4222_s15 + $0x30] sm:$0xff] }
 0x21f   : > { %v2214_v7 = vmul.f32 %v5061_v39, %v2195_v23  ;;  %v1140_v17 = vadd.f32 %v5046_v26, %v5042_v60  ;;  %v1137_v53 = vadd.f32 %v5003_v19, %v5042_v60  ;;  %v1134_v36 = vadd.f32 %v4950_v59, %v5042_v60  ;;  %v1295_v19 = vld [vmem:[%s4222_s15 + $0x28] sm:$0xff] }
 0x220   : > { %1342 = vmatpush.msrb.mxu2 %v1229_v20  ;;  %v2232_v16 = vadd.f32 %v5077_v43, %v2213_v27  ;;  %v1131_v61 = vadd.f32 %v4896_v9, %v5042_v60  ;;  %v1128_v26 = vadd.f32 %v4858_v57, %v5042_v60  ;;  %v1294_v20 = vld [vmem:[%s4222_s15 + $0x20] sm:$0xff] }
 0x221   : > { %v1213_v58 = vpop.f32.mrf.mxu1  ;;  %v2233_v40 = vadd.f32 %v5077_v43, %v2214_v7 }
 0x222   : > { %1343 = vmatpush.msrb.mxu2 %v1226_v29  ;;  %2346 = vmatpush.xpose.msrb.mxu1 %v1167_v55  ;;  %v1214_v35 = vadd.f32 %v1213_v58, %v5044_v10  ;;  %v1292_v10 = vld [vmem:[%s4222_s15 + $0x10] sm:$0xff] }
 0x223   : > { %2291 = vmatmul.f32.gmra.mxu0 %v2231_v48  ;;  %v1145_v1 = vpop.f32.mrf.mxu0 }
 0x224   : > { %1344 = vmatpush.msrb.mxu2 %v1223_v4  ;;  %v1146_v46 = vadd.f32 %v1145_v1, %v5042_v60 }
 0x226   : > { %1345 = vmatpush.msrb.mxu2 %v1220_v5  ;;  %2347 = vmatpush.xpose.msrb.mxu1 %v1164_v56 }
 0x228   : > { %1346 = vmatpush.msrb.mxu2 %v1217_v54 }
 0x22a   : > { %1347 = vmatpush.msrb.mxu2 %v1214_v35  ;;  %2348 = vmatpush.xpose.msrb.mxu1 %v1161_v52  ;;  %v1298_v52 = vld [vmem:[%s4222_s15 + $0x40] sm:$0xff] }
 0x22b   : > { %2294 = vmatmul.f32.gmra.mxu0 %v2232_v16  ;;  %v1148_v37 = vpop.f32.mrf.mxu0 }
 0x22c   : > { %1348 = vmatpush.msrb.mxu2 %v1211_v12  ;;  %v1149_v15 = vadd.f32 %v1148_v37, %v5042_v60 }
 0x22e   : > { %1349 = vmatpush.msrb.mxu2 %v1208_v41  ;;  %2349 = vmatpush.xpose.msrb.mxu1 %v1158_v32 }
 0x230   : > { %1350 = vmatpush.msrb.mxu2 %v1205_v51 }
 0x232   : > { %1351 = vmatpush.msrb.mxu2 %v1202_v0  ;;  %2350 = vmatpush.xpose.msrb.mxu1 %v1155_v21 }
 0x233   : > { %2297 = vmatmul.f32.gmra.mxu0 %v2233_v40 }
 0x234   : > { %1352 = vmatpush.msrb.mxu2 %v1199_v33 }
 0x236   : > { %1353 = vmatpush.msrb.mxu2 %v1196_v47  ;;  %2351 = vmatpush.xpose.msrb.mxu1 %v1152_v44  ;;  %v5170_v44 = vld [vmem:[#allocation9] ss:$0 sm:$0xff] }
 0x238   : > { %1354 = vmatpush.msrb.mxu2 %v1193_v2 }
 0x239   : > { %1355 = vmatmul.f32.vlgmr.msrb.gmra.mxu2 %v1290_v42 }
 0x23a   : > { %2352 = vmatpush.xpose.msrb.mxu1 %v1149_v15 }
 0x23e   : > { %2353 = vmatpush.xpose.msrb.mxu1 %v1146_v46 }
 0x241   : > { %1358 = vmatmul.f32.gmra.mxu2 %v1291_v11 }
 0x242   : > { %2354 = vmatpush.xpose.msrb.mxu1 %v1143_v63  ;;  %v1299_v63 = vld [vmem:[%s4222_s15 + $0x48] sm:$0xff] }
 0x246   : > { %2355 = vmatpush.xpose.msrb.mxu1 %v1140_v17 }
 0x249   : > { %1361 = vmatmul.f32.gmra.mxu2 %v1292_v10 }
 0x24a   : > { %2356 = vmatpush.xpose.msrb.mxu1 %v1137_v53 }
 0x24e   : > { %2357 = vmatpush.xpose.msrb.mxu1 %v1134_v36 }
 0x251   : > { %1364 = vmatmul.f32.gmra.mxu2 %v1293_v31 }
 0x252   : > { %2358 = vmatpush.xpose.msrb.mxu1 %v1131_v61 }
 0x256   : > { %2359 = vmatpush.xpose.msrb.mxu1 %v1128_v26 }
 0x259   : > { %1367 = vmatmul.f32.gmra.mxu2 %v1294_v20 }
 0x261   : > { %1370 = vmatmul.f32.gmra.mxu2 %v1295_v19 }
 0x268   : > { %v1980_v48 = vpop.xlane.xlu1 %1979 }
 0x269   : > { %v2004_v59 = vmul.f32 %v1980_v48, %v4306_v22  ;;  %1373 = vmatmul.f32.gmra.mxu2 %v1296_v3 }
 0x26b   : > { %v2020_v8 = vadd.f32 1e-06, %v2004_v59 }
 0x26d   : > { %3592 = vrsqrt.f32 %v2020_v8  ;;  %vm2105_vm6 = vweird.f32 %v2020_v8 }
 0x26f   : > { %v1982_v29 = vpop.xlane.xlu0 %1981 }
 0x270   : > { %v2005_v9 = vmul.f32 %v1982_v29, %v4306_v22  ;;  %v1914_v55 = vpop.xlane.xlu1 %1913 }
 0x271   : > { %v1931_v30 = vmul.f32 %v1914_v55, %v4306_v22  ;;  %1376 = vmatmul.f32.gmra.mxu2 %v1297_v14 }
 0x272   : > { %v2021_v57 = vadd.f32 1e-06, %v2005_v9 }
 0x273   : > { %v3593_v60 = vpop.eup %3592  ;;  %v5153_v4 = vsub.f32 %v4889_v62, %v1931_v30 }
 0x274   : > { %v2100_v27 = vmul.f32 %v3593_v60, %v2020_v8  ;;  %3594 = vrsqrt.f32 %v2021_v57  ;;  %vm2106_vm7 = vweird.f32 %v3593_v60  ;;  %vm2115_vm9 = vweird.f32 %v2021_v57 }
 0x275   : > { %v1963_v28 = vmul.f32 %v5153_v4, %v5153_v4  ;;  %vm5164_vm8 = vmor %vm2105_vm6, %vm2106_vm7 }
 0x276   : > { %v2101_v5 = vmul.f32 %v3593_v60, %v2100_v27 }
 0x277   : > { %v1984_v56 = vpop.xlane.xlu2 %1983  ;;  %1993 = vadd.xlane.f32.xlu2 %v1963_v28  ;;  %v1916_v54 = vpop.xlane.xlu0 %1915  ;;  %v1300_v28 = vld [vmem:[%s4222_s15 + $0x50] sm:$0xff] }
 0x278   : > { %v2006_v58 = vmul.f32 %v1984_v56, %v4306_v22  ;;  %v2102_v16 = vmul.f32 0.5, %v2101_v5  ;;  %v1932_v23 = vmul.f32 %v1916_v54, %v4306_v22  ;;  %v1986_v35 = vpop.xlane.xlu1 %1985 }
 0x279   : > { %v2007_v32 = vmul.f32 %v1986_v35, %v4306_v22  ;;  %1379 = vmatmul.f32.gmra.mxu2 %v1298_v52 }
 0x27a   : > { %v2022_v62 = vadd.f32 1e-06, %v2006_v58  ;;  %v3595_v12 = vpop.eup %3594  ;;  %v2103_v7 = vsub.f32 1.5, %v2102_v16  ;;  %v5161_v1 = vsub.f32 %v4929_v49, %v1932_v23 }
 0x27b   : > { %v2110_v51 = vmul.f32 %v3595_v12, %v2021_v57  ;;  %v2023_v21 = vadd.f32 1e-06, %v2007_v32  ;;  %vm2116_vm10 = vweird.f32 %v3595_v12 }
 0x27c   : > { %3596 = vrsqrt.f32 %v2022_v62  ;;  %v2104_v40 = vmul.f32 %v3593_v60, %v2103_v7  ;;  %v1964_v0 = vmul.f32 %v5161_v1, %v5161_v1  ;;  %vm5179_vm11 = vmor %vm2115_vm9, %vm2116_vm10  ;;  %vm2125_vm12 = vweird.f32 %v2022_v62 }
 0x27d   : > { %v2111_v33 = vmul.f32 %v3595_v12, %v2110_v51  ;;  %3598 = vrsqrt.f32 %v2023_v21  ;;  %vm2135_vm15 = vweird.f32 %v2023_v21 }
 0x27e   : > { %1995 = vadd.xlane.f32.xlu0 %v1964_v0  ;;  %v2108_v49 = vsel %vm5164_vm8, %v3593_v60, %v2104_v40 }
 0x27f   : > { %v2112_v47 = vmul.f32 0.5, %v2111_v33  ;;  %v1988_v37 = vpop.xlane.xlu2 %1987  ;;  %v2196_v2 = vmul.f32 %v2108_v49, %v4856_v34 }
 0x280   : > { %v2008_v42 = vmul.f32 %v1988_v37, %v4306_v22  ;;  %v2280_v15 = vpop.f32.mrf.mxu0 }
 0x281   : > { %v2113_v11 = vsub.f32 1.5, %v2112_v47  ;;  %v2281_v17 = vadd.f32 %v5170_v44, %v2280_v15  ;;  %v2215_v10 = vmul.f32 %v5061_v39, %v2196_v2  ;;  %1382 = vmatmul.f32.gmra.mxu2 %v1299_v63  ;;  %v1301_v47 = vld [vmem:[%s4222_s15 + $0x58] sm:$0xff] }
 0x282   : > { %v3597_v46 = vpop.eup %3596  ;;  %v5183_v31 = vadd.f32 1e-06, %v2008_v42 }
 0x283   : > { %v2120_v36 = vmul.f32 %v3597_v46, %v2022_v62  ;;  %v2114_v61 = vmul.f32 %v3595_v12, %v2113_v11  ;;  %2360 = vmatmul.f32.vlgmr.msrb.gmra.mxu1 %v2281_v17  ;;  %v2234_v34 = vadd.f32 %v5077_v43, %v2215_v10  ;;  %v3599_v26 = vpop.eup %3598  ;;  %vm2126_vm13 = vweird.f32 %v3597_v46 }
 0x284   : > { %3600 = vrsqrt.f32 %v5183_v31  ;;  %v2130_v19 = vmul.f32 %v3599_v26, %v2023_v21  ;;  %vm5192_vm14 = vmor %vm2125_vm12, %vm2126_vm13  ;;  %vm2136_vm0 = vweird.f32 %v3599_v26  ;;  %vm2145_vm2 = vweird.f32 %v5183_v31 }
 0x285   : > { %v2121_v20 = vmul.f32 %v3597_v46, %v2120_v36  ;;  %2300 = vmatmul.f32.gmra.mxu0 %v2234_v34  ;;  %v2118_v48 = vsel %vm5179_vm11, %v3595_v12, %v2114_v61  ;;  %vm5203_vm1 = vmor %vm2135_vm15, %vm2136_vm0  ;;  %v1302_v34 = vld [vmem:[%s4222_s15 + $0x60] sm:$0xff] }
 0x286   : > { %v2197_v59 = vmul.f32 %v2118_v48, %v4874_v38  ;;  %v2131_v29 = vmul.f32 %v3599_v26, %v2130_v19 }
 0x287   : > { %v2122_v3 = vmul.f32 0.5, %v2121_v20  ;;  %v1990_v8 = vpop.xlane.xlu0 %1989 }
 0x288   : > { %v2009_v9 = vmul.f32 %v1990_v8, %v4306_v22  ;;  %v2283_v14 = vpop.f32.mrf.mxu0  ;;  %v2216_v30 = vmul.f32 %v5061_v39, %v2197_v59  ;;  %v1992_v57 = vpop.xlane.xlu1 %1991  ;;  %v2132_v27 = vmul.f32 0.5, %v2131_v29 }
 0x289   : > { %v2123_v55 = vsub.f32 1.5, %v2122_v3  ;;  %v2284_v5 = vadd.f32 %v5170_v44, %v2283_v14  ;;  %v2010_v38 = vmul.f32 %v1992_v57, %v4306_v22  ;;  %1385 = vmatmul.f32.gmra.mxu2 %v1300_v28  ;;  %v1304_v28 = vld [vmem:[%s4222_s15 + $0x70] sm:$0xff] }
 0x28a   : > { %v2025_v56 = vadd.f32 1e-06, %v2009_v9  ;;  %v3601_v58 = vpop.eup %3600  ;;  %v2235_v16 = vadd.f32 %v5077_v43, %v2216_v30  ;;  %v2133_v23 = vsub.f32 1.5, %v2132_v27  ;;  %v1303_v9 = vld [vmem:[%s4222_s15 + $0x68] sm:$0xff] }
 0x28b   : > { %v2124_v54 = vmul.f32 %v3597_v46, %v2123_v55  ;;  %v2140_v52 = vmul.f32 %v3601_v58, %v5183_v31  ;;  %2363 = vmatmul.f32.gmra.mxu1 %v2284_v5  ;;  %v2026_v35 = vadd.f32 1e-06, %v2010_v38  ;;  %vm2146_vm3 = vweird.f32 %v3601_v58 }
 0x28c   : > { %3602 = vrsqrt.f32 %v2025_v56  ;;  %v2134_v12 = vmul.f32 %v3599_v26, %v2133_v23  ;;  %vm2147_vm4 = vmor %vm2145_vm2, %vm2146_vm3  ;;  %vm2155_vm5 = vweird.f32 %v2025_v56 }
 0x28d   : > { %v2128_v62 = vsel %vm5192_vm14, %v3597_v46, %v2124_v54  ;;  %v2141_v32 = vmul.f32 %v3601_v58, %v2140_v52  ;;  %2303 = vmatmul.f32.gmra.mxu0 %v2235_v16  ;;  %3604 = vrsqrt.f32 %v2026_v35  ;;  %vm2165_vm8 = vweird.f32 %v2026_v35  ;;  %v1305_v16 = vld [vmem:[%s4222_s15 + $0x78] sm:$0xff] }
 0x28e   : > { %v2198_v41 = vmul.f32 %v2128_v62, %v4907_v13  ;;  %v2138_v0 = vsel %vm5203_vm1, %v3599_v26, %v2134_v12  ;;  %v2461_v62 = vld [vmem:[%s669_s14] sm:$0x1]  ;;  %s5957_s14 = scalar_lea.vmem %s6626_s26, %s3382_s13 }
 0x28f   : > { %v2142_v51 = vmul.f32 0.5, %v2141_v32  ;;  %v2199_v13 = vmul.f32 %v2138_v0, %v4923_v24  ;;  %vm2462_vm11 = vcmp.gt.f32.partialorder %v2461_v62, 0.5 }
 0x290   : > { %v2217_v40 = vmul.f32 %v5061_v39, %v2198_v41  ;;  %v2286_v21 = vpop.f32.mrf.mxu0 }
 0x291   : > { %v2143_v49 = vsub.f32 1.5, %v2142_v51  ;;  %v2287_v37 = vadd.f32 %v5170_v44, %v2286_v21  ;;  %1388 = vmatmul.f32.gmra.mxu2 %v1301_v47  ;;  %v2218_v10 = vmul.f32 %v5061_v39, %v2199_v13  ;;  %v4009_v47 = vmov 0.0  }
 0x292   : > { %v3603_v33 = vpop.eup %3602  ;;  %v2236_v2 = vadd.f32 %v5077_v43, %v2217_v40  ;;  %v3711_v40 = vld [vmem:[%s4246_s9] sm:$0xff] }
 0x293   : > { %v2150_v42 = vmul.f32 %v3603_v33, %v2025_v56  ;;  %2366 = vmatmul.f32.gmra.mxu1 %v2287_v37  ;;  %v3605_v15 = vpop.eup %3604  ;;  %v2144_v46 = vmul.f32 %v3601_v58, %v2143_v49  ;;  %vm2156_vm6 = vweird.f32 %v3603_v33  ;;  %v2237_v24 = vadd.f32 %v5077_v43, %v2218_v10  ;;  %v3714_v10 = vld [vmem:[%s4246_s9 + $0x18] sm:$0xff] }
 0x294   : > { %v2160_v63 = vmul.f32 %v3605_v15, %v2026_v35  ;;  %vm2157_vm7 = vmor %vm2155_vm5, %vm2156_vm6  ;;  %vm2166_vm9 = vweird.f32 %v3605_v15  ;;  %v4008_v56 = vmov 0  }
 0x295   : > { %v2151_v11 = vmul.f32 %v3603_v33, %v2150_v42  ;;  %2306 = vmatmul.f32.gmra.mxu0 %v2236_v2  ;;  %v2148_v31 = vsel %vm2147_vm4, %v3601_v58, %v2144_v46  ;;  %vm2167_vm10 = vmor %vm2165_vm8, %vm2166_vm9  ;;  %3535 = vset.pattern.permute.xlu0 %v4008_v56  ;;  %v2463_v12 = vsel %vm2462_vm11, 1, %v4008_v56  ;;  %v3712_v2 = vld [vmem:[%s4246_s9 + $0x8] sm:$0xff] }
 0x296   : > { %v2161_v61 = vmul.f32 %v3605_v15, %v2160_v63  ;;  %v2200_v20 = vmul.f32 %v2148_v31, %v4968_v25  ;;  %3536 = vset.pattern.permute.xlu1 %v4008_v56  ;;  %3537 = vset.pattern.permute.xlu2 %v4008_v56  ;;  %v2464_v41 = vperm.slane %v2463_v12, 0 }
 0x297   : > { %v2152_v17 = vmul.f32 0.5, %v2151_v11 }
 0x298   : > { %v2289_v36 = vpop.f32.mrf.mxu0  ;;  %v2162_v48 = vmul.f32 0.5, %v2161_v61  ;;  %v2219_v3 = vmul.f32 %v5061_v39, %v2200_v20  ;;  %vm5248_vm13 = vcmp.eq.s32.totalorder %v2464_v41, 1  ;;  %v3715_v61 = vld [vmem:[%s4246_s9 + $0x20] sm:$0xff] }
 0x299   : > { %v2153_v53 = vsub.f32 1.5, %v2152_v17  ;;  %v2290_v26 = vadd.f32 %v5170_v44, %v2289_v36  ;;  %1391 = vmatmul.f32.gmra.mxu2 %v1302_v34 }
 0x29a   : > { %v2163_v59 = vsub.f32 1.5, %v2162_v48  ;;  %v2238_v14 = vadd.f32 %v5077_v43, %v2219_v3 }
 0x29b   : > { %2369 = vmatmul.f32.gmra.mxu1 %v2290_v26  ;;  %v2154_v19 = vmul.f32 %v3603_v33, %v2153_v53  ;;  %v3716_v26 = vld [vmem:[%s4246_s9 + $0x28] sm:$0xff] }
 0x29c   : > { %v2164_v30 = vmul.f32 %v3605_v15, %v2163_v59  ;;  %v3717_v59 = vld [vmem:[%s4246_s9 + $0x30] sm:$0xff] }
 0x29d   : > { %2309 = vmatmul.f32.gmra.mxu0 %v2237_v24  ;;  %v2158_v29 = vsel %vm2157_vm7, %v3603_v33, %v2154_v19 }
 0x29e   : > { %v2201_v25 = vmul.f32 %v2158_v29, %v5006_v18  ;;  %v2168_v27 = vsel %vm2167_vm10, %v3605_v15, %v2164_v30  ;;  %v3713_v15 = vld [vmem:[%s4246_s9 + $0x10] sm:$0xff] }
 0x29f   : > { %v2202_v38 = vmul.f32 %v2168_v27, %v5018_v6  ;;  %v2409_v6 = vlaneseq }
 0x2a0   : > { %v2292_v8 = vpop.f32.mrf.mxu0  ;;  %v2220_v57 = vmul.f32 %v5061_v39, %v2201_v25 }
 0x2a1   : > { %v2293_v55 = vadd.f32 %v5170_v44, %v2292_v8  ;;  %1394 = vmatmul.f32.gmra.mxu2 %v1303_v9  ;;  %v2221_v58 = vmul.f32 %v5061_v39, %v2202_v38  ;;  %v5239_v35 = vshrl.u32 %v2409_v6, 7  ;;  %v5242_v32 = vand.u32 127, %v2409_v6 }
 0x2a2   : > { %v2239_v18 = vadd.f32 %v5077_v43, %v2220_v57 }
 0x2a3   : > { %2372 = vmatmul.f32.gmra.mxu1 %v2293_v55  ;;  %v2240_v52 = vadd.f32 %v5077_v43, %v2221_v58  ;;  %v2411_v7 = vadd.s32 8, %v5239_v35  ;;  %vm2445_vm15 = vcmp.ge.s32.totalorder %v5239_v35, %v5242_v32 }
 0x2a4   : > { %vm5274_vm0 = vmand %vm2445_vm15, %vm5248_vm13 }
 0x2a5   : > { %2312 = vmatmul.f32.gmra.mxu0 %v2238_v14  ;;  %vm2446_vm12 = vcmp.ge.s32.totalorder %v2411_v7, %v5242_v32  ;;  %v2498_v17 = vsel %vm5274_vm0, 1.0, %v4009_v47 }
 0x2a6   : > { %vm5255_vm14 = vmand %vm2446_vm12, %vm5248_vm13 }
 0x2a7   : > { %v2499_v37 = vsel %vm5255_vm14, 1.0, %v4009_v47 }
 0x2a8   : > { %v2295_v60 = vpop.f32.mrf.mxu0 }
 0x2a9   : > { %v2296_v5 = vadd.f32 %v5170_v44, %v2295_v60  ;;  %1397 = vmatmul.f32.gmra.mxu2 %v1304_v28 }
 0x2ab   : > { %2375 = vmatmul.f32.gmra.mxu1 %v2296_v5 }
 0x2ad   : > { %2315 = vmatmul.f32.gmra.mxu0 %v2239_v18 }
 0x2b0   : > { %v2298_v54 = vpop.f32.mrf.mxu0 }
 0x2b1   : > { %v2299_v23 = vadd.f32 %v5170_v44, %v2298_v54  ;;  %1400 = vmatmul.f32.gmra.mxu2 %v1305_v16 }
 0x2b3   : > { %2378 = vmatmul.f32.gmra.mxu1 %v2299_v23 }
 0x2b5   : > { %2318 = vmatmul.f32.gmra.mxu0 %v2240_v52 }
 0x2bc   : > { %v1356_v51 = vpop.f32.mrf.mxu2 }
 0x2bd   : > { %v5245_v21 = vadd.f32 %v3711_v40, %v1356_v51  ;;  %v3718_v40 = vld [vmem:[%s4246_s9 + $0x48] sm:$0xff] }
 0x2bf   : > { %1420 = vadd.xlane.f32.xlu1 %v5245_v21 }
 0x2c4   : > { %v1359_v49 = vpop.f32.mrf.mxu2 }
 0x2c5   : > { %v5263_v42 = vadd.f32 %v3712_v2, %v1359_v49 }
 0x2c7   : > { %2516 = vmax.xlane.f32.xlu1 %v2499_v37  ;;  %1422 = vadd.xlane.f32.xlu2 %v5263_v42 }
 0x2cc   : > { %v1362_v13 = vpop.f32.mrf.mxu2 }
 0x2cd   : > { %v5267_v46 = vadd.f32 %v3713_v15, %v1362_v13 }
 0x2cf   : > { %1424 = vadd.xlane.f32.xlu0 %v5267_v46 }
 0x2d4   : > { %v1365_v63 = vpop.f32.mrf.mxu2 }
 0x2d5   : > { %v5282_v53 = vadd.f32 %v3714_v10, %v1365_v63 }
 0x2d7   : > { %2514 = vmax.xlane.f32.xlu0 %v2498_v17  ;;  %1426 = vadd.xlane.f32.xlu1 %v5282_v53  ;;  %v3719_v17 = vld [vmem:[%s4246_s9 + $0x50] sm:$0xff] }
 0x2dc   : > { %v1368_v36 = vpop.f32.mrf.mxu2 }
 0x2dd   : > { %v5286_v31 = vadd.f32 %v3715_v61, %v1368_v36 }
 0x2df   : > { %1428 = vadd.xlane.f32.xlu2 %v5286_v31 }
 0x2e4   : > { %v1371_v34 = vpop.f32.mrf.mxu2 }
 0x2e5   : > { %v5290_v24 = vadd.f32 %v3716_v26, %v1371_v34  ;;  %v3720_v34 = vld [vmem:[%s4246_s9 + $0x58] sm:$0xff] }
 0x2e7   : > { %6571 = vst [vmem:[#allocation24_spill] sm:$0xff] %v5290_v24  ;;  %1430 = vadd.xlane.f32.xlu0 %v5290_v24 }
 0x2ea   : > { %v1994_v20 = vpop.xlane.xlu2 %1993 }
 0x2eb   : > { %v2011_v19 = vmul.f32 %v1994_v20, %v4306_v22 }
 0x2ec   : > { %v1374_v3 = vpop.f32.mrf.mxu2 }
 0x2ed   : > { %v2027_v48 = vadd.f32 1e-06, %v2011_v19  ;;  %v5295_v8 = vadd.f32 %v3717_v59, %v1374_v3  ;;  %v3721_v59 = vld [vmem:[%s4246_s9 + $0x60] sm:$0xff] }
 0x2ef   : > { %3606 = vrsqrt.f32 %v2027_v48  ;;  %6572 = vst [vmem:[#allocation25_spill] sm:$0xff] %v5295_v8  ;;  %1432 = vadd.xlane.f32.xlu1 %v5295_v8  ;;  %vm2175_vm1 = vweird.f32 %v2027_v48 }
 0x2f1   : > { %v1996_v29 = vpop.xlane.xlu0 %1995 }
 0x2f2   : > { %v2012_v9 = vmul.f32 %v1996_v29, %v4306_v22 }
 0x2f4   : > { %v2028_v55 = vadd.f32 1e-06, %v2012_v9  ;;  %v1377_v30 = vpop.f32.mrf.mxu2 }
 0x2f5   : > { %v3607_v14 = vpop.eup %3606  ;;  %v5300_v60 = vadd.f32 %v4853_v50, %v1377_v30 }
 0x2f6   : > { %v2170_v25 = vmul.f32 %v3607_v14, %v2027_v48  ;;  %3608 = vrsqrt.f32 %v2028_v55  ;;  %vm2176_vm2 = vweird.f32 %v3607_v14  ;;  %vm2185_vm4 = vweird.f32 %v2028_v55 }
 0x2f7   : > { %6573 = vst [vmem:[#allocation26_spill] sm:$0xff] %v5300_v60  ;;  %1434 = vadd.xlane.f32.xlu0 %v5300_v60  ;;  %vm2177_vm3 = vmor %vm2175_vm1, %vm2176_vm2 }
 0x2f8   : > { %v2171_v57 = vmul.f32 %v3607_v14, %v2170_v25  ;;  %v3722_v25 = vld [vmem:[%s4246_s9 + $0x68] sm:$0xff] }
 0x2fa   : > { %v2172_v27 = vmul.f32 0.5, %v2171_v57 }
 0x2fc   : > { %v3609_v28 = vpop.eup %3608  ;;  %v2173_v5 = vsub.f32 1.5, %v2172_v27  ;;  %v1380_v58 = vpop.f32.mrf.mxu2 }
 0x2fd   : > { %v2180_v56 = vmul.f32 %v3609_v28, %v2028_v55  ;;  %v5304_v54 = vadd.f32 %v4871_v45, %v1380_v58  ;;  %vm2186_vm5 = vweird.f32 %v3609_v28 }
 0x2fe   : > { %v2174_v18 = vmul.f32 %v3607_v14, %v2173_v5  ;;  %vm2187_vm6 = vmor %vm2185_vm4, %vm2186_vm5  ;;  %v3723_v5 = vld [vmem:[%s4246_s9 + $0x70] sm:$0xff] }
 0x2ff   : > { %v2181_v38 = vmul.f32 %v3609_v28, %v2180_v56  ;;  %6574 = vst [vmem:[#allocation27_spill] sm:$0xff] %v5304_v54  ;;  %1436 = vadd.xlane.f32.xlu2 %v5304_v54 }
 0x300   : > { %v2178_v16 = vsel %vm2177_vm3, %v3607_v14, %v2174_v18 }
 0x301   : > { %v2182_v23 = vmul.f32 0.5, %v2181_v38  ;;  %v2203_v50 = vmul.f32 %v2178_v16, %v5153_v4 }
 0x302   : > { %v2301_v52 = vpop.f32.mrf.mxu0 }
 0x303   : > { %v2183_v62 = vsub.f32 1.5, %v2182_v23  ;;  %v2302_v6 = vadd.f32 %v5170_v44, %v2301_v52  ;;  %v2222_v12 = vmul.f32 %v5061_v39, %v2203_v50  ;;  %v2414_v23 = vadd.s32 32, %v5239_v35 }
 0x304   : > { %v1383_v41 = vpop.f32.mrf.mxu2 }
 0x305   : > { %v2184_v7 = vmul.f32 %v3609_v28, %v2183_v62  ;;  %2381 = vmatmul.f32.gmra.mxu1 %v2302_v6  ;;  %v2241_v45 = vadd.f32 %v5077_v43, %v2222_v12  ;;  %v5312_v49 = vadd.f32 %v3718_v40, %v1383_v41  ;;  %v3724_v62 = vld [vmem:[%s4246_s9 + $0x78] sm:$0xff]  ;;  %v2412_v12 = vadd.s32 16, %v5239_v35  ;;  %s6673_s9 = sld [smem:[#allocation50_spill]] }
 0x306   : > { %vm2449_vm9 = vcmp.ge.s32.totalorder %v2414_v23, %v5242_v32 }
 0x307   : > { %2321 = vmatmul.f32.gmra.mxu0 %v2241_v45  ;;  %v2188_v51 = vsel %vm2187_vm6, %v3609_v28, %v2184_v7  ;;  %6575 = vst [vmem:[#allocation28_spill] sm:$0xff] %v5312_v49  ;;  %1438 = vadd.xlane.f32.xlu0 %v5312_v49  ;;  %vm2447_vm10 = vcmp.ge.s32.totalorder %v2412_v12, %v5242_v32  ;;  %vm5371_vm11 = vmand %vm2449_vm9, %vm5248_vm13 }
 0x308   : > { %v2204_v4 = vmul.f32 %v2188_v51, %v5161_v1  ;;  %v2502_v51 = vsel %vm5371_vm11, 1.0, %v4009_v47  ;;  %vm5380_vm12 = vmand %vm2447_vm10, %vm5248_vm13 }
 0x30a   : > { %v2304_v37 = vpop.f32.mrf.mxu0  ;;  %v2223_v2 = vmul.f32 %v5061_v39, %v2204_v4  ;;  %v2413_v39 = vadd.s32 24, %v5239_v35 }
 0x30b   : > { %v2305_v13 = vadd.f32 %v5170_v44, %v2304_v37  ;;  %v2415_v37 = vadd.s32 40, %v5239_v35  ;;  %s3125_s6 = scalar_lea.hbm %s6673_s9, %s3384_s18 }
 0x30c   : > { %v2242_v15 = vadd.f32 %v5077_v43, %v2223_v2  ;;  %v1386_v63 = vpop.f32.mrf.mxu2  ;;  %vm2448_vm7 = vcmp.ge.s32.totalorder %v2413_v39, %v5242_v32  ;;  %v2500_v2 = vsel %vm5380_vm12, 1.0, %v4009_v47 }
 0x30d   : > { %2384 = vmatmul.f32.gmra.mxu1 %v2305_v13  ;;  %v5320_v10 = vadd.f32 %v3719_v17, %v1386_v63  ;;  %vm5333_vm8 = vmand %vm2448_vm7, %vm5248_vm13  ;;  %vm2450_vm15 = vcmp.ge.s32.totalorder %v2415_v37, %v5242_v32  ;;  %v2418_v17 = vadd.s32 64, %v5239_v35 }
 0x30e   : > { %v2501_v3 = vsel %vm5333_vm8, 1.0, %v4009_v47  ;;  %vm5398_vm1 = vmand %vm2450_vm15, %vm5248_vm13 }
 0x30f   : > { %2324 = vmatmul.f32.gmra.mxu0 %v2242_v15  ;;  %6576 = vst [vmem:[#allocation29_spill] sm:$0xff] %v5320_v10  ;;  %1440 = vadd.xlane.f32.xlu2 %v5320_v10  ;;  %v2503_v39 = vsel %vm5398_vm1, 1.0, %v4009_v47  ;;  %vm2453_vm2 = vcmp.ge.s32.totalorder %v2418_v17, %v5242_v32 }
 0x310   : > { %vm5414_vm3 = vmand %vm2453_vm2, %vm5248_vm13 }
 0x312   : > { %v2307_v1 = vpop.f32.mrf.mxu0 }
 0x313   : > { %v2308_v36 = vadd.f32 %v5170_v44, %v2307_v1 }
 0x314   : > { %v1389_v61 = vpop.f32.mrf.mxu2 }
 0x315   : > { %2387 = vmatmul.f32.gmra.mxu1 %v2308_v36  ;;  %v5326_v26 = vadd.f32 %v3720_v34, %v1389_v61 }
 0x317   : > { %6577 = vst [vmem:[#allocation30_spill] sm:$0xff] %v5326_v26  ;;  %1442 = vadd.xlane.f32.xlu0 %v5326_v26 }
 0x31a   : > { %v2310_v43 = vpop.f32.mrf.mxu0 }
 0x31b   : > { %v2311_v20 = vadd.f32 %v5170_v44, %v2310_v43 }
 0x31c   : > { %v1392_v48 = vpop.f32.mrf.mxu2 }
 0x31d   : > { %2390 = vmatmul.f32.gmra.mxu1 %v2311_v20  ;;  %v5341_v29 = vadd.f32 %v3721_v59, %v1392_v48  ;;  %v2506_v59 = vsel %vm5414_vm3, 1.0, %v4009_v47 }
 0x31f   : > { %6580 = vst [vmem:[#allocation31_spill] sm:$0xff] %v5341_v29  ;;  %2520 = vmax.xlane.f32.xlu0 %v2501_v3  ;;  %1444 = vadd.xlane.f32.xlu2 %v5341_v29 }
 0x322   : > { %v2313_v9 = vpop.f32.mrf.mxu0 }
 0x323   : > { %v2314_v55 = vadd.f32 %v5170_v44, %v2313_v9 }
 0x324   : > { %v1395_v14 = vpop.f32.mrf.mxu2 }
 0x325   : > { %2393 = vmatmul.f32.gmra.mxu1 %v2314_v55  ;;  %v5346_v30 = vadd.f32 %v3722_v25, %v1395_v14  ;;  %v2417_v25 = vadd.s32 56, %v5239_v35 }
 0x327   : > { %6581 = vst [vmem:[#allocation32_spill] sm:$0xff] %v5346_v30  ;;  %1446 = vadd.xlane.f32.xlu1 %v5346_v30  ;;  %vm2452_vm4 = vcmp.ge.s32.totalorder %v2417_v25, %v5242_v32  ;;  %v2419_v25 = vadd.s32 72, %v5239_v35 }
 0x328   : > { %vm5441_vm5 = vmand %vm2452_vm4, %vm5248_vm13 }
 0x329   : > { %v2505_v23 = vsel %vm5441_vm5, 1.0, %v4009_v47 }
 0x32a   : > { %v2316_v57 = vpop.f32.mrf.mxu0 }
 0x32b   : > { %v2317_v27 = vadd.f32 %v5170_v44, %v2316_v57 }
 0x32c   : > { %v1398_v28 = vpop.f32.mrf.mxu2 }
 0x32d   : > { %2396 = vmatmul.f32.gmra.mxu1 %v2317_v27  ;;  %v5351_v56 = vadd.f32 %v3723_v5, %v1398_v28 }
 0x32f   : > { %1448 = vadd.xlane.f32.xlu2 %v5351_v56 }
 0x332   : > { %v2319_v18 = vpop.f32.mrf.mxu0  ;;  %v1421_v58 = vpop.xlane.xlu1 %1420 }
 0x333   : > { %v2320_v38 = vadd.f32 %v5170_v44, %v2319_v18  ;;  %v1459_v16 = vmul.f32 %v1421_v58, %v4306_v22  ;;  %v2420_v58 = vadd.s32 80, %v5239_v35 }
 0x334   : > { %v1401_v50 = vpop.f32.mrf.mxu2 }
 0x335   : > { %2399 = vmatmul.f32.gmra.mxu1 %v2320_v38  ;;  %v5358_v52 = vsub.f32 %v5245_v21, %v1459_v16  ;;  %v5361_v6 = vadd.f32 %v3724_v62, %v1401_v50  ;;  %v2416_v62 = vadd.s32 48, %v5239_v35  ;;  %vm2455_vm6 = vcmp.ge.s32.totalorder %v2420_v58, %v5242_v32 }
 0x336   : > { %vm5459_vm7 = vmand %vm2455_vm6, %vm5248_vm13 }
 0x337   : > { %1450 = vadd.xlane.f32.xlu1 %v5361_v6  ;;  %v1491_v7 = vmul.f32 %v5358_v52, %v5358_v52  ;;  %vm2451_vm9 = vcmp.ge.s32.totalorder %v2416_v62, %v5242_v32 }
 0x338   : > { %vm5472_vm10 = vmand %vm2451_vm9, %vm5248_vm13  ;;  %vm2454_vm9 = vcmp.ge.s32.totalorder %v2419_v25, %v5242_v32 }
 0x339   : > { %1507 = vadd.xlane.f32.xlu2 %v1491_v7  ;;  %v2361_v7 = vpop.f32.mrf.mxu1 }
 0x33a   : > { %v1423_v45 = vpop.xlane.xlu2 %1422  ;;  %v5393_v15 = vpop.xlane.xlu1 %2516 }
 0x33b   : > { %v1460_v4 = vmul.f32 %v1423_v45, %v4306_v22  ;;  %6586 = vst [vmem:[#allocation33_spill] sm:$0xff] %v5393_v15 }
 0x33d   : > { %v5390_v13 = vsub.f32 %v5263_v42, %v1460_v4  ;;  %v2423_v4 = vadd.s32 104, %v5239_v35 }
 0x33f   : > { %2522 = vmax.xlane.f32.xlu1 %v2502_v51  ;;  %v1492_v61 = vmul.f32 %v5390_v13, %v5390_v13  ;;  %vm2458_vm15 = vcmp.ge.s32.totalorder %v2423_v4, %v5242_v32  ;;  %v2422_v4 = vadd.s32 96, %v5239_v35 }
 0x340   : > { %vm5488_vm4 = vmand %vm2458_vm15, %vm5248_vm13 }
 0x341   : > { %2518 = vmax.xlane.f32.xlu2 %v2500_v2  ;;  %v2508_v2 = vsel %vm5459_vm7, 1.0, %v4009_v47 }
 0x342   : > { %v1425_v63 = vpop.xlane.xlu0 %1424 }
 0x343   : > { %v1461_v36 = vmul.f32 %v1425_v63, %v4306_v22  ;;  %v2421_v63 = vadd.s32 88, %v5239_v35 }
 0x345   : > { %v5410_v34 = vsub.f32 %v5267_v46, %v1461_v36  ;;  %vm2456_vm2 = vcmp.ge.s32.totalorder %v2421_v63, %v5242_v32 }
 0x346   : > { %vm5495_vm6 = vmand %vm2456_vm2, %vm5248_vm13 }
 0x347   : > { %1509 = vadd.xlane.f32.xlu1 %v1492_v61  ;;  %v1493_v3 = vmul.f32 %v5410_v34, %v5410_v34  ;;  %v2504_v61 = vsel %vm5472_vm10, 1.0, %v4009_v47  ;;  %vm5516_vm2 = vmand %vm2454_vm9, %vm5248_vm13  ;;  %vm2457_vm9 = vcmp.ge.s32.totalorder %v2422_v4, %v5242_v32 }
 0x349   : > { %2524 = vmax.xlane.f32.xlu2 %v2503_v39 }
 0x34a   : > { %v1427_v43 = vpop.xlane.xlu1 %1426  ;;  %v5427_v55 = vpop.xlane.xlu0 %2514 }
 0x34b   : > { %v1462_v48 = vmul.f32 %v1427_v43, %v4306_v22  ;;  %6591 = vst [vmem:[#allocation34_spill] sm:$0xff] %v5427_v55 }
 0x34d   : > { %v5425_v9 = vsub.f32 %v5282_v53, %v1462_v48  ;;  %v2364_v48 = vpop.f32.mrf.mxu1 }
 0x34f   : > { %1511 = vadd.xlane.f32.xlu1 %v1493_v3  ;;  %v1494_v28 = vmul.f32 %v5425_v9, %v5425_v9 }
 0x351   : > { %2530 = vmax.xlane.f32.xlu2 %v2506_v59 }
 0x352   : > { %v1429_v14 = vpop.xlane.xlu2 %1428 }
 0x353   : > { %v1463_v57 = vmul.f32 %v1429_v14, %v4306_v22  ;;  %v6600_v14 = vmov 0 }
 0x354   : > { %v6601_v14 = vsel %vm5495_vm6, 4294967295, %v6600_v14 }
 0x355   : > { %v5432_v27 = vsub.f32 %v5286_v31, %v1463_v57  ;;  %v2511_v57 = vsel %vm5488_vm4, 1.0, %v4009_v47 }
 0x357   : > { %1513 = vadd.xlane.f32.xlu1 %v1494_v28  ;;  %v1495_v5 = vmul.f32 %v5432_v27, %v5432_v27  ;;  %v2424_v28 = vadd.s32 112, %v5239_v35 }
 0x359   : > { %1515 = vadd.xlane.f32.xlu0 %v1495_v5  ;;  %vm2459_vm15 = vcmp.ge.s32.totalorder %v2424_v28, %v5242_v32 }
 0x35a   : > { %v1431_v38 = vpop.xlane.xlu0 %1430 }
 0x35b   : > { %v1464_v16 = vmul.f32 %v1431_v38, %v4306_v22  ;;  %v2509_v38 = vsel %vm5495_vm6, 1.0, %v4009_v47  ;;  %vm5523_vm6 = vmand %vm2459_vm15, %vm5248_vm13 }
 0x35c   : > { %v2512_v63 = vsel %vm5523_vm6, 1.0, %v4009_v47  ;;  %vm5545_vm15 = vmand %vm2457_vm9, %vm5248_vm13  ;;  %vm6475_vm9 = vcmp.gt.f32.partialorder %v5393_v15, 0.0 }
 0x35d   : > { %v5451_v50 = vsub.f32 %v5290_v24, %v1464_v16  ;;  %v2510_v28 = vsel %vm5545_vm15, 1.0, %v4009_v47 }
 0x35f   : > { %2528 = vmax.xlane.f32.xlu1 %v2505_v23  ;;  %v1496_v12 = vmul.f32 %v5451_v50, %v5451_v50 }
 0x361   : > { %1517 = vadd.xlane.f32.xlu0 %v1496_v12  ;;  %v6604_v12 = vmov 0 }
 0x362   : > { %v1433_v51 = vpop.xlane.xlu1 %1432  ;;  %v6605_v12 = vsel %vm5523_vm6, 4294967295, %v6604_v12  ;;  %vm2546_vm6 = vcmp.gt.f32.partialorder %v5427_v55, 0.0 }
 0x363   : > { %v1465_v37 = vmul.f32 %v1433_v51, %v4306_v22  ;;  %v5527_v51 = vpop.f32.mrf.mxu1 }
 0x365   : > { %v5477_v36 = vsub.f32 %v5295_v8, %v1465_v37 }
 0x367   : > { %2534 = vmax.xlane.f32.xlu1 %v2508_v2  ;;  %v1497_v39 = vmul.f32 %v5477_v36, %v5477_v36  ;;  %v2507_v2 = vsel %vm5516_vm2, 1.0, %v4009_v47 }
 0x369   : > { %2526 = vmax.xlane.f32.xlu0 %v2504_v61  ;;  %1519 = vadd.xlane.f32.xlu2 %v1497_v39 }
 0x36a   : > { %v1435_v3 = vpop.xlane.xlu0 %1434 }
 0x36b   : > { %v1466_v59 = vmul.f32 %v1435_v3, %v4306_v22 }
 0x36d   : > { %v5505_v5 = vsub.f32 %v5300_v60, %v1466_v59 }
 0x36f   : > { %2540 = vmax.xlane.f32.xlu1 %v2511_v57  ;;  %v1498_v58 = vmul.f32 %v5505_v5, %v5505_v5  ;;  %v2370_v57 = vpop.f32.mrf.mxu1 }
 0x371   : > { %1521 = vadd.xlane.f32.xlu0 %v1498_v58  ;;  %2536 = vmax.xlane.f32.xlu2 %v2509_v38  ;;  %v2482_v58 = vsel %vm5274_vm0, %v2361_v7, -1e+30  ;;  %v1337_v7 = vld [vmem:[#allocation12 + $0x78] sm:$0xff] }
 0x372   : > { %v1437_v16 = vpop.xlane.xlu2 %1436  ;;  %1788 = vmatpush.msrb.mxu3 %v1337_v7  ;;  %v1334_v7 = vld [vmem:[#allocation12 + $0x60] sm:$0xff] }
 0x373   : > { %v1467_v62 = vmul.f32 %v1437_v16, %v4306_v22  ;;  %v5562_v16 = vsel %vm2546_vm6, %v2482_v58, 0.0 }
 0x375   : > { %v5531_v37 = vsub.f32 %v5304_v54, %v1467_v62 }
 0x377   : > { %v1499_v61 = vmul.f32 %v5531_v37, %v5531_v37 }
 0x379   : > { %2532 = vmax.xlane.f32.xlu0 %v2507_v2  ;;  %2542 = vmax.xlane.f32.xlu2 %v2512_v63 }
 0x37a   : > { %1523 = vadd.xlane.f32.xlu1 %v1499_v61  ;;  %v1439_v39 = vpop.xlane.xlu0 %1438  ;;  %v2425_v61 = vadd.s32 120, %v5239_v35 }
 0x37b   : > { %v1468_v3 = vmul.f32 %v1439_v39, %v4306_v22  ;;  %v2483_v39 = vsel %vm5255_vm14, %v2364_v48, -1e+30  ;;  %v1336_v48 = vld [vmem:[#allocation12 + $0x70] sm:$0xff] }
 0x37c   : > { %vm2460_vm0 = vcmp.ge.s32.totalorder %v2425_v61, %v5242_v32  ;;  %1789 = vmatpush.msrb.mxu3 %v1336_v48  ;;  %v1335_v61 = vld [vmem:[#allocation12 + $0x68] sm:$0xff]  ;;  %v1330_v48 = vld [vmem:[#allocation12 + $0x40] sm:$0xff] }
 0x37d   : > { %v5550_v25 = vsub.f32 %v5312_v49, %v1468_v3  ;;  %vm5587_vm14 = vmand %vm2460_vm0, %vm5248_vm13 }
 0x37e   : > { %1790 = vmatpush.msrb.mxu3 %v1335_v61  ;;  %v1328_v61 = vld [vmem:[#allocation12 + $0x30] sm:$0xff] }
 0x37f   : > { %v1500_v38 = vmul.f32 %v5550_v25, %v5550_v25 }
 0x380   : > { %1791 = vmatpush.msrb.mxu3 %v1334_v7  ;;  %v1327_v7 = vld [vmem:[#allocation12 + $0x28] sm:$0xff] }
 0x381   : > { %2538 = vmax.xlane.f32.xlu0 %v2510_v28  ;;  %1525 = vadd.xlane.f32.xlu2 %v1500_v38  ;;  %v5576_v28 = vpop.f32.mrf.mxu1  ;;  %v5580_v38 = vsel %vm6475_vm9, %v2483_v39, 0.0 }
 0x382   : > { %2610 = vmax.xlane.f32.xlu1 %v5562_v16  ;;  %v1441_v4 = vpop.xlane.xlu2 %1440 }
 0x383   : > { %v1469_v63 = vmul.f32 %v1441_v4, %v4306_v22  ;;  %v2513_v4 = vsel %vm5587_vm14, 1.0, %v4009_v47 }
 0x384   : > { %v2322_v62 = vpop.f32.mrf.mxu0 }
 0x385   : > { %v2323_v2 = vadd.f32 %v5170_v44, %v2322_v62  ;;  %v5570_v11 = vsub.f32 %v5320_v10, %v1469_v63 }
 0x387   : > { %2402 = vmatmul.f32.gmra.mxu1 %v2323_v2  ;;  %v1501_v3 = vmul.f32 %v5570_v11, %v5570_v11 }
 0x389   : > { %1527 = vadd.xlane.f32.xlu0 %v1501_v3  ;;  %2612 = vmax.xlane.f32.xlu2 %v5580_v38  ;;  %v5594_v32 = vpop.f32.mrf.mxu1  ;;  %v1333_v3 = vld [vmem:[#allocation12 + $0x58] sm:$0xff] }
 0x38a   : > { %v1443_v58 = vpop.xlane.xlu0 %1442  ;;  %1792 = vmatpush.msrb.mxu3 %v1333_v3 }
 0x38b   : > { %v1470_v0 = vmul.f32 %v1443_v58, %v4306_v22  ;;  %v1331_v58 = vld [vmem:[#allocation12 + $0x48] sm:$0xff] }
 0x38c   : > { %v2325_v35 = vpop.f32.mrf.mxu0 }
 0x38d   : > { %v2326_v62 = vadd.f32 %v5170_v44, %v2325_v35  ;;  %v2485_v44 = vsel %vm5333_vm8, %v2370_v57, -1e+30  ;;  %v5608_v47 = vsub.f32 %v5326_v26, %v1470_v0  ;;  %v1332_v35 = vld [vmem:[#allocation12 + $0x50] sm:$0xff]  ;;  %v1323_v26 = vld [vmem:[#allocation12 + $0x8] sm:$0xff] }
 0x38e   : > { %1793 = vmatpush.msrb.mxu3 %v1332_v35  ;;  %v1325_v35 = vld [vmem:[#allocation12 + $0x18] sm:$0xff] }
 0x38f   : > { %2405 = vmatmul.f32.gmra.mxu1 %v2326_v62  ;;  %v1502_v19 = vmul.f32 %v5608_v47, %v5608_v47 }
 0x390   : > { %1794 = vmatpush.msrb.mxu3 %v1331_v58 }
 0x391   : > { %2544 = vmax.xlane.f32.xlu0 %v2513_v4  ;;  %v5612_v57 = vpop.f32.mrf.mxu1  ;;  %v1329_v4 = vld [vmem:[#allocation12 + $0x38] sm:$0xff] }
 0x392   : > { %v5596_v2 = vpop.xlane.xlu0 %2520  ;;  %v1445_v39 = vpop.xlane.xlu2 %1444  ;;  %1795 = vmatpush.msrb.mxu3 %v1330_v48  ;;  %v1324_v48 = vld [vmem:[#allocation12 + $0x10] sm:$0xff] }
 0x393   : > { %6610 = vst [vmem:[#allocation35_spill] sm:$0xff] %v5596_v2  ;;  %vm2549_vm13 = vcmp.gt.f32.partialorder %v5596_v2, 0.0 }
 0x394   : > { %v5604_v63 = vsel %vm2549_vm13, %v2485_v44, 0.0  ;;  %1796 = vmatpush.msrb.mxu3 %v1329_v4 }
 0x395   : > { %2616 = vmax.xlane.f32.xlu1 %v5604_v63 }
 0x396   : > { %1797 = vmatpush.msrb.mxu3 %v1328_v61  ;;  %v1322_v61 = vld [vmem:[#allocation12] sm:$0xff] }
 0x398   : > { %1798 = vmatpush.msrb.mxu3 %v1327_v7  ;;  %v2486_v7 = vsel %vm5371_vm11, %v5576_v28, -1e+30 }
 0x399   : > { %v5614_v44 = vpop.f32.mrf.mxu1 }
 0x39a   : > { %v1447_v62 = vpop.xlane.xlu1 %1446 }
 0x39d   : > { %1529 = vadd.xlane.f32.xlu1 %v1502_v19  ;;  %v1326_v19 = vld [vmem:[#allocation12 + $0x20] sm:$0xff] }
 0x39e   : > { %1799 = vmatpush.msrb.mxu3 %v1326_v19  ;;  %v1471_v19 = vmul.f32 %v1445_v39, %v4306_v22 }
 0x3a0   : > { %1800 = vmatpush.msrb.mxu3 %v1325_v35  ;;  %v5647_v39 = vsub.f32 %v5341_v29, %v1471_v19 }
 0x3a1   : > { %v5621_v2 = vpop.f32.mrf.mxu1 }
 0x3a2   : > { %v5616_v0 = vpop.xlane.xlu2 %1448  ;;  %1801 = vmatpush.msrb.mxu3 %v1324_v48 }
 0x3a4   : > { %1802 = vmatpush.msrb.mxu3 %v1323_v26  ;;  %v2484_v26 = vsel %vm5380_vm12, %v5527_v51, -1e+30 }
 0x3a6   : > { %1803 = vmatpush.msrb.mxu3 %v1322_v61 }
 0x3a9   : > { %v5650_v48 = vpop.f32.mrf.mxu1 }
 0x3aa   : > { %v5618_v15 = vpop.xlane.xlu1 %1450 }
 0x3ac   : > { %v1508_v3 = vpop.xlane.xlu2 %1507 }
 0x3ad   : > { %v1539_v58 = vmul.f32 %v1508_v3, %v4306_v22 }
 0x3af   : > { %v1555_v55 = vadd.f32 1e-06, %v1539_v58  ;;  %v1472_v58 = vmul.f32 %v1447_v62, %v4306_v22 }
 0x3b1   : > { %3610 = vrsqrt.f32 %v1555_v55  ;;  %v5653_v51 = vsub.f32 %v5346_v30, %v1472_v58  ;;  %vm1577_vm12 = vweird.f32 %v1555_v55 }
 0x3b2   : > { %v5623_v4 = vpop.xlane.xlu1 %2522 }
 0x3b3   : > { %6611 = vst [vmem:[#allocation36_spill] sm:$0xff] %v5623_v4  ;;  %vm6474_vm8 = vcmp.gt.f32.partialorder %v5623_v4, 0.0  ;;  %v1504_v19 = vmul.f32 %v5653_v51, %v5653_v51 }
 0x3b4   : > { %v5630_v3 = vpop.xlane.xlu2 %2518  ;;  %v5634_v35 = vsel %vm6474_vm8, %v2486_v7, 0.0 }
 0x3b5   : > { %6612 = vst [vmem:[#allocation37_spill] sm:$0xff] %v5630_v3  ;;  %vm2548_vm0 = vcmp.gt.f32.partialorder %v5630_v3, 0.0  ;;  %2618 = vmax.xlane.f32.xlu2 %v5634_v35 }
 0x3b6   : > { %v5644_v41 = vsel %vm2548_vm0, %v2484_v26, 0.0  ;;  %v1503_v26 = vmul.f32 %v5647_v39, %v5647_v39 }
 0x3b7   : > { %v3611_v28 = vpop.eup %3610  ;;  %2614 = vmax.xlane.f32.xlu0 %v5644_v41 }
 0x3b8   : > { %v1572_v40 = vmul.f32 %v3611_v28, %v1555_v55  ;;  %vm1578_vm11 = vweird.f32 %v3611_v28 }
 0x3b9   : > { %vm1579_vm8 = vmor %vm1577_vm12, %vm1578_vm11 }
 0x3ba   : > { %v1573_v62 = vmul.f32 %v3611_v28, %v1572_v40  ;;  %v1510_v61 = vpop.xlane.xlu1 %1509  ;;  %v5665_v40 = vld [vmem:[%s6449_s12] ss:$0 sm:$0xff] }
 0x3bb   : > { %v1540_v7 = vmul.f32 %v1510_v61, %v4306_v22 }
 0x3bc   : > { %v1574_v4 = vmul.f32 0.5, %v1573_v62  ;;  %v5660_v10 = vpop.xlane.xlu2 %2524  ;;  %v5667_v62 = vpop.f32.mrf.mxu1 }
 0x3bd   : > { %v1556_v3 = vadd.f32 1e-06, %v1540_v7  ;;  %1531 = vadd.xlane.f32.xlu2 %v1503_v26  ;;  %6613 = vst [vmem:[#allocation38_spill] sm:$0xff] %v5660_v10  ;;  %vm6486_vm9 = vcmp.gt.f32.partialorder %v5660_v10, 0.0 }
 0x3be   : > { %v1575_v29 = vsub.f32 1.5, %v1574_v4 }
 0x3bf   : > { %3612 = vrsqrt.f32 %v1556_v3  ;;  %1533 = vadd.xlane.f32.xlu0 %v1504_v19  ;;  %v2487_v19 = vsel %vm5398_vm1, %v5594_v32, -1e+30  ;;  %vm1587_vm11 = vweird.f32 %v1556_v3 }
 0x3c0   : > { %v1576_v58 = vmul.f32 %v3611_v28, %v1575_v29  ;;  %v5675_v29 = vld [vmem:[%s6614_s16] ss:$0 sm:$0xff]  ;;  %v5683_v49 = vsel %vm6486_vm9, %v2487_v19, 0.0  ;;  %s3128_s16 = sshll.u32 %s3125_s6, 4  ;;  %s3129_s16 = int_to_ptr.hbm [resolvable:$true] %s3128_s16 }
 0x3c2   : > { %v1580_v61 = vsel %vm1579_vm8, %v3611_v28, %v1576_v58  ;;  %v1512_v7 = vpop.xlane.xlu1 %1511 }
 0x3c3   : > { %v1541_v4 = vmul.f32 %v1512_v7, %v4306_v22  ;;  %v1731_v26 = vmul.f32 %v1580_v61, %v5358_v52 }
 0x3c4   : > { %v5687_v7 = vpop.xlane.xlu2 %2530 }
 0x3c5   : > { %v3613_v55 = vpop.eup %3612  ;;  %v1557_v30 = vadd.f32 1e-06, %v1541_v4  ;;  %v1750_v28 = vmul.f32 %v5665_v40, %v1731_v26  ;;  %6615 = vst [vmem:[#allocation39_spill] sm:$0xff] %v5687_v7  ;;  %vm6485_vm1 = vcmp.gt.f32.partialorder %v5687_v7, 0.0  ;;  %v5691_v4 = vpop.f32.mrf.mxu1 }
 0x3c6   : > { %v1582_v58 = vmul.f32 %v3613_v55, %v1556_v3  ;;  %vm1588_vm8 = vweird.f32 %v3613_v55 }
 0x3c7   : > { %3614 = vrsqrt.f32 %v1557_v30  ;;  %2620 = vmax.xlane.f32.xlu0 %v5683_v49  ;;  %v1769_v52 = vadd.f32 %v5675_v29, %v1750_v28  ;;  %v2490_v28 = vsel %vm5414_vm3, %v5621_v2, -1e+30  ;;  %vm1589_vm12 = vmor %vm1587_vm11, %vm1588_vm8 }
 0x3c8   : > { %v1583_v61 = vmul.f32 %v3613_v55, %v1582_v58 }
 0x3c9   : > { %1804 = vmatmul.f32.vlgmr.msrb.gmra.mxu3 %v1769_v52 }
 0x3ca   : > { %v1584_v54 = vmul.f32 0.5, %v1583_v61  ;;  %v1514_v1 = vpop.xlane.xlu1 %1513 }
 0x3cb   : > { %v1542_v32 = vmul.f32 %v1514_v1, %v4306_v22  ;;  %v5701_v1 = vsel %vm6485_vm1, %v2490_v28, 0.0 }
 0x3cc   : > { %v1585_v26 = vsub.f32 1.5, %v1584_v54  ;;  %v1516_v19 = vpop.xlane.xlu0 %1515 }
 0x3cd   : > { %v3615_v10 = vpop.eup %3614  ;;  %v5696_v58 = vadd.f32 1e-06, %v1542_v32  ;;  %v1543_v52 = vmul.f32 %v1516_v19, %v4306_v22  ;;  %v2489_v19 = vsel %vm5441_vm5, %v5614_v44, -1e+30  ;;  %v5723_v18 = vpop.f32.mrf.mxu1  ;;  %vm1597_vm5 = vweird.f32 %v1557_v30 }
 0x3ce   : > { %v1586_v61 = vmul.f32 %v3613_v55, %v1585_v26  ;;  %v1592_v60 = vmul.f32 %v3615_v10, %v1557_v30  ;;  %vm1598_vm8 = vweird.f32 %v3615_v10  ;;  %v2488_v30 = vsel %vm5472_vm10, %v5612_v57, -1e+30 }
 0x3cf   : > { %3616 = vrsqrt.f32 %v5696_v58  ;;  %v5704_v54 = vadd.f32 1e-06, %v1543_v52  ;;  %2626 = vmax.xlane.f32.xlu0 %v5701_v1  ;;  %vm1599_vm11 = vmor %vm1597_vm5, %vm1598_vm8  ;;  %vm1607_vm10 = vweird.f32 %v5696_v58 }
 0x3d0   : > { %v1593_v20 = vmul.f32 %v3615_v10, %v1592_v60  ;;  %v1590_v2 = vsel %vm1589_vm12, %v3613_v55, %v1586_v61 }
 0x3d1   : > { %3618 = vrsqrt.f32 %v5704_v54  ;;  %v1732_v32 = vmul.f32 %v1590_v2, %v5390_v13  ;;  %vm1617_vm1 = vweird.f32 %v5704_v54 }
 0x3d2   : > { %v1594_v26 = vmul.f32 0.5, %v1593_v20  ;;  %v5709_v3 = vpop.xlane.xlu1 %2528 }
 0x3d3   : > { %6616 = vst [vmem:[#allocation40_spill] sm:$0xff] %v5709_v3  ;;  %vm2553_vm3 = vcmp.gt.f32.partialorder %v5709_v3, 0.0  ;;  %v1751_v28 = vmul.f32 %v5665_v40, %v1732_v32 }
 0x3d4   : > { %v1595_v52 = vsub.f32 1.5, %v1594_v26  ;;  %v1518_v7 = vpop.xlane.xlu0 %1517  ;;  %v5718_v60 = vsel %vm2553_vm3, %v2489_v19, 0.0 }
 0x3d5   : > { %v3617_v55 = vpop.eup %3616  ;;  %v1544_v13 = vmul.f32 %v1518_v7, %v4306_v22  ;;  %2624 = vmax.xlane.f32.xlu2 %v5718_v60  ;;  %v1770_v61 = vadd.f32 %v5675_v29, %v1751_v28 }
 0x3d6   : > { %v1596_v44 = vmul.f32 %v3615_v10, %v1595_v52  ;;  %v1602_v20 = vmul.f32 %v3617_v55, %v5696_v58  ;;  %v2492_v52 = vsel %vm5459_vm7, %v5667_v62, -1e+30  ;;  %vm1608_vm8 = vweird.f32 %v3617_v55  ;;  %v2400_v58 = vpop.f32.mrf.mxu1 }
 0x3d7   : > { %v3619_v2 = vpop.eup %3618  ;;  %v5726_v32 = vadd.f32 1e-06, %v1544_v13  ;;  %1807 = vmatmul.f32.gmra.mxu3 %v1770_v61 }
 0x3d8   : > { %v1603_v26 = vmul.f32 %v3617_v55, %v1602_v20  ;;  %v1612_v19 = vmul.f32 %v3619_v2, %v5704_v54  ;;  %v1600_v3 = vsel %vm1599_vm11, %v3615_v10, %v1596_v44  ;;  %vm1618_vm7 = vweird.f32 %v3619_v2  ;;  %vm1609_vm11 = vmor %vm1607_vm10, %vm1608_vm8 }
 0x3d9   : > { %3620 = vrsqrt.f32 %v5726_v32  ;;  %v1733_v7 = vmul.f32 %v1600_v3, %v5410_v34  ;;  %vm5760_vm9 = vmor %vm1617_vm1, %vm1618_vm7  ;;  %vm6619_vm1 = vnez %v6601_v14  ;;  %vm1627_vm10 = vweird.f32 %v5726_v32 }
 0x3da   : > { %v1604_v28 = vmul.f32 0.5, %v1603_v26  ;;  %v1613_v8 = vmul.f32 %v3619_v2, %v1612_v19  ;;  %v5731_v24 = vpop.xlane.xlu1 %2534 }
 0x3db   : > { %vm2556_vm12 = vcmp.gt.f32.partialorder %v5731_v24, 0.0  ;;  %v1752_v10 = vmul.f32 %v5665_v40, %v1733_v7 }
 0x3dc   : > { %v1605_v13 = vsub.f32 1.5, %v1604_v28  ;;  %v1614_v61 = vmul.f32 0.5, %v1613_v8  ;;  %v5741_v34 = vpop.xlane.xlu0 %2526  ;;  %v1520_v3 = vpop.xlane.xlu2 %1519  ;;  %v5745_v44 = vsel %vm2556_vm12, %v2492_v52, 0.0 }
 0x3dd   : > { %vm2552_vm5 = vcmp.gt.f32.partialorder %v5741_v34, 0.0  ;;  %v1545_v45 = vmul.f32 %v1520_v3, %v4306_v22  ;;  %2630 = vmax.xlane.f32.xlu2 %v5745_v44  ;;  %v1771_v17 = vadd.f32 %v5675_v29, %v1752_v10  ;;  %v2495_v3 = vsel %vm5488_vm4, %v2400_v58, -1e+30 }
 0x3de   : > { %v1606_v57 = vmul.f32 %v3617_v55, %v1605_v13  ;;  %v1615_v62 = vsub.f32 1.5, %v1614_v61  ;;  %v5754_v8 = vsel %vm2552_vm5, %v2488_v30, 0.0 }
 0x3df   : > { %v3621_v20 = vpop.eup %3620  ;;  %v1561_v26 = vadd.f32 1e-06, %v1545_v45  ;;  %1810 = vmatmul.f32.gmra.mxu3 %v1771_v17  ;;  %2622 = vmax.xlane.f32.xlu1 %v5754_v8 }
 0x3e0   : > { %v1616_v19 = vmul.f32 %v3619_v2, %v1615_v62  ;;  %v1622_v7 = vmul.f32 %v3621_v20, %v5726_v32  ;;  %v1610_v28 = vsel %vm1609_vm11, %v3617_v55, %v1606_v57  ;;  %v2493_v55 = vsel %vm6619_vm1, %v5691_v4, -1e+30 }
 0x3e1   : > { %3622 = vrsqrt.f32 %v1561_v26  ;;  %v1734_v30 = vmul.f32 %v1610_v28, %v5425_v9 }
 0x3e2   : > { %v1623_v10 = vmul.f32 %v3621_v20, %v1622_v7  ;;  %v5765_v13 = vpop.xlane.xlu1 %2540  ;;  %v1620_v61 = vsel %vm5760_vm9, %v3619_v2, %v1616_v19  ;;  %vm1628_vm9 = vweird.f32 %v3621_v20 }
 0x3e3   : > { %vm6490_vm8 = vcmp.gt.f32.partialorder %v5765_v13, 0.0  ;;  %v1753_v54 = vmul.f32 %v5665_v40, %v1734_v30  ;;  %v1735_v62 = vmul.f32 %v1620_v61, %v5432_v27  ;;  %vm1629_vm7 = vmor %vm1627_vm10, %vm1628_vm9 }
 0x3e4   : > { %v1624_v45 = vmul.f32 0.5, %v1623_v10  ;;  %v1522_v17 = vpop.xlane.xlu0 %1521  ;;  %v5776_v9 = vpop.xlane.xlu2 %2536  ;;  %v5780_v57 = vsel %vm6490_vm8, %v2495_v3, 0.0 }
 0x3e5   : > { %v1546_v2 = vmul.f32 %v1522_v17, %v4306_v22  ;;  %vm2557_vm4 = vcmp.gt.f32.partialorder %v5776_v9, 0.0  ;;  %2636 = vmax.xlane.f32.xlu2 %v5780_v57  ;;  %v1772_v43 = vadd.f32 %v5675_v29, %v1753_v54  ;;  %v1754_v52 = vmul.f32 %v5665_v40, %v1735_v62 }
 0x3e6   : > { %v1625_v14 = vsub.f32 1.5, %v1624_v45  ;;  %v5789_v4 = vsel %vm2557_vm4, %v2493_v55, 0.0  ;;  %v2491_v54 = vsel %vm5516_vm2, %v5650_v48, -1e+30  ;;  %vm1637_vm2 = vweird.f32 %v1561_v26 }
 0x3e7   : > { %v3623_v58 = vpop.eup %3622  ;;  %v1562_v19 = vadd.f32 1e-06, %v1546_v2  ;;  %1813 = vmatmul.f32.gmra.mxu3 %v1772_v43  ;;  %2632 = vmax.xlane.f32.xlu0 %v5789_v4  ;;  %v1773_v32 = vadd.f32 %v5675_v29, %v1754_v52 }
 0x3e8   : > { %v1626_v7 = vmul.f32 %v3621_v20, %v1625_v14  ;;  %v1632_v28 = vmul.f32 %v3623_v58, %v1561_v26  ;;  %vm1638_vm1 = vweird.f32 %v3623_v58 }
 0x3e9   : > { %3624 = vrsqrt.f32 %v1562_v19  ;;  %vm1639_vm9 = vmor %vm1637_vm2, %vm1638_vm1 }
 0x3ea   : > { %v1633_v27 = vmul.f32 %v3623_v58, %v1632_v28  ;;  %v1630_v30 = vsel %vm1629_vm7, %v3621_v20, %v1626_v7 }
 0x3eb   : > { %v1736_v45 = vmul.f32 %v1630_v30, %v5451_v50 }
 0x3ec   : > { %v1634_v10 = vmul.f32 0.5, %v1633_v27  ;;  %v5794_v61 = vpop.xlane.xlu0 %2532  ;;  %v5796_v3 = vpop.xlane.xlu2 %2542 }
 0x3ed   : > { %vm2555_vm11 = vcmp.gt.f32.partialorder %v5794_v61, 0.0  ;;  %v1524_v55 = vpop.xlane.xlu1 %1523  ;;  %v1755_v14 = vmul.f32 %v5665_v40, %v1736_v45 }
 0x3ee   : > { %v1635_v17 = vsub.f32 1.5, %v1634_v10  ;;  %v1547_v20 = vmul.f32 %v1524_v55, %v4306_v22  ;;  %v5807_v2 = vsel %vm2555_vm11, %v2491_v54, 0.0  ;;  %v2494_v10 = vsel %vm5545_vm15, %v5723_v18, -1e+30 }
 0x3ef   : > { %v3625_v43 = vpop.eup %3624  ;;  %1816 = vmatmul.f32.gmra.mxu3 %v1773_v32  ;;  %2628 = vmax.xlane.f32.xlu1 %v5807_v2  ;;  %v1774_v55 = vadd.f32 %v5675_v29, %v1755_v14  ;;  %vm1647_vm15 = vweird.f32 %v1562_v19 }
 0x3f0   : > { %v1636_v23 = vmul.f32 %v3623_v58, %v1635_v17  ;;  %v1642_v48 = vmul.f32 %v3625_v43, %v1562_v19  ;;  %v1563_v62 = vadd.f32 1e-06, %v1547_v20  ;;  %vm1648_vm7 = vweird.f32 %v3625_v43 }
 0x3f1   : > { %vm1649_vm1 = vmor %vm1647_vm15, %vm1648_vm7 }
 0x3f2   : > { %v1643_v50 = vmul.f32 %v3625_v43, %v1642_v48  ;;  %3626 = vrsqrt.f32 %v1563_v62  ;;  %v1640_v7 = vsel %vm1639_vm9, %v3623_v58, %v1636_v23  ;;  %vm6489_vm9 = vcmp.gt.f32.partialorder %v5796_v3, 0.0 }
 0x3f3   : > { %v1737_v30 = vmul.f32 %v1640_v7, %v5477_v36  ;;  %vm1657_vm7 = vweird.f32 %v1563_v62 }
 0x3f4   : > { %v1644_v28 = vmul.f32 0.5, %v1643_v50  ;;  %v5811_v52 = vpop.xlane.xlu0 %2538  ;;  %v1526_v27 = vpop.xlane.xlu2 %1525 }
 0x3f5   : > { %6620 = vst [vmem:[#allocation41_spill] sm:$0xff] %v5811_v52  ;;  %vm6488_vm10 = vcmp.gt.f32.partialorder %v5811_v52, 0.0  ;;  %v1548_v26 = vmul.f32 %v1526_v27, %v4306_v22  ;;  %v2611_v54 = vpop.xlane.xlu1 %2610  ;;  %v1756_v20 = vmul.f32 %v5665_v40, %v1737_v30  ;;  %v1474_v30 = vmul.f32 %v5618_v15, %v4306_v22 }
 0x3f6   : > { %v1645_v32 = vsub.f32 1.5, %v1644_v28  ;;  %v2642_v58 = vsub.f32 %v5562_v16, %v2611_v54  ;;  %v5823_v45 = vsel %vm6488_vm10, %v2494_v10, 0.0 }
 0x3f7   : > { %v1564_v36 = vadd.f32 1e-06, %v1548_v26  ;;  %1819 = vmatmul.f32.gmra.mxu3 %v1774_v55  ;;  %2634 = vmax.xlane.f32.xlu1 %v5823_v45  ;;  %v1775_v7 = vadd.f32 %v5675_v29, %v1756_v20  ;;  %v5841_v20 = vsub.f32 %v5361_v6, %v1474_v30 }
 0x3f8   : > { %v3627_v59 = vpop.eup %3626  ;;  %v1646_v18 = vmul.f32 %v3625_v43, %v1645_v32  ;;  %v2658_v17 = vmul.f32 1.442695, %v2642_v58 }
 0x3f9   : > { %v1652_v23 = vmul.f32 %v3627_v59, %v1563_v62  ;;  %3628 = vrsqrt.f32 %v1564_v36  ;;  %vm1658_vm2 = vweird.f32 %v3627_v59 }
 0x3fa   : > { %3630 = vpow2.f32 %v2658_v17  ;;  %v1650_v48 = vsel %vm1649_vm1, %v3625_v43, %v1646_v18  ;;  %vm1659_vm15 = vmor %vm1657_vm7, %vm1658_vm2  ;;  %vm6621_vm1 = vnez %v6605_v12  ;;  %vm1667_vm7 = vweird.f32 %v1564_v36 }
 0x3fb   : > { %v1653_v16 = vmul.f32 %v3627_v59, %v1652_v23  ;;  %v1738_v19 = vmul.f32 %v1650_v48, %v5505_v5 }
 0x3fc   : > { %v1528_v14 = vpop.xlane.xlu0 %1527  ;;  %v2613_v50 = vpop.xlane.xlu2 %2612 }
 0x3fd   : > { %v1654_v28 = vmul.f32 0.5, %v1653_v16  ;;  %v1549_v27 = vmul.f32 %v1528_v14, %v4306_v22  ;;  %v2643_v10 = vsub.f32 %v5580_v38, %v2613_v50  ;;  %v1757_v5 = vmul.f32 %v5665_v40, %v1738_v19 }
 0x3ff   : > { %v3629_v26 = vpop.eup %3628  ;;  %v1655_v54 = vsub.f32 1.5, %v1654_v28  ;;  %v1565_v55 = vadd.f32 1e-06, %v1549_v27  ;;  %1822 = vmatmul.f32.gmra.mxu3 %v1775_v7  ;;  %v2660_v18 = vmul.f32 1.442695, %v2643_v10  ;;  %v1776_v16 = vadd.f32 %v5675_v29, %v1757_v5 }
 0x400   : > { %v5833_v43 = vpop.eup %3630  ;;  %v1662_v32 = vmul.f32 %v3629_v26, %v1564_v36  ;;  %vm1668_vm2 = vweird.f32 %v3629_v26  ;;  %v1506_v28 = vmul.f32 %v5841_v20, %v5841_v20 }
 0x401   : > { %v1656_v58 = vmul.f32 %v3627_v59, %v1655_v54  ;;  %3632 = vrsqrt.f32 %v1565_v55  ;;  %2690 = vadd.xlane.f32.xlu2 %v5833_v43 }
 0x402   : > { %v1663_v15 = vmul.f32 %v3629_v26, %v1662_v32  ;;  %3634 = vpow2.f32 %v2660_v18  ;;  %v1473_v32 = vmul.f32 %v5616_v0, %v4306_v22 }
 0x403   : > { %v1660_v23 = vsel %vm1659_vm15, %v3627_v59, %v1656_v58 }
 0x404   : > { %v2403_v38 = vpop.f32.mrf.mxu1  ;;  %v1664_v48 = vmul.f32 0.5, %v1663_v15  ;;  %v5849_v14 = vpop.xlane.xlu0 %2544  ;;  %v1739_v50 = vmul.f32 %v1660_v23, %v5531_v37 }
 0x405   : > { %v2496_v17 = vsel %vm6621_vm1, %v2403_v38, -1e+30  ;;  %6622 = vst [vmem:[#allocation42_spill] sm:$0xff] %v5849_v14  ;;  %vm6487_vm15 = vcmp.gt.f32.partialorder %v5849_v14, 0.0  ;;  %vm5855_vm1 = vmor %vm1667_vm7, %vm1668_vm2  ;;  %vm1677_vm2 = vweird.f32 %v1565_v55 }
 0x406   : > { %v5845_v62 = vsel %vm6489_vm9, %v2496_v17, 0.0  ;;  %v1665_v12 = vsub.f32 1.5, %v1664_v48  ;;  %v1758_v37 = vmul.f32 %v5665_v40, %v1739_v50  ;;  %v5878_v17 = vsub.f32 %v5351_v56, %v1473_v32 }
 0x407   : > { %2638 = vmax.xlane.f32.xlu0 %v5845_v62  ;;  %v3633_v7 = vpop.eup %3632  ;;  %1825 = vmatmul.f32.gmra.mxu3 %v1776_v16 }
 0x408   : > { %v1666_v27 = vmul.f32 %v3629_v26, %v1665_v12  ;;  %v1672_v59 = vmul.f32 %v3633_v7, %v1565_v55  ;;  %v2617_v10 = vpop.xlane.xlu1 %2616  ;;  %v5867_v5 = vpop.eup %3634  ;;  %v1777_v0 = vadd.f32 %v5675_v29, %v1758_v37  ;;  %v1505_v12 = vmul.f32 %v5878_v17, %v5878_v17 }
 0x409   : > { %v2645_v30 = vsub.f32 %v5604_v63, %v2617_v10  ;;  %1537 = vadd.xlane.f32.xlu2 %v1506_v28 }
 0x40a   : > { %v1673_v58 = vmul.f32 %v3633_v7, %v1672_v59  ;;  %v1670_v18 = vsel %vm5855_vm1, %v3629_v26, %v1666_v27 }
 0x40b   : > { %v2664_v38 = vmul.f32 1.442695, %v2645_v30  ;;  %v1740_v33 = vmul.f32 %v1670_v18, %v5550_v25 }
 0x40c   : > { %v2406_v54 = vpop.f32.mrf.mxu1  ;;  %v1674_v15 = vmul.f32 0.5, %v1673_v58 }
 0x40d   : > { %v2497_v36 = vsel %vm5587_vm14, %v2406_v54, -1e+30  ;;  %3636 = vpow2.f32 %v2664_v38  ;;  %vm1678_vm14 = vweird.f32 %v3633_v7  ;;  %v1759_v50 = vmul.f32 %v5665_v40, %v1740_v33 }
 0x40e   : > { %v5871_v63 = vsel %vm6487_vm15, %v2497_v36, 0.0  ;;  %v1675_v26 = vsub.f32 1.5, %v1674_v15  ;;  %vm1679_vm7 = vmor %vm1677_vm2, %vm1678_vm14 }
 0x40f   : > { %2692 = vadd.xlane.f32.xlu0 %v5867_v5  ;;  %2640 = vmax.xlane.f32.xlu1 %v5871_v63  ;;  %v1778_v59 = vadd.f32 %v5675_v29, %v1759_v50 }
 0x410   : > { %1828 = vmatmul.f32.gmra.mxu3 %v1777_v0  ;;  %v1676_v23 = vmul.f32 %v3633_v7, %v1675_v26  ;;  %v1530_v48 = vpop.xlane.xlu1 %1529 }
 0x411   : > { %v1550_v16 = vmul.f32 %v1530_v48, %v4306_v22 }
 0x412   : > { %v1680_v28 = vsel %vm1679_vm7, %v3633_v7, %v1676_v23 }
 0x413   : > { %v5884_v27 = vpop.eup %3636  ;;  %v1566_v25 = vadd.f32 1e-06, %v1550_v16  ;;  %v1741_v55 = vmul.f32 %v1680_v28, %v5570_v11 }
 0x414   : > { %2696 = vadd.xlane.f32.xlu2 %v5884_v27 }
 0x415   : > { %3638 = vrsqrt.f32 %v1566_v25  ;;  %v1760_v10 = vmul.f32 %v5665_v40, %v1741_v55  ;;  %vm1687_vm14 = vweird.f32 %v1566_v25 }
 0x417   : > { %1535 = vadd.xlane.f32.xlu1 %v1505_v12  ;;  %v1779_v37 = vadd.f32 %v5675_v29, %v1760_v10 }
 0x418   : > { %1831 = vmatmul.f32.gmra.mxu3 %v1778_v59 }
 0x41b   : > { %v3639_v19 = vpop.eup %3638 }
 0x41c   : > { %v1682_v30 = vmul.f32 %v3639_v19, %v1566_v25  ;;  %vm1688_vm1 = vweird.f32 %v3639_v19 }
 0x41d   : > { %vm1689_vm2 = vmor %vm1687_vm14, %vm1688_vm1 }
 0x41e   : > { %v1683_v54 = vmul.f32 %v3639_v19, %v1682_v30 }
 0x420   : > { %1834 = vmatmul.f32.gmra.mxu3 %v1779_v37  ;;  %v1684_v7 = vmul.f32 0.5, %v1683_v54 }
 0x422   : > { %v1685_v32 = vsub.f32 1.5, %v1684_v7 }
 0x424   : > { %v1686_v58 = vmul.f32 %v3639_v19, %v1685_v32 }
 0x426   : > { %v1690_v36 = vsel %vm1689_vm2, %v3639_v19, %v1686_v58 }
 0x427   : > { %v1742_v18 = vmul.f32 %v1690_v36, %v5608_v47 }
 0x428   : > { %v2619_v38 = vpop.xlane.xlu2 %2618 }
 0x429   : > { %v2646_v11 = vsub.f32 %v5634_v35, %v2619_v38  ;;  %v1761_v15 = vmul.f32 %v5665_v40, %v1742_v18 }
 0x42a   : > { %v2615_v0 = vpop.xlane.xlu0 %2614 }
 0x42b   : > { %v2666_v33 = vmul.f32 1.442695, %v2646_v11  ;;  %v2644_v26 = vsub.f32 %v5644_v41, %v2615_v0  ;;  %v1780_v23 = vadd.f32 %v5675_v29, %v1761_v15 }
 0x42d   : > { %3640 = vpow2.f32 %v2666_v33  ;;  %v2662_v48 = vmul.f32 1.442695, %v2644_v26  ;;  %1837 = vmatmul.f32.gmra.mxu3 %v1780_v23 }
 0x42f   : > { %3642 = vpow2.f32 %v2662_v48 }
 0x430   : > { %v1532_v16 = vpop.xlane.xlu2 %1531 }
 0x431   : > { %v1551_v50 = vmul.f32 %v1532_v16, %v4306_v22 }
 0x432   : > { %v1534_v12 = vpop.xlane.xlu0 %1533 }
 0x433   : > { %v5897_v47 = vpop.eup %3640  ;;  %v1567_v28 = vadd.f32 1e-06, %v1551_v50  ;;  %v1552_v35 = vmul.f32 %v1534_v12, %v4306_v22  ;;  %v5914_v12 = vld [vmem:[%s6625_s29] ss:$0 sm:$0xff]  ;;  %s3889_s29 = sshra.s32 %s3129_s16, 4  ;;  %s3890_s29 = int_to_ptr.hbm [resolvable:$true] %s3889_s29 }
 0x434   : > { %2698 = vadd.xlane.f32.xlu0 %v5897_v47  ;;  %s3891_s27 = scalar_lea.hbm %s3890_s29, 128  ;;  %p3896_p12 = scmp.lt.s32.totalorder %s3890_s29, %s6673_s9 }
 0x435   : > { %v5901_v25 = vpop.eup %3642  ;;  %3644 = vrsqrt.f32 %v1567_v28  ;;  %v1568_v41 = vadd.f32 1e-06, %v1552_v35  ;;  %vm1697_vm1 = vweird.f32 %v1567_v28  ;;  %p3892_p1 = scmp.ne.s32.totalorder %s3890_s29, %s3891_s27 }
 0x436   : > { %2694 = vadd.xlane.f32.xlu1 %v5901_v25 }
 0x437   : > { %3646 = vrsqrt.f32 %v1568_v41  ;;  %vm1707_vm15 = vweird.f32 %v1568_v41  ;;  %p3893_p3 = pnand %p3892_p1, %p4192_p2 }
 0x439   : > { %p3894_p11 = pneg %p3893_p3 }
 0x43a   : > { %v2621_v59 = vpop.xlane.xlu0 %2620 }
 0x43b   : > { %v3645_v55 = vpop.eup %3644  ;;  %v2647_v10 = vsub.f32 %v5683_v49, %v2621_v59 }
 0x43c   : > { %v1692_v19 = vmul.f32 %v3645_v55, %v1567_v28  ;;  %vm1698_vm7 = vweird.f32 %v3645_v55 }
 0x43d   : > { %v3647_v30 = vpop.eup %3646  ;;  %v2668_v37 = vmul.f32 1.442695, %v2647_v10  ;;  %vm1699_vm2 = vmor %vm1697_vm1, %vm1698_vm7 }
 0x43e   : > { %v1693_v54 = vmul.f32 %v3645_v55, %v1692_v19  ;;  %v1702_v7 = vmul.f32 %v3647_v30, %v1568_v41  ;;  %vm1708_vm14 = vweird.f32 %v3647_v30 }
 0x43f   : > { %3648 = vpow2.f32 %v2668_v37  ;;  %vm1709_vm10 = vmor %vm1707_vm15, %vm1708_vm14 }
 0x440   : > { %v1694_v32 = vmul.f32 0.5, %v1693_v54  ;;  %v1703_v58 = vmul.f32 %v3647_v30, %v1702_v7 }
 0x442   : > { %v1695_v36 = vsub.f32 1.5, %v1694_v32  ;;  %v1704_v18 = vmul.f32 0.5, %v1703_v58  ;;  %v2627_v38 = vpop.xlane.xlu0 %2626 }
 0x443   : > { %v2650_v11 = vsub.f32 %v5701_v1, %v2627_v38 }
 0x444   : > { %v1696_v15 = vmul.f32 %v3645_v55, %v1695_v36  ;;  %v1705_v0 = vsub.f32 1.5, %v1704_v18 }
 0x445   : > { %v5906_v33 = vpop.eup %3648  ;;  %v2674_v49 = vmul.f32 1.442695, %v2650_v11 }
 0x446   : > { %v1706_v26 = vmul.f32 %v3647_v30, %v1705_v0  ;;  %2700 = vadd.xlane.f32.xlu1 %v5906_v33  ;;  %v1700_v23 = vsel %vm1699_vm2, %v3645_v55, %v1696_v15 }
 0x447   : > { %3650 = vpow2.f32 %v2674_v49  ;;  %v1743_v48 = vmul.f32 %v1700_v23, %v5647_v39 }
 0x448   : > { %v2625_v16 = vpop.xlane.xlu2 %2624  ;;  %v1710_v50 = vsel %vm1709_vm10, %v3647_v30, %v1706_v26 }
 0x449   : > { %v2649_v1 = vsub.f32 %v5718_v60, %v2625_v16  ;;  %v1762_v28 = vmul.f32 %v5665_v40, %v1743_v48  ;;  %v1744_v59 = vmul.f32 %v1710_v50, %v5653_v51 }
 0x44b   : > { %v2672_v35 = vmul.f32 1.442695, %v2649_v1  ;;  %v1781_v41 = vadd.f32 %v5675_v29, %v1762_v28  ;;  %v1763_v19 = vmul.f32 %v5665_v40, %v1744_v59 }
 0x44c   : > { %v1805_v55 = vpop.f32.mrf.mxu3 }
 0x44d   : > { %v5919_v10 = vpop.eup %3650  ;;  %3652 = vpow2.f32 %v2672_v35  ;;  %v1806_v39 = vadd.f32 %v5914_v12, %v1805_v55  ;;  %1840 = vmatmul.f32.gmra.mxu3 %v1781_v41  ;;  %v1782_v58 = vadd.f32 %v5675_v29, %v1763_v19  ;;  %v2978_v35 = vld [vmem:[%s5957_s14] sm:$0xff] }
 0x44e   : > { %2706 = vadd.xlane.f32.xlu1 %v5919_v10 }
 0x44f   : > { %v1853_v60 = vadd.f32 %v1806_v39, %v5245_v21 }
 0x450   : > { %v2631_v30 = vpop.xlane.xlu2 %2630 }
 0x451   : > { %1869 = vst [vmem:[%s5926_s8] sm:$0xff] %v1853_v60  ;;  %v2652_v51 = vsub.f32 %v5745_v44, %v2631_v30  ;;  %v2985_v60 = vld [vmem:[%s5957_s14 + $0x38] sm:$0xff] }
 0x452   : > { %v2623_v37 = vpop.xlane.xlu1 %2622 }
 0x453   : > { %v5930_v54 = vpop.eup %3652  ;;  %v2678_v7 = vmul.f32 1.442695, %v2652_v51  ;;  %v2648_v32 = vsub.f32 %v5754_v8, %v2623_v37  ;;  %v2979_v37 = vld [vmem:[%s5957_s14 + $0x8] sm:$0xff] }
 0x454   : > { %2704 = vadd.xlane.f32.xlu0 %v5930_v54 }
 0x455   : > { %3654 = vpow2.f32 %v2678_v7  ;;  %v2670_v21 = vmul.f32 1.442695, %v2648_v32  ;;  %1843 = vmatmul.f32.gmra.mxu3 %v1782_v58  ;;  %v6627_v7 = vld [vmem:[#allocation24_spill] sm:$0xff] }
 0x457   : > { %3656 = vpow2.f32 %v2670_v21  ;;  %v2988_v21 = vld [vmem:[%s5957_s14 + $0x50] sm:$0xff] }
 0x458   : > { %v5960_v1 = vpop.xlane.xlu2 %2636 }
 0x45a   : > { %v1808_v36 = vpop.f32.mrf.mxu3  ;;  %v2633_v18 = vpop.xlane.xlu0 %2632 }
 0x45b   : > { %v5935_v38 = vpop.eup %3654  ;;  %v1809_v44 = vadd.f32 %v5914_v12, %v1808_v36  ;;  %v2653_v11 = vsub.f32 %v5789_v4, %v2633_v18 }
 0x45c   : > { %2710 = vadd.xlane.f32.xlu0 %v5935_v38 }
 0x45d   : > { %v5940_v8 = vpop.eup %3656  ;;  %v1854_v15 = vadd.f32 %v1809_v44, %v5263_v42  ;;  %v2680_v0 = vmul.f32 1.442695, %v2653_v11  ;;  %v2980_v11 = vld [vmem:[%s5957_s14 + $0x10] sm:$0xff] }
 0x45e   : > { %2702 = vadd.xlane.f32.xlu2 %v5940_v8 }
 0x45f   : > { %1870 = vst [vmem:[%s5926_s8 + $0x8] sm:$0xff] %v1854_v15  ;;  %3658 = vpow2.f32 %v2680_v0  ;;  %v2982_v15 = vld [vmem:[%s5957_s14 + $0x20] sm:$0xff]  ;;  %v6628_v0 = vld [vmem:[#allocation25_spill] sm:$0xff] }
 0x462   : > { %v1811_v49 = vpop.f32.mrf.mxu3  ;;  %v2629_v26 = vpop.xlane.xlu1 %2628 }
 0x463   : > { %v1812_v23 = vadd.f32 %v5914_v12, %v1811_v49  ;;  %v2651_v4 = vsub.f32 %v5807_v2, %v2629_v26 }
 0x465   : > { %v5947_v48 = vpop.eup %3658  ;;  %v1855_v16 = vadd.f32 %v1812_v23, %v5267_v46  ;;  %v2676_v50 = vmul.f32 1.442695, %v2651_v4 }
 0x466   : > { %2712 = vadd.xlane.f32.xlu1 %v5947_v48 }
 0x467   : > { %1871 = vst [vmem:[%s5926_s8 + $0x10] sm:$0xff] %v1855_v16  ;;  %3660 = vpow2.f32 %v2676_v50 }
 0x46a   : > { %v1814_v42 = vpop.f32.mrf.mxu3  ;;  %v5973_v19 = vpop.xlane.xlu1 %2634 }
 0x46b   : > { %v1815_v2 = vadd.f32 %v5914_v12, %v1814_v42 }
 0x46d   : > { %v5962_v46 = vpop.eup %3660  ;;  %v1856_v28 = vadd.f32 %v1815_v2, %v5282_v53  ;;  %v2981_v2 = vld [vmem:[%s5957_s14 + $0x18] sm:$0xff] }
 0x46e   : > { %2708 = vadd.xlane.f32.xlu2 %v5962_v46 }
 0x46f   : > { %1872 = vst [vmem:[%s5926_s8 + $0x18] sm:$0xff] %v1856_v28 }
 0x470   : > { %2996 = vperm.xlu0 %3535, %v2978_v35   ;;  %v2984_v35 = vld [vmem:[%s5957_s14 + $0x30] sm:$0xff] }
 0x472   : > { %v1817_v41 = vpop.f32.mrf.mxu3 }
 0x473   : > { %v1818_v59 = vadd.f32 %v5914_v12, %v1817_v41  ;;  %v6629_v41 = vld [vmem:[#allocation26_spill] sm:$0xff] }
 0x474   : > { %v5969_v55 = vpop.xlane.xlu2 %2690 }
 0x475   : > { %v1857_v39 = vadd.f32 %v1818_v59, %v5286_v31 }
 0x477   : > { %1873 = vst [vmem:[%s5926_s8 + $0x20] sm:$0xff] %v1857_v39 }
 0x478   : > { %3031 = vperm.xlu0 %3535, %v2985_v60  }
 0x47a   : > { %v1820_v53 = vpop.f32.mrf.mxu3 }
 0x47b   : > { %v1821_v30 = vadd.f32 %v5914_v12, %v1820_v53 }
 0x47c   : > { %v1538_v51 = vpop.xlane.xlu2 %1537 }
 0x47d   : > { %v1858_v32 = vadd.f32 %v1821_v30, %v6627_v7  ;;  %v1554_v58 = vmul.f32 %v1538_v51, %v4306_v22  ;;  %v2983_v30 = vld [vmem:[%s5957_s14 + $0x28] sm:$0xff] }
 0x47e   : > { %v2987_v7 = vld [vmem:[%s5957_s14 + $0x48] sm:$0xff] }
 0x47f   : > { %1874 = vst [vmem:[%s5926_s8 + $0x28] sm:$0xff] %v1858_v32  ;;  %v1570_v31 = vadd.f32 1e-06, %v1554_v58  ;;  %3001 = vperm.xlu1 %3536, %v2979_v37   ;;  %v6630_v32 = vld [vmem:[#allocation27_spill] sm:$0xff] }
 0x480   : > { %3046 = vperm.xlu0 %3535, %v2988_v21  }
 0x481   : > { %3662 = vrsqrt.f32 %v1570_v31  ;;  %vm1727_vm14 = vweird.f32 %v1570_v31 }
 0x482   : > { %v5982_v36 = vpop.xlane.xlu1 %2640  ;;  %v1823_v18 = vpop.f32.mrf.mxu3 }
 0x483   : > { %v1824_v44 = vadd.f32 %v5914_v12, %v1823_v18 }
 0x485   : > { %v1859_v49 = vadd.f32 %v1824_v44, %v6628_v0  ;;  %v2655_v0 = vsub.f32 %v5780_v57, %v5960_v1 }
 0x486   : > { %3006 = vperm.xlu2 %3537, %v2980_v11  }
 0x487   : > { %1875 = vst [vmem:[%s5926_s8 + $0x30] sm:$0xff] %v1859_v49  ;;  %3016 = vperm.xlu1 %3536, %v2982_v15   ;;  %v3663_v23 = vpop.eup %3662 }
 0x488   : > { %v1722_v28 = vmul.f32 %v3663_v23, %v1570_v31  ;;  %vm1728_vm15 = vweird.f32 %v3663_v23 }
 0x489   : > { %vm1729_vm2 = vmor %vm1727_vm14, %vm1728_vm15  ;;  %vm2727_vm15 = vweird.f32 %v5969_v55 }
 0x48a   : > { %v1536_v26 = vpop.xlane.xlu1 %1535  ;;  %v1826_v16 = vpop.f32.mrf.mxu3  ;;  %v1723_v39 = vmul.f32 %v3663_v23, %v1722_v28 }
 0x48b   : > { %v1553_v4 = vmul.f32 %v1536_v26, %v4306_v22  ;;  %v1827_v50 = vadd.f32 %v5914_v12, %v1826_v16  ;;  %v2986_v26 = vld [vmem:[%s5957_s14 + $0x40] sm:$0xff] }
 0x48c   : > { %v1724_v51 = vmul.f32 0.5, %v1723_v39 }
 0x48d   : > { %v1569_v42 = vadd.f32 1e-06, %v1553_v4  ;;  %v1860_v59 = vadd.f32 %v1827_v50, %v6629_v41  ;;  %v2990_v50 = vld [vmem:[%s5957_s14 + $0x60] sm:$0xff]  ;;  %v2684_v41 = vmul.f32 1.442695, %v2655_v0 }
 0x48e   : > { %3011 = vperm.xlu2 %3537, %v2981_v2   ;;  %v1725_v18 = vsub.f32 1.5, %v1724_v51  ;;  %v6631_v2 = vld [vmem:[#allocation28_spill] sm:$0xff] }
 0x48f   : > { %3664 = vrsqrt.f32 %v1569_v42  ;;  %1876 = vst [vmem:[%s5926_s8 + $0x38] sm:$0xff] %v1860_v59  ;;  %3026 = vperm.xlu1 %3536, %v2984_v35   ;;  %vm1717_vm7 = vweird.f32 %v1569_v42 }
 0x490   : > { %v1726_v4 = vmul.f32 %v3663_v23, %v1725_v18  ;;  %3666 = vpow2.f32 %v2684_v41  ;;  %v2991_v18 = vld [vmem:[%s5957_s14 + $0x68] sm:$0xff] }
 0x491   : > { %3668 = vrcp.f32 %v5969_v55 }
 0x492   : > { %v1730_v1 = vsel %vm1729_vm2, %v3663_v23, %v1726_v4 }
 0x493   : > { %v1829_v60 = vpop.f32.mrf.mxu3 }
 0x494   : > { %v1830_v22 = vadd.f32 %v5914_v12, %v1829_v60  ;;  %v2989_v60 = vld [vmem:[%s5957_s14 + $0x58] sm:$0xff] }
 0x495   : > { %v3665_v53 = vpop.eup %3664 }
 0x496   : > { %v1712_v37 = vmul.f32 %v3665_v53, %v1569_v42  ;;  %v1861_v58 = vadd.f32 %v1830_v22, %v6630_v32  ;;  %3021 = vperm.xlu2 %3537, %v2983_v30   ;;  %vm1718_vm10 = vweird.f32 %v3665_v53  ;;  %v6632_v22 = vld [vmem:[#allocation29_spill] sm:$0xff]  ;;  %v6016_v23 = vpop.eup %3666 }
 0x497   : > { %3041 = vperm.xlu1 %3536, %v2987_v7   ;;  %vm1719_vm1 = vmor %vm1717_vm7, %vm1718_vm10 }
 0x498   : > { %v1713_v21 = vmul.f32 %v3665_v53, %v1712_v37  ;;  %1877 = vst [vmem:[%s5926_s8 + $0x40] sm:$0xff] %v1861_v58  ;;  %v2639_v37 = vpop.xlane.xlu0 %2638 }
 0x49a   : > { %v1714_v44 = vmul.f32 0.5, %v1713_v21 }
 0x49b   : > { %v1832_v15 = vpop.f32.mrf.mxu3 }
 0x49c   : > { %v1715_v11 = vsub.f32 1.5, %v1714_v44  ;;  %v1833_v49 = vadd.f32 %v5914_v12, %v1832_v15  ;;  %v3669_v15 = vpop.eup %3668 }
 0x49d   : > { %vm2728_vm10 = vweird.f32 %v3669_v15 }
 0x49e   : > { %v1716_v16 = vmul.f32 %v3665_v53, %v1715_v11  ;;  %v1862_v28 = vadd.f32 %v1833_v49, %v6631_v2  ;;  %3036 = vperm.xlu2 %3537, %v2986_v26   ;;  %v2723_v26 = vmul.f32 %v3669_v15, %v5969_v55  ;;  %vm2729_vm7 = vmor %vm2727_vm15, %vm2728_vm10 }
 0x49f   : > { %3056 = vperm.xlu1 %3536, %v2990_v50  }
 0x4a0   : > { %v1720_v35 = vsel %vm1719_vm1, %v3665_v53, %v1716_v16  ;;  %1878 = vst [vmem:[%s5926_s8 + $0x48] sm:$0xff] %v1862_v28  ;;  %v1746_v53 = vmul.f32 %v1730_v1, %v5841_v20  ;;  %v6633_v20 = vld [vmem:[#allocation30_spill] sm:$0xff]  ;;  %v6023_v21 = vpop.xlane.xlu0 %2692  ;;  %v2724_v4 = vsub.f32 1.0, %v2723_v26 }
 0x4a1   : > { %v1745_v57 = vmul.f32 %v1720_v35, %v5878_v17  ;;  %vm2742_vm14 = vweird.f32 %v6023_v21 }
 0x4a2   : > { %v1765_v17 = vmul.f32 %v5665_v40, %v1746_v53  ;;  %v2725_v28 = vmul.f32 %v3669_v15, %v2724_v4 }
 0x4a3   : > { %v1764_v59 = vmul.f32 %v5665_v40, %v1745_v57  ;;  %v1835_v39 = vpop.f32.mrf.mxu3  ;;  %v2656_v40 = vsub.f32 %v5845_v62, %v2639_v37  ;;  %v6037_v62 = vpop.xlane.xlu2 %2696 }
 0x4a4   : > { %v1836_v42 = vadd.f32 %v5914_v12, %v1835_v39  ;;  %v1784_v51 = vadd.f32 %v5675_v29, %v1765_v17  ;;  %v2731_v17 = vand.u32 2147483647, %v5969_v55 }
 0x4a5   : > { %v1783_v31 = vadd.f32 %v5675_v29, %v1764_v59  ;;  %v2686_v44 = vmul.f32 1.442695, %v2656_v40  ;;  %v2654_v29 = vsub.f32 %v5823_v45, %v5973_v19  ;;  %v2657_v45 = vsub.f32 %v5871_v63, %v5982_v36 }
 0x4a6   : > { %v1863_v30 = vadd.f32 %v1836_v42, %v6632_v22  ;;  %3051 = vperm.xlu2 %3537, %v2989_v60   ;;  %v2726_v42 = vadd.f32 %v3669_v15, %v2725_v28  ;;  %v2733_v60 = vand.u32 2147483648, %v5969_v55  ;;  %vm2732_vm1 = vcmp.eq.f32.partialorder %v2731_v17, 8.507059e+37 }
 0x4a7   : > { %1846 = vmatmul.f32.gmra.mxu3 %v1783_v31  ;;  %3670 = vpow2.f32 %v2686_v44  ;;  %v2682_v49 = vmul.f32 1.442695, %v2654_v29  ;;  %v2688_v35 = vmul.f32 1.442695, %v2657_v45 }
 0x4a8   : > { %1879 = vst [vmem:[%s5926_s8 + $0x50] sm:$0xff] %v1863_v30  ;;  %v6030_v11 = vpop.xlane.xlu0 %2698  ;;  %3672 = vrcp.f32 %v6023_v21 }
 0x4a9   : > { %v6032_v0 = vpop.xlane.xlu1 %2694 }
 0x4aa   : > { %2716 = vadd.xlane.f32.xlu0 %v6016_v23  ;;  %3674 = vrcp.f32 %v6032_v0  ;;  %vm2757_vm10 = vweird.f32 %v6032_v0 }
 0x4ab   : > { %3676 = vpow2.f32 %v2682_v49 }
 0x4ad   : > { %v6043_v16 = vpop.eup %3670 }
 0x4ae   : > { %v6048_v50 = vpop.eup %3672 }
 0x4af   : > { %1849 = vmatmul.f32.gmra.mxu3 %v1784_v51  ;;  %v2738_v63 = vmul.f32 %v6048_v50, %v6023_v21  ;;  %vm2743_vm2 = vweird.f32 %v6048_v50 }
 0x4b0   : > { %v1838_v7 = vpop.f32.mrf.mxu3  ;;  %v6050_v2 = vpop.eup %3674 }
 0x4b1   : > { %v1839_v32 = vadd.f32 %v5914_v12, %v1838_v7  ;;  %v6052_v41 = vpop.eup %3676  ;;  %v2753_v57 = vmul.f32 %v6050_v2, %v6032_v0  ;;  %v2739_v22 = vsub.f32 1.0, %v2738_v63  ;;  %v6634_v7 = vld [vmem:[#allocation31_spill] sm:$0xff]  ;;  %vm2758_vm15 = vweird.f32 %v6050_v2 }
 0x4b2   : > { %vm6128_vm9 = vmor %vm2757_vm10, %vm2758_vm15 }
 0x4b3   : > { %v1864_v58 = vadd.f32 %v1839_v32, %v6633_v20  ;;  %v2754_v37 = vsub.f32 1.0, %v2753_v57  ;;  %v2730_v20 = vsel %vm2729_vm7, %v3669_v15, %v2726_v42  ;;  %v2740_v55 = vmul.f32 %v6048_v50, %v2739_v22  ;;  %vm6143_vm10 = vmor %vm2742_vm14, %vm2743_vm2 }
 0x4b4   : > { %v2746_v15 = vand.u32 2147483647, %v6023_v21 }
 0x4b5   : > { %1880 = vst [vmem:[%s5926_s8 + $0x58] sm:$0xff] %v1864_v58  ;;  %v2748_v58 = vand.u32 2147483648, %v6023_v21  ;;  %v2755_v26 = vmul.f32 %v6050_v2, %v2754_v37  ;;  %v2741_v22 = vadd.f32 %v6048_v50, %v2740_v55  ;;  %v2778_v55 = vand.u32 2147483648, %v6037_v62 }
 0x4b6   : > { %vm6109_vm7 = vcmp.eq.f32.partialorder %v2746_v15, 8.507059e+37  ;;  %v2776_v15 = vand.u32 2147483647, %v6037_v62  ;;  %v2793_v37 = vand.u32 2147483648, %v6030_v11 }
 0x4b7   : > { %v2749_v57 = vor.u32 1.1754944e-38, %v2748_v58  ;;  %v2761_v58 = vand.u32 2147483647, %v6032_v0 }
 0x4b9   : > { %v6062_v59 = vpop.xlane.xlu1 %2700  ;;  %vm2762_vm14 = vcmp.eq.f32.partialorder %v2761_v58, 8.507059e+37  ;;  %v2779_v58 = vor.u32 1.1754944e-38, %v2778_v55 }
 0x4be   : > { %3061 = vperm.xlu0 %3535, %v2991_v18   ;;  %v2734_v18 = vor.u32 1.1754944e-38, %v2733_v60 }
 0x4c0   : > { %v2735_v4 = vsel %vm2732_vm1, %v2734_v18, %v2730_v20 }
 0x4c1   : > { %v6095_v42 = vpop.xlane.xlu1 %2706 }
 0x4c7   : > { %v6041_v19 = vpop.xlane.xlu0 %2704 }
 0x4c8   : > { %3678 = vrcp.f32 %v6041_v19  ;;  %vm2832_vm8 = vweird.f32 %v6041_v19 }
 0x4c9   : > { %3680 = vrcp.f32 %v6037_v62  ;;  %2718 = vadd.xlane.f32.xlu1 %v6043_v16 }
 0x4ca   : > { %3682 = vpow2.f32 %v2688_v35 }
 0x4ce   : > { %v6056_v36 = vpop.eup %3678 }
 0x4cf   : > { %v6060_v1 = vpop.eup %3680  ;;  %2714 = vadd.xlane.f32.xlu2 %v6052_v41  ;;  %v6065_v39 = vpop.xlane.xlu0 %2710  ;;  %v2828_v31 = vmul.f32 %v6056_v36, %v6041_v19  ;;  %vm2833_vm1 = vweird.f32 %v6056_v36 }
 0x4d0   : > { %3684 = vrcp.f32 %v6065_v39  ;;  %v1841_v53 = vpop.f32.mrf.mxu3  ;;  %v2768_v51 = vmul.f32 %v6060_v1, %v6037_v62  ;;  %v6080_v44 = vpop.eup %3682  ;;  %vm6148_vm15 = vmor %vm2832_vm8, %vm2833_vm1  ;;  %vm2772_vm8 = vweird.f32 %v6037_v62 }
 0x4d1   : > { %v1842_v30 = vadd.f32 %v5914_v12, %v1841_v53  ;;  %3686 = vrcp.f32 %v6030_v11  ;;  %v2829_v40 = vsub.f32 1.0, %v2828_v31  ;;  %6635 = vst [vmem:[#allocation24_spill] sm:$0xff] %v6080_v44  ;;  %v6097_v60 = vpop.xlane.xlu2 %2702  ;;  %v2736_v53 = vmul.f32 %v5833_v43, %v2735_v4 }
 0x4d2   : > { %3688 = vrcp.f32 %v6062_v59  ;;  %v2769_v49 = vsub.f32 1.0, %v2768_v51  ;;  %v2756_v51 = vadd.f32 %v6050_v2, %v2755_v26  ;;  %v2838_v26 = vand.u32 2147483648, %v6041_v19 }
 0x4d3   : > { %v1865_v32 = vadd.f32 %v1842_v30, %v6634_v7  ;;  %v2830_v28 = vmul.f32 %v6056_v36, %v2829_v40  ;;  %v2763_v7 = vand.u32 2147483648, %v6032_v0  ;;  %3690 = vrcp.f32 %v6095_v42 }
 0x4d4   : > { %v2770_v17 = vmul.f32 %v6060_v1, %v2769_v49  ;;  %3692 = vrcp.f32 %v6097_v60  ;;  %v2839_v14 = vor.u32 1.1754944e-38, %v2838_v26 }
 0x4d5   : > { %1881 = vst [vmem:[%s5926_s8 + $0x60] sm:$0xff] %v1865_v32  ;;  %v6638_v32 = vld [vmem:[#allocation32_spill] sm:$0xff]  ;;  %v2831_v18 = vadd.f32 %v6056_v36, %v2830_v28  ;;  %v2760_v28 = vsel %vm6128_vm9, %v6050_v2, %v2756_v51  ;;  %vm2773_vm9 = vweird.f32 %v6060_v1 }
 0x4d6   : > { %v6084_v29 = vpop.eup %3684  ;;  %vm6172_vm1 = vmor %vm2772_vm8, %vm2773_vm9 }
 0x4d7   : > { %2720 = vadd.xlane.f32.xlu2 %v6080_v44  ;;  %v6089_v45 = vpop.eup %3686  ;;  %v2873_v35 = vmul.f32 %v6084_v29, %v6065_v39  ;;  %v2835_v51 = vsel %vm6148_vm15, %v6056_v36, %v2831_v18  ;;  %vm2787_vm15 = vweird.f32 %v6030_v11  ;;  %v2808_v36 = vand.u32 2147483648, %v6062_v59 }
 0x4d8   : > { %v1844_v63 = vpop.f32.mrf.mxu3  ;;  %v6103_v30 = vpop.eup %3688  ;;  %v2783_v43 = vmul.f32 %v6089_v45, %v6030_v11 }
 0x4d9   : > { %v1845_v31 = vadd.f32 %v5914_v12, %v1844_v63  ;;  %v2874_v40 = vsub.f32 1.0, %v2873_v35  ;;  %v2798_v49 = vmul.f32 %v6103_v30, %v6062_v59  ;;  %v2836_v35 = vand.u32 2147483647, %v6041_v19  ;;  %v2993_v63 = vld [vmem:[%s5957_s14 + $0x78] sm:$0xff]  ;;  %v6164_v44 = vpop.eup %3690  ;;  %v6166_v52 = vpop.xlane.xlu1 %2712 }
 0x4da   : > { %v2745_v19 = vsel %vm6143_vm10, %v6048_v50, %v2741_v22  ;;  %v2784_v2 = vsub.f32 1.0, %v2783_v43  ;;  %v2962_v22 = vsel %vm2546_vm6, %v2736_v53, 0.0  ;;  %vm6176_vm10 = vcmp.eq.f32.partialorder %v2776_v15, 8.507059e+37  ;;  %v6185_v26 = vpop.eup %3692 }
 0x4db   : > { %v1866_v20 = vadd.f32 %v1845_v31, %v6638_v32  ;;  %v2764_v31 = vor.u32 1.1754944e-38, %v2763_v7  ;;  %v2875_v21 = vmul.f32 %v6084_v29, %v2874_v40  ;;  %v2799_v7 = vsub.f32 1.0, %v2798_v49 }
 0x4dc   : > { %vm2837_vm2 = vcmp.eq.f32.partialorder %v2836_v35, 8.507059e+37  ;;  %v2750_v49 = vsel %vm6109_vm7, %v2749_v57, %v2745_v19  ;;  %vm2878_vm6 = vweird.f32 %v6084_v29  ;;  %3694 = vrcp.f32 %v6166_v52 }
 0x4dd   : > { %1882 = vst [vmem:[%s5926_s8 + $0x68] sm:$0xff] %v1866_v20  ;;  %v2771_v20 = vadd.f32 %v6060_v1, %v2770_v17  ;;  %v2765_v17 = vsel %vm2762_vm14, %v2764_v31, %v2760_v28  ;;  %v2840_v18 = vsel %vm2837_vm2, %v2839_v14, %v2835_v51  ;;  %v2785_v28 = vmul.f32 %v6089_v45, %v2784_v2 }
 0x4de   : > { %v2766_v35 = vmul.f32 %v5901_v25, %v2765_v17  ;;  %v2876_v15 = vadd.f32 %v6084_v29, %v2875_v21  ;;  %v2800_v55 = vmul.f32 %v6103_v30, %v2799_v7  ;;  %v2843_v14 = vmul.f32 %v6164_v44, %v6095_v42 }
 0x4df   : > { %v2775_v53 = vsel %vm6172_vm1, %v6060_v1, %v2771_v20  ;;  %v2883_v1 = vand.u32 2147483648, %v6065_v39  ;;  %vm2877_vm7 = vweird.f32 %v6065_v39  ;;  %v2841_v25 = vmul.f32 %v5930_v54, %v2840_v18 }
 0x4e0   : > { %v2881_v57 = vand.u32 2147483647, %v6065_v39  ;;  %v2813_v0 = vmul.f32 %v6185_v26, %v6097_v60  ;;  %vm6212_vm9 = vmor %vm2877_vm7, %vm2878_vm6  ;;  %v2786_v39 = vadd.f32 %v6089_v45, %v2785_v28  ;;  %vm2788_vm14 = vweird.f32 %v6089_v45 }
 0x4e1   : > { %v6162_v4 = vpop.xlane.xlu2 %2708  ;;  %v2880_v54 = vsel %vm6212_vm9, %v6084_v29, %v2876_v15  ;;  %v2791_v32 = vand.u32 2147483647, %v6030_v11  ;;  %v2844_v20 = vsub.f32 1.0, %v2843_v14  ;;  %v2964_v21 = vsel %vm2548_vm0, %v2766_v35, 0.0 }
 0x4e2   : > { %v2997_v43 = vpop.permute.xlu0 %2996  ;;  %3071 = vperm.xlu1 %3536, %v2993_v63   ;;  %3696 = vrcp.f32 %v6162_v4  ;;  %v2780_v63 = vsel %vm6176_vm10, %v2779_v58, %v2775_v53  ;;  %v2884_v51 = vor.u32 1.1754944e-38, %v2883_v1  ;;  %vm2803_vm8 = vweird.f32 %v6103_v30  ;;  %v2992_v53 = vld [vmem:[%s5957_s14 + $0x70] sm:$0xff]  ;;  %s3895_s14 = scalar_lea.hbm %s6673_s9, 256 }
 0x4e3   : > { %v3074_v40 = vmul.f32 %v2997_v43, %v2962_v22  ;;  %v2969_v29 = vsel %vm2553_vm3, %v2841_v25, 0.0  ;;  %vm2882_vm2 = vcmp.eq.f32.partialorder %v2881_v57, 8.507059e+37  ;;  %v2801_v22 = vadd.f32 %v6103_v30, %v2800_v55  ;;  %v6228_v43 = vpop.eup %3694  ;;  %vm6243_vm3 = vmor %vm2787_vm15, %vm2788_vm14  ;;  %v6665_v55 = vld [vmem:[#allocation38_spill] sm:$0xff]  ;;  %p3897_p13 = scmp.lt.s32.totalorder %s3895_s14, %s3891_s27 }
 0x4e4   : > { %v2814_v62 = vsub.f32 1.0, %v2813_v0  ;;  %vm2802_vm0 = vweird.f32 %v6062_v59  ;;  %v2781_v28 = vmul.f32 %v5884_v27, %v2780_v63  ;;  %v2751_v35 = vmul.f32 %v5867_v5, %v2750_v49 }
 0x4e5   : > { %3090 = vst [vmem:[%s6197_s5] sm:$0xff] %v3074_v40  ;;  %v2885_v40 = vsel %vm2882_vm2, %v2884_v51, %v2880_v54  ;;  %v2806_v15 = vand.u32 2147483647, %v6062_v59  ;;  %v2845_v14 = vmul.f32 %v6164_v44, %v2844_v20  ;;  %vm6251_vm1 = vmor %vm2802_vm0, %vm2803_vm8  ;;  %v2790_v5 = vsel %vm6243_vm3, %v6089_v45, %v2786_v39  ;;  %p3898_p0 = por %p3897_p13, %p3896_p12 }
 0x4e6   : > { %v2886_v27 = vmul.f32 %v5935_v38, %v2885_v40  ;;  %v2805_v11 = vsel %vm6251_vm1, %v6103_v30, %v2801_v22  ;;  %vm2792_vm10 = vcmp.eq.f32.partialorder %v2791_v32, 8.507059e+37  ;;  %v2794_v59 = vor.u32 1.1754944e-38, %v2793_v37  ;;  %v6659_v38 = vld [vmem:[#allocation33_spill] sm:$0xff] }
 0x4e7   : > { %v2815_v49 = vmul.f32 %v6185_v26, %v2814_v62  ;;  %v2888_v25 = vmul.f32 %v6228_v43, %v6166_v52  ;;  %v2809_v0 = vor.u32 1.1754944e-38, %v2808_v36  ;;  %v2965_v45 = vsel %vm2549_vm13, %v2781_v28, 0.0  ;;  %p3899_p4 = pnand %p3898_p0, %p3894_p11 }
 0x4e8   : > { %v6231_v18 = vpop.eup %3696  ;;  %vm6660_vm6 = vcmp.gt.f32.partialorder %v6659_v38, 0.0  ;;  %vm2807_vm7 = vcmp.eq.f32.partialorder %v2806_v15, 8.507059e+37  ;;  %v2795_v30 = vsel %vm2792_vm10, %v2794_v59, %v2790_v5  ;;  %v2853_v37 = vand.u32 2147483648, %v6095_v42 }
 0x4e9   : > { %v3007_v19 = vpop.permute.xlu2 %3006  ;;  %v2858_v57 = vmul.f32 %v6231_v18, %v6162_v4  ;;  %v2963_v31 = vsel %vm6660_vm6, %v2751_v35, 0.0  ;;  %v2810_v32 = vsel %vm2807_vm7, %v2809_v0, %v2805_v11  ;;  %v2846_v20 = vadd.f32 %v6164_v44, %v2845_v14  ;;  %v6667_v14 = vld [vmem:[#allocation36_spill] sm:$0xff] }
 0x4ea   : > { %v3076_v7 = vmul.f32 %v3007_v19, %v2964_v21  ;;  %v3032_v50 = vpop.permute.xlu0 %3031  ;;  %vm2848_vm15 = vweird.f32 %v6164_v44  ;;  %v2972_v21 = vsel %vm2556_vm12, %v2886_v27, 0.0  ;;  %vm2818_vm13 = vweird.f32 %v6185_v26 }
 0x4eb   : > { %v3081_v58 = vmul.f32 %v3032_v50, %v2969_v29  ;;  %v2859_v17 = vsub.f32 1.0, %v2858_v57  ;;  %v2816_v50 = vadd.f32 %v6185_v26, %v2815_v49  ;;  %vm2847_vm9 = vweird.f32 %v6095_v42 }
 0x4ec   : > { %3092 = vst [vmem:[%s6197_s5 + $0x10] sm:$0xff] %v3076_v7  ;;  %v2889_v7 = vsub.f32 1.0, %v2888_v25  ;;  %v2823_v22 = vand.u32 2147483648, %v6097_v60  ;;  %v2851_v36 = vand.u32 2147483647, %v6095_v42  ;;  %vm2817_vm14 = vweird.f32 %v6097_v60  ;;  %vm6288_vm12 = vmor %vm2847_vm9, %vm2848_vm15 }
 0x4ed   : > { %3097 = vst [vmem:[%s6197_s5 + $0x38] sm:$0xff] %v3081_v58  ;;  %v2811_v24 = vmul.f32 %v5906_v33, %v2810_v32  ;;  %v2796_v62 = vmul.f32 %v5897_v47, %v2795_v30  ;;  %v2821_v40 = vand.u32 2147483647, %v6097_v60  ;;  %v2850_v42 = vsel %vm6288_vm12, %v6164_v44, %v2846_v20  ;;  %vm6299_vm8 = vmor %vm2817_vm14, %vm2818_vm13  ;;  %v6671_v32 = vld [vmem:[#allocation39_spill] sm:$0xff] }
 0x4ee   : > { %v2890_v47 = vmul.f32 %v6228_v43, %v2889_v7  ;;  %v2860_v33 = vmul.f32 %v6231_v18, %v2859_v17  ;;  %v2854_v28 = vor.u32 1.1754944e-38, %v2853_v37  ;;  %v2820_v60 = vsel %vm6299_vm8, %v6185_v26, %v2816_v50 }
 0x4ef   : > { %3066 = vperm.xlu2 %3537, %v2992_v53   ;;  %vm2852_vm2 = vcmp.eq.f32.partialorder %v2851_v36, 8.507059e+37  ;;  %v2824_v35 = vor.u32 1.1754944e-38, %v2823_v22  ;;  %vm6666_vm0 = vcmp.gt.f32.partialorder %v6665_v55, 0.0  ;;  %vm6668_vm3 = vcmp.gt.f32.partialorder %v6667_v14, 0.0 }
 0x4f0   : > { %v2967_v44 = vsel %vm6666_vm0, %v2811_v24, 0.0  ;;  %v2966_v1 = vsel %vm6668_vm3, %v2796_v62, 0.0  ;;  %v2855_v27 = vsel %vm2852_vm2, %v2854_v28, %v2850_v42  ;;  %vm2822_vm1 = vcmp.eq.f32.partialorder %v2821_v40, 8.507059e+37 }
 0x4f1   : > { %v3012_v54 = vpop.permute.xlu2 %3011  ;;  %v3002_v39 = vpop.permute.xlu1 %3001  ;;  %v2825_v49 = vsel %vm2822_vm1, %v2824_v35, %v2820_v60  ;;  %vm2893_vm10 = vweird.f32 %v6228_v43  ;;  %v2891_v26 = vadd.f32 %v6228_v43, %v2890_v47  ;;  %v2861_v25 = vadd.f32 %v6231_v18, %v2860_v33 }
 0x4f2   : > { %v3077_v19 = vmul.f32 %v3012_v54, %v2965_v45  ;;  %v3075_v2 = vmul.f32 %v3002_v39, %v2963_v31  ;;  %v3047_v51 = vpop.permute.xlu0 %3046  ;;  %vm2863_vm6 = vweird.f32 %v6231_v18  ;;  %vm2892_vm7 = vweird.f32 %v6166_v52 }
 0x4f3   : > { %v3084_v29 = vmul.f32 %v3047_v51, %v2972_v21  ;;  %v2898_v57 = vand.u32 2147483648, %v6166_v52  ;;  %v2868_v0 = vand.u32 2147483648, %v6162_v4  ;;  %v2856_v63 = vmul.f32 %v5919_v10, %v2855_v27  ;;  %vm6324_vm13 = vmor %vm2892_vm7, %vm2893_vm10 }
 0x4f4   : > { %3093 = vst [vmem:[%s6197_s5 + $0x18] sm:$0xff] %v3077_v19  ;;  %vm2862_vm15 = vweird.f32 %v6162_v4  ;;  %v2826_v45 = vmul.f32 %v5940_v8, %v2825_v49  ;;  %v2896_v31 = vand.u32 2147483647, %v6166_v52  ;;  %v2866_v30 = vand.u32 2147483647, %v6162_v4 }
 0x4f5   : > { %3091 = vst [vmem:[%s6197_s5 + $0x8] sm:$0xff] %v3075_v2  ;;  %vm2864_vm9 = vmor %vm2862_vm15, %vm2863_vm6  ;;  %v2895_v10 = vsel %vm6324_vm13, %v6228_v43, %v2891_v26  ;;  %v2899_v54 = vor.u32 1.1754944e-38, %v2898_v57  ;;  %v2869_v39 = vor.u32 1.1754944e-38, %v2868_v0  ;;  %vm6672_vm14 = vcmp.gt.f32.partialorder %v6671_v32, 0.0 }
 0x4f6   : > { %3100 = vst [vmem:[%s6197_s5 + $0x50] sm:$0xff] %v3084_v29  ;;  %v2865_v37 = vsel %vm2864_vm9, %v6231_v18, %v2861_v25  ;;  %v2970_v20 = vsel %vm6672_vm14, %v2856_v63, 0.0  ;;  %v2968_v52 = vsel %vm2552_vm5, %v2826_v45, 0.0  ;;  %vm2897_vm12 = vcmp.eq.f32.partialorder %v2896_v31, 8.507059e+37 }
 0x4f7   : > { %vm2867_vm8 = vcmp.eq.f32.partialorder %v2866_v30, 8.507059e+37  ;;  %v2900_v21 = vsel %vm2897_vm12, %v2899_v54, %v2895_v10  ;;  %vm6675_vm0 = vcmp.gt.f32.partialorder %v5765_v13, 0.0 }
 0x4f8   : > { %v2870_v43 = vsel %vm2867_vm8, %v2869_v39, %v2865_v37  ;;  %v2901_v18 = vmul.f32 %v5947_v48, %v2900_v21 }
 0x4f9   : > { %v3022_v15 = vpop.permute.xlu2 %3021  ;;  %v3017_v5 = vpop.permute.xlu1 %3016  ;;  %v2871_v51 = vmul.f32 %v5962_v46, %v2870_v43 }
 0x4fa   : > { %v3079_v11 = vmul.f32 %v3022_v15, %v2967_v44  ;;  %v3078_v59 = vmul.f32 %v3017_v5, %v2966_v1  ;;  %v2973_v34 = vsel %vm2557_vm4, %v2901_v18, 0.0 }
 0x4fb   : > { %v2971_v17 = vsel %vm2555_vm11, %v2871_v51, 0.0 }
 0x4fc   : > { %3095 = vst [vmem:[%s6197_s5 + $0x28] sm:$0xff] %v3079_v11 }
 0x4fd   : > { %3094 = vst [vmem:[%s6197_s5 + $0x20] sm:$0xff] %v3078_v59 }
 0x501   : > { %v3037_v8 = vpop.permute.xlu2 %3036  ;;  %v3027_v19 = vpop.permute.xlu1 %3026 }
 0x502   : > { %v3082_v4 = vmul.f32 %v3037_v8, %v2970_v20  ;;  %v3080_v2 = vmul.f32 %v3027_v19, %v2968_v52 }
 0x504   : > { %3098 = vst [vmem:[%s6197_s5 + $0x40] sm:$0xff] %v3082_v4 }
 0x505   : > { %3096 = vst [vmem:[%s6197_s5 + $0x30] sm:$0xff] %v3080_v2 }
 0x509   : > { %v3052_v7 = vpop.permute.xlu2 %3051  ;;  %v3042_v29 = vpop.permute.xlu1 %3041 }
 0x50a   : > { %v3085_v50 = vmul.f32 %v3052_v7, %v2973_v34  ;;  %v3083_v22 = vmul.f32 %v3042_v29, %v2971_v17 }
 0x50c   : > { %3101 = vst [vmem:[%s6197_s5 + $0x58] sm:$0xff] %v3085_v50 }
 0x50d   : > { %3099 = vst [vmem:[%s6197_s5 + $0x48] sm:$0xff] %v3083_v22 }
 0x511   : > { %v6363_v1 = vpop.permute.xlu1 %3056 }
 0x51d   : > { %v2717_v36 = vpop.xlane.xlu0 %2716 }
 0x51e   : > { %3698 = vrcp.f32 %v2717_v36  ;;  %v2928_v62 = vand.u32 2147483648, %v2717_v36  ;;  %v2926_v40 = vand.u32 2147483647, %v2717_v36  ;;  %vm2922_vm4 = vweird.f32 %v2717_v36 }
 0x520   : > { %v2929_v47 = vor.u32 1.1754944e-38, %v2928_v62  ;;  %vm2927_vm2 = vcmp.eq.f32.partialorder %v2926_v40, 8.507059e+37 }
 0x524   : > { %v3699_v24 = vpop.eup %3698 }
 0x525   : > { %v2918_v48 = vmul.f32 %v3699_v24, %v2717_v36  ;;  %vm2923_vm5 = vweird.f32 %v3699_v24 }
 0x526   : > { %vm2924_vm11 = vmor %vm2922_vm4, %vm2923_vm5 }
 0x527   : > { %v2919_v46 = vsub.f32 1.0, %v2918_v48 }
 0x529   : > { %v2920_v9 = vmul.f32 %v3699_v24, %v2919_v46 }
 0x52a   : > { %v1847_v58 = vpop.f32.mrf.mxu3 }
 0x52b   : > { %v1848_v61 = vadd.f32 %v5914_v12, %v1847_v58  ;;  %v2921_v53 = vadd.f32 %v3699_v24, %v2920_v9 }
 0x52d   : > { %v1867_v42 = vadd.f32 %v1848_v61, %v5351_v56  ;;  %v2925_v33 = vsel %vm2924_vm11, %v3699_v24, %v2921_v53 }
 0x52e   : > { %v2930_v28 = vsel %vm2927_vm2, %v2929_v47, %v2925_v33 }
 0x52f   : > { %1883 = vst [vmem:[%s5926_s8 + $0x70] sm:$0xff] %v1867_v42  ;;  %v2931_v60 = vmul.f32 %v6016_v23, %v2930_v28 }
 0x530   : > { %v3062_v56 = vpop.permute.xlu0 %3061 }
 0x531   : > { %v2975_v15 = vsel %vm6675_vm0, %v2931_v60, 0.0 }
 0x532   : > { %v1850_v35 = vpop.f32.mrf.mxu3  ;;  %v3087_v44 = vmul.f32 %v3062_v56, %v2975_v15 }
 0x533   : > { %v1851_v55 = vadd.f32 %v5914_v12, %v1850_v35 }
 0x534   : > { %3103 = vst [vmem:[%s6197_s5 + $0x68] sm:$0xff] %v3087_v44 }
 0x535   : > { %v1868_v14 = vadd.f32 %v1851_v55, %v5361_v6 }
 0x537   : > { %1884 = vst [vmem:[%s5926_s8 + $0x78] sm:$0xff] %v1868_v14 }
 0x538   : > { %3902 = shalt.err (!%p3899_p4)
}
 0x539   : > { %s4010_s8 = smov 128   ;;  %s4011_s6 = smov 8   ;;  %vm6676_vm14 = vcmp.gt.f32.partialorder %v5796_v3, 0.0  ;;  %v6677_v18 = vld [vmem:[#allocation41_spill] sm:$0xff]  ;;  %v6680_v22 = vld [vmem:[#allocation24_spill] sm:$0xff]  ;;  %v6681_v24 = vld [vmem:[#allocation42_spill] sm:$0xff] }
 0x53a   : > { %3436 = dma.vmem_to_hbm [thread:$0]  (%p4192_p2), %s3127_s24, 2048, %s3129_s16, %s3107_s4, %s4010_s8, %s4010_s8, %s4011_s6   ;;  %vm6678_vm12 = vcmp.gt.f32.partialorder %v6677_v18, 0.0  ;;  %vm6682_vm2 = vcmp.gt.f32.partialorder %v6681_v24, 0.0 }
 0x53b   : > { %s6679_s4 = sld [smem:[#allocation51_spill]]  ;;  %s3145_s27 = sshll.u32 %s6197_s5, 4  ;;  %s3146_s27 = int_to_ptr.vmem [resolvable:$true] %s3145_s27 }
 0x53c   : > { %v2719_v6 = vpop.xlane.xlu1 %2718  ;;  %s3112_s21 = scalar_lea.sflag [#allocation15], %s4215_s30 }
 0x53d   : > { %3700 = vrcp.f32 %v2719_v6  ;;  %v2943_v27 = vand.u32 2147483648, %v2719_v6  ;;  %v2941_v59 = vand.u32 2147483647, %v2719_v6  ;;  %vm2937_vm1 = vweird.f32 %v2719_v6 }
 0x53f   : > { %v2944_v0 = vor.u32 1.1754944e-38, %v2943_v27  ;;  %vm2942_vm6 = vcmp.eq.f32.partialorder %v2941_v59, 8.507059e+37 }
 0x541   : > { %s3144_s29 = scalar_lea.hbm %s6679_s4, %s3384_s18  ;;  %s3923_s15 = scalar_lea.hbm %s6679_s4, 256 }
 0x542   : > { %v2715_v13 = vpop.xlane.xlu2 %2714  ;;  %s3147_s17 = sshll.u32 %s3144_s29, 4  ;;  %s3148_s17 = int_to_ptr.hbm [resolvable:$true] %s3147_s17 }
 0x543   : > { %v3701_v12 = vpop.eup %3700  ;;  %3702 = vrcp.f32 %v2715_v13  ;;  %v2913_v38 = vand.u32 2147483648, %v2715_v13  ;;  %v2911_v10 = vand.u32 2147483647, %v2715_v13  ;;  %vm2907_vm15 = vweird.f32 %v2715_v13  ;;  %s3917_s26 = sshra.s32 %s3148_s17, 4  ;;  %s3918_s26 = int_to_ptr.hbm [resolvable:$true] %s3917_s26 }
 0x544   : > { %v2933_v23 = vmul.f32 %v3701_v12, %v2719_v6  ;;  %vm2938_vm3 = vweird.f32 %v3701_v12  ;;  %s3919_s18 = scalar_lea.hbm %s3918_s26, 128  ;;  %p3924_p7 = scmp.lt.s32.totalorder %s3918_s26, %s6679_s4 }
 0x545   : > { %vm2939_vm10 = vmor %vm2937_vm1, %vm2938_vm3  ;;  %v2914_v8 = vor.u32 1.1754944e-38, %v2913_v38  ;;  %vm2912_vm9 = vcmp.eq.f32.partialorder %v2911_v10, 8.507059e+37  ;;  %p3920_p6 = scmp.ne.s32.totalorder %s3918_s26, %s3919_s18  ;;  %p3925_p1 = scmp.lt.s32.totalorder %s3923_s15, %s3919_s18 }
 0x546   : > { %v2934_v5 = vsub.f32 1.0, %v2933_v23 }
 0x547   : > { %p3921_p8 = pnand %p3920_p6, %p4192_p2  ;;  %p3926_p3 = por %p3925_p1, %p3924_p7 }
 0x548   : > { %v2935_v11 = vmul.f32 %v3701_v12, %v2934_v5 }
 0x549   : > { %v3703_v49 = vpop.eup %3702  ;;  %p3922_p9 = pneg %p3921_p8 }
 0x54a   : > { %v2903_v26 = vmul.f32 %v3703_v49, %v2715_v13  ;;  %v2721_v25 = vpop.xlane.xlu2 %2720  ;;  %v2936_v57 = vadd.f32 %v3701_v12, %v2935_v11  ;;  %vm2908_vm7 = vweird.f32 %v3703_v49 }
 0x54b   : > { %3704 = vrcp.f32 %v2721_v25  ;;  %vm2909_vm13 = vmor %vm2907_vm15, %vm2908_vm7  ;;  %v2958_v43 = vand.u32 2147483648, %v2721_v25  ;;  %v2956_v34 = vand.u32 2147483647, %v2721_v25  ;;  %vm2952_vm5 = vweird.f32 %v2721_v25  ;;  %p3927_p11 = pnand %p3926_p3, %p3922_p9 }
 0x54c   : > { %v2904_v63 = vsub.f32 1.0, %v2903_v26  ;;  %v2940_v45 = vsel %vm2939_vm10, %v3701_v12, %v2936_v57 }
 0x54d   : > { %v2945_v31 = vsel %vm2942_vm6, %v2944_v0, %v2940_v45  ;;  %v2959_v29 = vor.u32 1.1754944e-38, %v2958_v43  ;;  %vm2957_vm11 = vcmp.eq.f32.partialorder %v2956_v34, 8.507059e+37 }
 0x54e   : > { %v2905_v30 = vmul.f32 %v3703_v49, %v2904_v63  ;;  %v2946_v37 = vmul.f32 %v6043_v16, %v2945_v31 }
 0x550   : > { %v2906_v54 = vadd.f32 %v3703_v49, %v2905_v30  ;;  %v2976_v19 = vsel %vm6676_vm14, %v2946_v37, 0.0 }
 0x551   : > { %v3705_v39 = vpop.eup %3704 }
 0x552   : > { %v2910_v32 = vsel %vm2909_vm13, %v3703_v49, %v2906_v54  ;;  %v2948_v20 = vmul.f32 %v3705_v39, %v2721_v25  ;;  %v3067_v52 = vpop.permute.xlu2 %3066  ;;  %vm2953_vm8 = vweird.f32 %v3705_v39 }
 0x553   : > { %v2915_v4 = vsel %vm2912_vm9, %v2914_v8, %v2910_v32  ;;  %v3088_v2 = vmul.f32 %v3067_v52, %v2976_v19  ;;  %vm2954_vm4 = vmor %vm2952_vm5, %vm2953_vm8 }
 0x554   : > { %v2916_v21 = vmul.f32 %v6052_v41, %v2915_v4  ;;  %v2949_v16 = vsub.f32 1.0, %v2948_v20  ;;  %v3072_v46 = vpop.permute.xlu1 %3071 }
 0x555   : > { %3104 = vst [vmem:[%s6197_s5 + $0x70] sm:$0xff] %v3088_v2 }
 0x556   : > { %v2974_v51 = vsel %vm6678_vm12, %v2916_v21, 0.0  ;;  %v2950_v7 = vmul.f32 %v3705_v39, %v2949_v16 }
 0x557   : > { %v3086_v17 = vmul.f32 %v6363_v1, %v2974_v51 }
 0x558   : > { %v2951_v3 = vadd.f32 %v3705_v39, %v2950_v7 }
 0x559   : > { %3102 = vst [vmem:[%s6197_s5 + $0x60] sm:$0xff] %v3086_v17 }
 0x55a   : > { %v2955_v41 = vsel %vm2954_vm4, %v3705_v39, %v2951_v3 }
 0x55b   : > { %v2960_v50 = vsel %vm2957_vm11, %v2959_v29, %v2955_v41 }
 0x55c   : > { %v2961_v36 = vmul.f32 %v6680_v22, %v2960_v50 }
 0x55e   : > { %v2977_v48 = vsel %vm6682_vm2, %v2961_v36, 0.0 }
 0x55f   : > { %v3089_v62 = vmul.f32 %v3072_v46, %v2977_v48 }
 0x561   : > { %3105 = vst [vmem:[%s6197_s5 + $0x78] sm:$0xff] %v3089_v62 }
 0x562   : > { %3930 = shalt.err (!%p3927_p11)
}
 0x563   : > { %3437 = dma.vmem_to_hbm [thread:$0]  (%p4192_p2), %s3146_s27, 2048, %s3148_s17, %s3112_s21, %s4010_s8, %s4010_s8, %s4011_s6  }
 0x564 PF: > { %s6683_s30 = sld [smem:[#allocation21_spill]]  ;;  %p3458_p12 = pnand %p3357_p10, %p4139_p5 }
 0x566   : > { %p3459_p13 = pneg %p3458_p12 }
 0x56a   : > { %s3162_s29 = sand.u32 1, %s6683_s30  }
 0x56b   : > { %s3163_s26 = scalar_lea.sflag [#allocation6], %s3162_s29 }
 0x56c   : > { %3968 = dma.done.wait (%p3459_p13), %s3163_s26, 2048  }
 0x56d   : > { %3970 = vsyncadd (%p3459_p13), %s3163_s26, 4294965248  ;;  %s3173_s18 = scalar_lea.sflag [#allocation15], %s3162_s29 }
 0x56e   : > { %3972 = dma.done.wait (%p3459_p13), %s3173_s18, 2048  }
 0x56f   : > { %3974 = vsyncadd (%p3459_p13), %s3173_s18, 4294965248  ;;  %s37_s23 = sadd.s32 1, %s3997_s23   ;;  %s6685_s18 = smov %s3981_s19 }
 0x570   : > { %p34_p0 = scmp.ge.s32.totalorder %s37_s23, 4   ;;  %s6686_s19 = smov %s3985_s20 }
 0x571   : > { %s6687_s20 = smov %s4202_s25  ;;  %s6688_s21 = smov %s3993_s22 }
 0x572   : > { %s6689_s22 = smov %s6691_s28  ;;  %36 = sbr.rel (!%p34_p0) target bundleno = 20 (0x14), region = 168 }
 0x577   :  { %3179 = vsyncpa [#allocation5], 1 }
 0x578   :  { %3181 = vsyncpa [#allocation5 + $0x1], 1 }
 0x579   :  { %3182 = vsyncpa [#allocation8], 1 }
 0x57a   :  { %3183 = vsyncpa [#allocation11], 1 }
 0x57b   :  { %3184 = vsyncpa [#allocation6], 1 }
 0x57c   :  { %3186 = vsyncpa [#allocation6 + $0x1], 1 }
 0x57d   :  { %3187 = vsyncpa [#allocation15], 1 }
 0x57e   :  { %3189 = vsyncpa [#allocation15 + $0x1], 1 }

</bundles_post_ra>
